<compile_context>
chip_gen: v7x
topology: tpu7x:2x2x1
jax: 0.10.0
libtpu: 0.0.40
codegen_flags: <defaults>
</compile_context>

<pallas_src>
import jax
import jax.numpy as jnp
from jax import lax
from jax.experimental import pallas as pl
from jax.experimental.pallas import tpu as pltpu


# --------------------------------------------------------------------------
# Fully fused kernel: 1x1 projections + six FR blocks + both cross-attentions
# + residual mix + 3x3 conv_cat + BatchNorm(eval) + ReLU, per batch element.
# --------------------------------------------------------------------------
def _make_fused_kernel(C, H, W):
    HW = H * W
    W1 = W + 1                    # left/right zero pad of the flattened axis
    inv_c = 1.0 / C
    inv_w = 1.0 / W
    inv_h = 1.0 / H
    scale = float(W)              # logits = W identical terms = W * q_g * k_g
    f32 = jnp.float32

    def rank1_attn(qg, kg, vg):
        # qg/kg/vg: (S, C).  Row-wise softmax of rank-1 logits, weighted sum.
        logits = scale * qg[:, :, None] * kg[:, None, :]            # (S, C, C)
        m = jnp.max(logits, axis=-1, keepdims=True)
        e = jnp.exp(logits - m)
        den = jnp.sum(e, axis=-1)                                   # (S, C)
        num = jnp.sum(e * vg[:, None, :], axis=-1)                  # (S, C)
        return num * pl.reciprocal(den, approx=True)

    def kernel(x1_ref, x2_ref, w1_ref, b1_ref, w2_ref, b2_ref,
               srow_ref, scol_ref, cmax_ref, cmean_ref,
               gb_ref, wcflat_ref, maskw_ref, bns_ref, bnt_ref,
               o_ref, z_ref):
        srow = srow_ref[...]                                        # (H, HW) 0/1
        scol = scol_ref[...]                                        # (HW, W) 0/1
        x1 = x1_ref[0]                                              # (C, HW)
        x2 = x2_ref[0]

        # Stacked 1x1 projections: rows [q; k; v] for each input.
        y1 = jnp.dot(w1_ref[...], x1, preferred_element_type=f32) + b1_ref[...]
        y2 = jnp.dot(w2_ref[...], x2, preferred_element_type=f32) + b2_ref[...]

        fh = []   # per group: (H, C)
        fw = []   # per group: (W, C)
        for g in range(6):                    # 0..2: q1,k1,v1   3..5: q2,k2,v2
            y = y1 if g < 3 else y2
            t = g % 3
            yt = y[t * C:(t + 1) * C]                               # (C, HW)

            # channel max / mean per spatial position
            mx = jnp.max(yt, axis=0, keepdims=True)                 # (1, HW)
            mn = jnp.sum(yt, axis=0, keepdims=True) * inv_c         # (1, HW)

            # 7x7 FR conv: two dense (HW, HW) matmuls (precomputed on host)
            sc_flat = (jnp.dot(mx, cmax_ref[g], preferred_element_type=f32) +
                       jnp.dot(mn, cmean_ref[g], preferred_element_type=f32))
            # flattened -> (H, W) via selector matmul (no in-kernel relayout)
            sc2d = jnp.dot(srow * sc_flat, scol,
                           preferred_element_type=f32)              # (H, W)

            # average pools via selector matmuls
            f_w = jnp.dot(yt, scol, preferred_element_type=f32) * inv_h   # (C, W)
            f_hT = lax.dot_general(srow, yt, (((1,), (1,)), ((), ())),
                                   preferred_element_type=f32) * inv_w    # (H, C)

            # w_attention (softmax over W) / h_attention (softmax over H)
            m1 = jnp.max(sc2d, axis=1, keepdims=True)
            e1 = jnp.exp(sc2d - m1)
            p_wa = e1 * pl.reciprocal(jnp.sum(e1, axis=1, keepdims=True),
                                      approx=True)                  # (H, W)
            m0 = jnp.max(sc2d, axis=0, keepdims=True)
            e0 = jnp.exp(sc2d - m0)
            p_ha = e0 * pl.reciprocal(jnp.sum(e0, axis=0, keepdims=True),
                                      approx=True)                  # (H, W)

            # fh[h,c] = sum_w p_wa[h,w] * f_wxc[w,c]
            fh.append(lax.dot_general(p_wa, f_w, (((1,), (1,)), ((), ())),
                                      preferred_element_type=f32))  # (H, C)
            # fw[w,c] = sum_h p_ha[h,w] * f_hxc[h,c]
            fw.append(lax.dot_general(p_ha, f_hT, (((0,), (0,)), ((), ())),
                                      preferred_element_type=f32))  # (W, C)

        # attention 1: Q=FR(q2)=g3, K=FR(k1)=g1, V=FR(v1)=g2
        op1 = rank1_attn(fh[3], fh[1], fh[2]) + rank1_attn(fw[3], fw[1], fw[2])
        # attention 2: Q=FR(q1)=g0, K=FR(k2)=g4, V=FR(v2)=g5
        op2 = rank1_attn(fh[0], fh[4], fh[5]) + rank1_attn(fw[0], fw[4], fw[5])

        # ---------------- conv_cat stage (same grid step, all in VMEM) -------
        gamma = gb_ref[0]
        beta = gb_ref[1]

        # broadcast the (H, C) attention summaries over w -> (C, HW)
        o1b = lax.dot_general(op1, srow, (((0,), (0,)), ((), ())),
                              preferred_element_type=f32)
        o2b = lax.dot_general(op2, srow, (((0,), (0,)), ((), ())),
                              preferred_element_type=f32)

        # z = cat(out1, out2) in a zero-padded flattened VMEM scratch
        z_ref[:, pl.ds(0, W1)] = jnp.zeros((2 * C, W1), f32)
        z_ref[:, pl.ds(W1 + HW, W1)] = jnp.zeros((2 * C, W1), f32)
        z_ref[pl.ds(0, C), pl.ds(W1, HW)] = gamma * o1b + x1
        z_ref[pl.ds(C, C), pl.ds(W1, HW)] = beta * o2b + x2

        # 3x3 conv as ONE matmul: stack the 9 masked shifted slices along
        # sublanes (9*2C contraction) against the host-flattened weight.
        parts = []
        for kh in range(3):
            for kw in range(3):
                zs = z_ref[:, pl.ds(kh * W + kw, HW)]               # (2C, HW)
                if kw != 1:                                         # kill row wrap
                    zs = zs * maskw_ref[pl.ds(kw, 1), :]
                parts.append(zs)
        zstack = jnp.concatenate(parts, axis=0)                     # (9*2C, HW)
        acc = jnp.dot(wcflat_ref[...], zstack,
                      preferred_element_type=f32)                   # (C, HW)

        y = acc * bns_ref[...] + bnt_ref[...]                       # BN (eval)
        o_ref[0] = jnp.maximum(y, 0.0)                              # ReLU

    return kernel


# --------------------------------------------------------------------------
# Full CrossAtt forward (single pallas_call)
# --------------------------------------------------------------------------
def cross_att_forward(p, x1, x2):
    B, C, H, W = x1.shape
    assert H == W, "FR_block concat requires H == W (as in the torch module)"
    HW = H * W
    f32 = jnp.float32

    x1f = x1.reshape(B, C, HW).astype(f32)
    x2f = x2.reshape(B, C, HW).astype(f32)

    # Stacked projection weights/biases: rows [q; k; v] per input.
    w1 = jnp.concatenate([p["w_q1"], p["w_k1"], p["w_v1"]], axis=0)       # (3C, C)
    b1 = jnp.concatenate([p["b_q1"], p["b_k1"], p["b_v1"]], axis=0).reshape(3 * C, 1)
    w2 = jnp.concatenate([p["w_q2"], p["w_k2"], p["w_v2"]], axis=0)
    b2 = jnp.concatenate([p["b_q2"], p["b_k2"], p["b_v2"]], axis=0).reshape(3 * C, 1)

    # 0/1 selector matrices (row / column membership of the flattened axis).
    pp = jnp.arange(HW)
    srow = (pp[None, :] // W == jnp.arange(H)[:, None]).astype(f32)       # (H, HW)
    scol = (pp[:, None] % W == jnp.arange(W)[None, :]).astype(f32)        # (HW, W)

    # Dense (HW, HW) matrices implementing the 7x7 FR conv (zero padding baked
    # in), one per group per pooled channel {max, mean}:
    #   cmax[g][p, q] = K_g[0, hi-ho+3, wi-wo+3]  (p=(hi,wi) input, q=(ho,wo) output)
    frw = jnp.stack([p["fr_q1"], p["fr_k1"], p["fr_v1"],
                     p["fr_q2"], p["fr_k2"], p["fr_v2"]], axis=0)         # (6,2,7,7)
    hi = jnp.arange(H).reshape(H, 1, 1, 1)
    wi = jnp.arange(W).reshape(1, W, 1, 1)
    ho = jnp.arange(H).reshape(1, 1, H, 1)
    wo = jnp.arange(W).reshape(1, 1, 1, W)
    kh = jnp.broadcast_to(hi - ho + 3, (H, W, H, W))
    kw = jnp.broadcast_to(wi - wo + 3, (H, W, H, W))
    valid = ((kh >= 0) & (kh < 7) & (kw >= 0) & (kw < 7)).astype(f32)
    band = frw[:, :, jnp.clip(kh, 0, 6), jnp.clip(kw, 0, 6)] * valid      # (6,2,H,W,H,W)
    band = band.reshape(6, 2, HW, HW)
    cmax, cmean = band[:, 0], band[:, 1]                                  # (6, HW, HW)

    # conv_cat weights flattened for a single stacked matmul: (C, 9*2C),
    # column order = tap-major (kh, kw), then input channel.
    wc9 = jnp.transpose(p["w_cat"], (2, 3, 0, 1)).reshape(9, C, 2 * C)
    wcflat = jnp.transpose(wc9, (1, 0, 2)).reshape(C, 9 * 2 * C)

    wmod = pp % W
    maskw = jnp.stack([wmod != 0,
                       jnp.ones((HW,), dtype=jnp.bool_),
                       wmod != W - 1]).astype(f32)                        # (3, HW)
    gb = jnp.stack([p["gamma"][0], p["beta"][0]]).astype(f32)             # (2,)

    feat = pl.pallas_call(
        _make_fused_kernel(C, H, W),
        out_shape=jax.ShapeDtypeStruct((B, C, HW), f32),
        grid=(B,),
        in_specs=[
            pl.BlockSpec((1, C, HW), lambda b: (b, 0, 0)),                # x1
            pl.BlockSpec((1, C, HW), lambda b: (b, 0, 0)),                # x2
            pl.BlockSpec((3 * C, C), lambda b: (0, 0)),                   # w1
            pl.BlockSpec((3 * C, 1), lambda b: (0, 0)),                   # b1
            pl.BlockSpec((3 * C, C), lambda b: (0, 0)),                   # w2
            pl.BlockSpec((3 * C, 1), lambda b: (0, 0)),                   # b2
            pl.BlockSpec((H, HW), lambda b: (0, 0)),                      # srow
            pl.BlockSpec((HW, W), lambda b: (0, 0)),                      # scol
            pl.BlockSpec((6, HW, HW), lambda b: (0, 0, 0)),               # cmax
            pl.BlockSpec((6, HW, HW), lambda b: (0, 0, 0)),               # cmean
            pl.BlockSpec(memory_space=pltpu.MemorySpace.SMEM),            # gamma,beta
            pl.BlockSpec((C, 9 * 2 * C), lambda b: (0, 0)),               # wcflat
            pl.BlockSpec((3, HW), lambda b: (0, 0)),                      # maskw
            pl.BlockSpec((C, 1), lambda b: (0, 0)),                       # bn_scale
            pl.BlockSpec((C, 1), lambda b: (0, 0)),                       # bn_shift
        ],
        out_specs=pl.BlockSpec((1, C, HW), lambda b: (b, 0, 0)),
        scratch_shapes=[pltpu.VMEM((2 * C, HW + 2 * (W + 1)), f32)],
        compiler_params=pltpu.CompilerParams(
            dimension_semantics=("parallel",)),
    )(x1f, x2f, w1, b1, w2, b2, srow, scol, cmax, cmean, gb,
      wcflat, maskw, p["bn_scale"].reshape(C, 1), p["bn_shift"].reshape(C, 1))

    return feat.reshape(B, C, H, W)


# --------------------------------------------------------------------------
# Deterministic parameter init (shapes from the module's __init__)
# --------------------------------------------------------------------------
def init_params(key, C):
    ks = iter(jax.random.split(key, 20))

    def rnd(shape, scale):
        return (scale * jax.random.normal(next(ks), shape)).astype(jnp.float32)

    p = {}
    for name in ("q1", "k1", "v1", "q2", "k2", "v2"):
        p[f"w_{name}"] = rnd((C, C), 0.2)       # 1x1 conv weight (C_out, C_in)
        p[f"b_{name}"] = rnd((C,), 0.1)
    for name in ("q1", "q2", "k1", "k2", "v1", "v2"):
        p[f"fr_{name}"] = rnd((2, 7, 7), 0.1)   # FR avg_max_conv weight
    # torch inits gamma/beta to 0; nonzero values exercise the full fused path.
    p["gamma"] = jnp.full((1,), 0.3, jnp.float32)
    p["beta"] = jnp.full((1,), -0.2, jnp.float32)
    p["w_cat"] = rnd((C, 2 * C, 3, 3), 0.1)
    # BatchNorm2d default init (weight=1, bias=0, running stats 0/1), eval mode.
    # TODO(synk): training-mode BatchNorm (batch statistics) is not implemented;
    # eval-mode running statistics are used instead.
    eps = 1e-5
    bn_w = jnp.ones((C,), jnp.float32)
    bn_b = jnp.zeros((C,), jnp.float32)
    run_m = jnp.zeros((C,), jnp.float32)
    run_v = jnp.ones((C,), jnp.float32)
    p["bn_scale"] = bn_w / jnp.sqrt(run_v + eps)
    p["bn_shift"] = bn_b - run_m * p["bn_scale"]
    return p


# --------------------------------------------------------------------------
# Pure-JAX reference (mirrors the PyTorch forward) for a numerical check
# --------------------------------------------------------------------------
def reference_forward(p, x1, x2):
    P = lax.Precision.HIGHEST

    def pw(x, w, b):
        return jnp.einsum("oc,bchw->bohw", w, x, precision=P) + b[None, :, None, None]

    def fr(x, w_conv):
        B, C, H, W = x.shape
        mx = jnp.max(x, axis=1, keepdims=True)
        mn = jnp.mean(x, axis=1, keepdims=True)
        pool = jnp.concatenate([mx, mn], axis=1)
        sc = lax.conv_general_dilated(pool, w_conv[None], (1, 1), ((3, 3), (3, 3)),
                                      dimension_numbers=("NCHW", "OIHW", "NCHW"),
                                      precision=P)[:, 0]                  # (B,H,W)
        w_att = jax.nn.softmax(sc, axis=2)
        h_att = jax.nn.softmax(jnp.transpose(sc, (0, 2, 1)), axis=2)
        f_hxc = jnp.transpose(jnp.mean(x, axis=3), (0, 2, 1))             # (B,H,C)
        f_wxc = jnp.transpose(jnp.mean(x, axis=2), (0, 2, 1))             # (B,W,C)
        fh = jnp.einsum("bhw,bwc->bhc", w_att, f_wxc, precision=P)
        fw = jnp.einsum("bwh,bhc->bwc", h_att, f_hxc, precision=P)
        fh_out = jnp.broadcast_to(fh[:, :, :, None], (B, H, C, W))
        fw_out = jnp.broadcast_to(fw[:, :, :, None], (B, W, C, H))
        return jnp.concatenate([fh_out, fw_out], axis=1)                  # (B,2H,C,W)

    def attend(qf, kf, vf):
        attn = jnp.einsum("bscw,bsdw->bscd", qf, kf, precision=P)
        attn = jax.nn.softmax(attn, axis=-1)
        out = jnp.einsum("bscd,bsdw->bscw", attn, vf, precision=P)
        out = jnp.transpose(out, (0, 2, 1, 3))                            # (B,C,2H,W)
        Hh = out.shape[2] // 2
        return out[:, :, :Hh] + out[:, :, Hh:]

    q1 = pw(x1, p["w_q1"], p["b_q1"]); k1 = pw(x1, p["w_k1"], p["b_k1"])
    v1 = pw(x1, p["w_v1"], p["b_v1"]); q2 = pw(x2, p["w_q2"], p["b_q2"])
    k2 = pw(x2, p["w_k2"], p["b_k2"]); v2 = pw(x2, p["w_v2"], p["b_v2"])

    out1_pre = attend(fr(q2, p["fr_q2"]), fr(k1, p["fr_k1"]), fr(v1, p["fr_v1"]))
    out2_pre = attend(fr(q1, p["fr_q1"]), fr(k2, p["fr_k2"]), fr(v2, p["fr_v2"]))
    out1 = p["gamma"][0] * out1_pre + x1
    out2 = p["beta"][0] * out2_pre + x2
    cat = jnp.concatenate([out1, out2], axis=1)
    y = lax.conv_general_dilated(cat, p["w_cat"], (1, 1), ((1, 1), (1, 1)),
                                 dimension_numbers=("NCHW", "OIHW", "NCHW"),
                                 precision=P)
    y = y * p["bn_scale"][None, :, None, None] + p["bn_shift"][None, :, None, None]
    return jnp.maximum(y, 0.0)


if __name__ == "__main__":
    B, C, H, W = 2, 8, 8, 8
    key = jax.random.PRNGKey(0)
    kx1, kx2, kp = jax.random.split(key, 3)
    x1 = jax.random.normal(kx1, (B, C, H, W), jnp.float32)
    x2 = jax.random.normal(kx2, (B, C, H, W), jnp.float32)
    params = init_params(kp, C)

    feat = jax.block_until_ready(jax.jit(cross_att_forward)(params, x1, x2))

    rfeat = jax.jit(reference_forward)(params, x1, x2)
    err = float(jnp.max(jnp.abs(feat - rfeat)))
    if not bool(jnp.allclose(feat, rfeat, atol=2e-2, rtol=2e-2)):
        raise AssertionError(f"feat_sum mismatch vs reference: max abs err = {err}")

    print("KERNEL_OK")
</pallas_src>

<mosaic_0001>
module attributes {stable_mosaic.version = 11 : i64} {
  func.func @kernel(%arg0: i32, %arg1: memref<1x8x64xf32, #tpu.memory_space<vmem>>, %arg2: memref<1x8x64xf32, #tpu.memory_space<vmem>>, %arg3: memref<24x8xf32, #tpu.memory_space<vmem>>, %arg4: memref<24x1xf32, #tpu.memory_space<vmem>>, %arg5: memref<24x8xf32, #tpu.memory_space<vmem>>, %arg6: memref<24x1xf32, #tpu.memory_space<vmem>>, %arg7: memref<8x64xf32, #tpu.memory_space<vmem>>, %arg8: memref<64x8xf32, #tpu.memory_space<vmem>>, %arg9: memref<6x64x64xf32, #tpu.memory_space<vmem>>, %arg10: memref<6x64x64xf32, #tpu.memory_space<vmem>>, %arg11: memref<2xf32, #tpu.memory_space<smem>>, %arg12: memref<8x144xf32, #tpu.memory_space<vmem>>, %arg13: memref<3x64xf32, #tpu.memory_space<vmem>>, %arg14: memref<8x1xf32, #tpu.memory_space<vmem>>, %arg15: memref<8x1xf32, #tpu.memory_space<vmem>>, %arg16: memref<1x8x64xf32, #tpu.memory_space<vmem>>, %arg17: memref<16x82xf32, #tpu.memory_space<vmem>>) attributes {dimension_semantics = [#tpu.dimension_semantics<parallel>], iteration_bounds = array<i64: 2>, scalar_prefetch = 0 : i64, scratch_operands = 1 : i64, tpu.core_type = #tpu.core_type<tc>, window_params = [{transform_indices = @transform_0, window_bounds = array<i64: 1, 8, 64>}, {transform_indices = @transform_1, window_bounds = array<i64: 1, 8, 64>}, {pipeline_mode = #tpu.pipeline_mode<synchronous>, transform_indices = @transform_2, window_bounds = array<i64: 24, 8>}, {pipeline_mode = #tpu.pipeline_mode<synchronous>, transform_indices = @transform_3, window_bounds = array<i64: 24, 1>}, {pipeline_mode = #tpu.pipeline_mode<synchronous>, transform_indices = @transform_4, window_bounds = array<i64: 24, 8>}, {pipeline_mode = #tpu.pipeline_mode<synchronous>, transform_indices = @transform_5, window_bounds = array<i64: 24, 1>}, {pipeline_mode = #tpu.pipeline_mode<synchronous>, transform_indices = @transform_6, window_bounds = array<i64: 8, 64>}, {pipeline_mode = #tpu.pipeline_mode<synchronous>, transform_indices = @transform_7, window_bounds = array<i64: 64, 8>}, {pipeline_mode = #tpu.pipeline_mode<synchronous>, transform_indices = @transform_8, window_bounds = array<i64: 6, 64, 64>}, {pipeline_mode = #tpu.pipeline_mode<synchronous>, transform_indices = @transform_9, window_bounds = array<i64: 6, 64, 64>}, {transform_indices = @transform_10, window_bounds = array<i64: 2>}, {pipeline_mode = #tpu.pipeline_mode<synchronous>, transform_indices = @transform_11, window_bounds = array<i64: 8, 144>}, {pipeline_mode = #tpu.pipeline_mode<synchronous>, transform_indices = @transform_12, window_bounds = array<i64: 3, 64>}, {pipeline_mode = #tpu.pipeline_mode<synchronous>, transform_indices = @transform_13, window_bounds = array<i64: 8, 1>}, {pipeline_mode = #tpu.pipeline_mode<synchronous>, transform_indices = @transform_14, window_bounds = array<i64: 8, 1>}, {transform_indices = @transform_15, window_bounds = array<i64: 1, 8, 64>}]} {
    %c0 = arith.constant 0 : index
    %c0_0 = arith.constant 0 : index
    %0 = vector.load %arg7[%c0, %c0_0] : memref<8x64xf32, #tpu.memory_space<vmem>>, vector<8x64xf32>
    %c0_1 = arith.constant 0 : index
    %c0_2 = arith.constant 0 : index
    %1 = vector.load %arg8[%c0_1, %c0_2] : memref<64x8xf32, #tpu.memory_space<vmem>>, vector<64x8xf32>
    %c0_3 = arith.constant 0 : index
    %c0_4 = arith.constant 0 : index
    %c0_5 = arith.constant 0 : index
    %2 = vector.load %arg1[%c0_3, %c0_4, %c0_5] : memref<1x8x64xf32, #tpu.memory_space<vmem>>, vector<1x8x64xf32>
    %3 = vector.shape_cast %2 : vector<1x8x64xf32> to vector<8x64xf32>
    %c0_6 = arith.constant 0 : index
    %c0_7 = arith.constant 0 : index
    %c0_8 = arith.constant 0 : index
    %4 = vector.load %arg2[%c0_6, %c0_7, %c0_8] : memref<1x8x64xf32, #tpu.memory_space<vmem>>, vector<1x8x64xf32>
    %5 = vector.shape_cast %4 : vector<1x8x64xf32> to vector<8x64xf32>
    %c0_9 = arith.constant 0 : index
    %c0_10 = arith.constant 0 : index
    %6 = vector.load %arg3[%c0_9, %c0_10] : memref<24x8xf32, #tpu.memory_space<vmem>>, vector<24x8xf32>
    %cst = arith.constant dense<0.000000e+00> : vector<24x64xf32>
    %7 = tpu.matmul %6, %3, %cst {dimension_numbers = #tpu.dot_dimension_numbers<[1], [0], [0], [1], [0, 0, 1, 1], [], []>} : vector<24x8xf32>, vector<8x64xf32>, vector<24x64xf32> -> vector<24x64xf32>
    %c0_11 = arith.constant 0 : index
    %c0_12 = arith.constant 0 : index
    %8 = vector.load %arg4[%c0_11, %c0_12] : memref<24x1xf32, #tpu.memory_space<vmem>>, vector<24x1xf32>
    %9 = vector.broadcast %8 : vector<24x1xf32> to vector<24x64xf32>
    %10 = arith.addf %7, %9 : vector<24x64xf32>
    %c0_13 = arith.constant 0 : index
    %c0_14 = arith.constant 0 : index
    %11 = vector.load %arg5[%c0_13, %c0_14] : memref<24x8xf32, #tpu.memory_space<vmem>>, vector<24x8xf32>
    %cst_15 = arith.constant dense<0.000000e+00> : vector<24x64xf32>
    %12 = tpu.matmul %11, %5, %cst_15 {dimension_numbers = #tpu.dot_dimension_numbers<[1], [0], [0], [1], [0, 0, 1, 1], [], []>} : vector<24x8xf32>, vector<8x64xf32>, vector<24x64xf32> -> vector<24x64xf32>
    %c0_16 = arith.constant 0 : index
    %c0_17 = arith.constant 0 : index
    %13 = vector.load %arg6[%c0_16, %c0_17] : memref<24x1xf32, #tpu.memory_space<vmem>>, vector<24x1xf32>
    %14 = vector.broadcast %13 : vector<24x1xf32> to vector<24x64xf32>
    %15 = arith.addf %12, %14 : vector<24x64xf32>
    %16 = vector.extract_strided_slice %10 {offsets = [0, 0], sizes = [8, 64], strides = [1, 1]} : vector<24x64xf32> to vector<8x64xf32>
    %cst_18 = arith.constant dense<0xFF800000> : vector<64xf32>
    %17 = vector.multi_reduction <maximumf>, %16, %cst_18 [0] : vector<8x64xf32> to vector<64xf32>
    %18 = vector.shape_cast %17 : vector<64xf32> to vector<1x64xf32>
    %cst_19 = arith.constant dense<0.000000e+00> : vector<64xf32>
    %19 = vector.multi_reduction <add>, %16, %cst_19 [0] : vector<8x64xf32> to vector<64xf32>
    %20 = vector.shape_cast %19 : vector<64xf32> to vector<1x64xf32>
    %cst_20 = arith.constant 1.250000e-01 : f32
    %21 = vector.broadcast %cst_20 : f32 to vector<1x64xf32>
    %22 = arith.mulf %20, %21 : vector<1x64xf32>
    %c0_21 = arith.constant 0 : index
    %c0_22 = arith.constant 0 : index
    %c0_23 = arith.constant 0 : index
    %23 = vector.load %arg9[%c0_21, %c0_22, %c0_23] : memref<6x64x64xf32, #tpu.memory_space<vmem>>, vector<1x64x64xf32>
    %24 = vector.shape_cast %23 : vector<1x64x64xf32> to vector<64x64xf32>
    %cst_24 = arith.constant dense<0.000000e+00> : vector<1x64xf32>
    %25 = tpu.matmul %18, %24, %cst_24 {dimension_numbers = #tpu.dot_dimension_numbers<[1], [0], [0], [1], [0, 0, 1, 1], [], []>} : vector<1x64xf32>, vector<64x64xf32>, vector<1x64xf32> -> vector<1x64xf32>
    %c0_25 = arith.constant 0 : index
    %c0_26 = arith.constant 0 : index
    %c0_27 = arith.constant 0 : index
    %26 = vector.load %arg10[%c0_25, %c0_26, %c0_27] : memref<6x64x64xf32, #tpu.memory_space<vmem>>, vector<1x64x64xf32>
    %27 = vector.shape_cast %26 : vector<1x64x64xf32> to vector<64x64xf32>
    %cst_28 = arith.constant dense<0.000000e+00> : vector<1x64xf32>
    %28 = tpu.matmul %22, %27, %cst_28 {dimension_numbers = #tpu.dot_dimension_numbers<[1], [0], [0], [1], [0, 0, 1, 1], [], []>} : vector<1x64xf32>, vector<64x64xf32>, vector<1x64xf32> -> vector<1x64xf32>
    %29 = arith.addf %25, %28 : vector<1x64xf32>
    %30 = vector.broadcast %29 : vector<1x64xf32> to vector<8x64xf32>
    %31 = arith.mulf %0, %30 : vector<8x64xf32>
    %cst_29 = arith.constant dense<0.000000e+00> : vector<8x8xf32>
    %32 = tpu.matmul %31, %1, %cst_29 {dimension_numbers = #tpu.dot_dimension_numbers<[1], [0], [0], [1], [0, 0, 1, 1], [], []>} : vector<8x64xf32>, vector<64x8xf32>, vector<8x8xf32> -> vector<8x8xf32>
    %cst_30 = arith.constant dense<0.000000e+00> : vector<8x8xf32>
    %33 = tpu.matmul %16, %1, %cst_30 {dimension_numbers = #tpu.dot_dimension_numbers<[1], [0], [0], [1], [0, 0, 1, 1], [], []>} : vector<8x64xf32>, vector<64x8xf32>, vector<8x8xf32> -> vector<8x8xf32>
    %cst_31 = arith.constant 1.250000e-01 : f32
    %34 = vector.broadcast %cst_31 : f32 to vector<8x8xf32>
    %35 = arith.mulf %33, %34 : vector<8x8xf32>
    %cst_32 = arith.constant dense<0.000000e+00> : vector<8x8xf32>
    %36 = tpu.matmul %0, %16, %cst_32 {dimension_numbers = #tpu.dot_dimension_numbers<[1], [1], [0], [0], [0, 0, 1, 0], [], []>} : vector<8x64xf32>, vector<8x64xf32>, vector<8x8xf32> -> vector<8x8xf32>
    %cst_33 = arith.constant 1.250000e-01 : f32
    %37 = vector.broadcast %cst_33 : f32 to vector<8x8xf32>
    %38 = arith.mulf %36, %37 : vector<8x8xf32>
    %cst_34 = arith.constant dense<0xFF800000> : vector<8xf32>
    %39 = vector.multi_reduction <maximumf>, %32, %cst_34 [1] : vector<8x8xf32> to vector<8xf32>
    %40 = vector.shape_cast %39 : vector<8xf32> to vector<8x1xf32>
    %41 = vector.broadcast %40 : vector<8x1xf32> to vector<8x8xf32>
    %42 = arith.subf %32, %41 : vector<8x8xf32>
    %43 = math.exp %42 : vector<8x8xf32>
    %cst_35 = arith.constant dense<0.000000e+00> : vector<8xf32>
    %44 = vector.multi_reduction <add>, %43, %cst_35 [1] : vector<8x8xf32> to vector<8xf32>
    %45 = vector.shape_cast %44 : vector<8xf32> to vector<8x1xf32>
    %46 = tpu.reciprocal %45 {approx = true} : vector<8x1xf32> -> vector<8x1xf32>
    %47 = vector.broadcast %46 : vector<8x1xf32> to vector<8x8xf32>
    %48 = arith.mulf %43, %47 : vector<8x8xf32>
    %cst_36 = arith.constant dense<0xFF800000> : vector<8xf32>
    %49 = vector.multi_reduction <maximumf>, %32, %cst_36 [0] : vector<8x8xf32> to vector<8xf32>
    %50 = vector.shape_cast %49 : vector<8xf32> to vector<1x8xf32>
    %51 = vector.broadcast %50 : vector<1x8xf32> to vector<8x8xf32>
    %52 = arith.subf %32, %51 : vector<8x8xf32>
    %53 = math.exp %52 : vector<8x8xf32>
    %cst_37 = arith.constant dense<0.000000e+00> : vector<8xf32>
    %54 = vector.multi_reduction <add>, %53, %cst_37 [0] : vector<8x8xf32> to vector<8xf32>
    %55 = vector.shape_cast %54 : vector<8xf32> to vector<1x8xf32>
    %56 = tpu.reciprocal %55 {approx = true} : vector<1x8xf32> -> vector<1x8xf32>
    %57 = vector.broadcast %56 : vector<1x8xf32> to vector<8x8xf32>
    %58 = arith.mulf %53, %57 : vector<8x8xf32>
    %cst_38 = arith.constant dense<0.000000e+00> : vector<8x8xf32>
    %59 = tpu.matmul %48, %35, %cst_38 {dimension_numbers = #tpu.dot_dimension_numbers<[1], [1], [0], [0], [0, 0, 1, 0], [], []>} : vector<8x8xf32>, vector<8x8xf32>, vector<8x8xf32> -> vector<8x8xf32>
    %cst_39 = arith.constant dense<0.000000e+00> : vector<8x8xf32>
    %60 = tpu.matmul %58, %38, %cst_39 {dimension_numbers = #tpu.dot_dimension_numbers<[0], [0], [1], [1], [0, 1, 1, 1], [], []>} : vector<8x8xf32>, vector<8x8xf32>, vector<8x8xf32> -> vector<8x8xf32>
    %61 = vector.extract_strided_slice %10 {offsets = [8, 0], sizes = [8, 64], strides = [1, 1]} : vector<24x64xf32> to vector<8x64xf32>
    %cst_40 = arith.constant dense<0xFF800000> : vector<64xf32>
    %62 = vector.multi_reduction <maximumf>, %61, %cst_40 [0] : vector<8x64xf32> to vector<64xf32>
    %63 = vector.shape_cast %62 : vector<64xf32> to vector<1x64xf32>
    %cst_41 = arith.constant dense<0.000000e+00> : vector<64xf32>
    %64 = vector.multi_reduction <add>, %61, %cst_41 [0] : vector<8x64xf32> to vector<64xf32>
    %65 = vector.shape_cast %64 : vector<64xf32> to vector<1x64xf32>
    %cst_42 = arith.constant 1.250000e-01 : f32
    %66 = vector.broadcast %cst_42 : f32 to vector<1x64xf32>
    %67 = arith.mulf %65, %66 : vector<1x64xf32>
    %c1 = arith.constant 1 : index
    %c0_43 = arith.constant 0 : index
    %c0_44 = arith.constant 0 : index
    %68 = vector.load %arg9[%c1, %c0_43, %c0_44] : memref<6x64x64xf32, #tpu.memory_space<vmem>>, vector<1x64x64xf32>
    %69 = vector.shape_cast %68 : vector<1x64x64xf32> to vector<64x64xf32>
    %cst_45 = arith.constant dense<0.000000e+00> : vector<1x64xf32>
    %70 = tpu.matmul %63, %69, %cst_45 {dimension_numbers = #tpu.dot_dimension_numbers<[1], [0], [0], [1], [0, 0, 1, 1], [], []>} : vector<1x64xf32>, vector<64x64xf32>, vector<1x64xf32> -> vector<1x64xf32>
    %c1_46 = arith.constant 1 : index
    %c0_47 = arith.constant 0 : index
    %c0_48 = arith.constant 0 : index
    %71 = vector.load %arg10[%c1_46, %c0_47, %c0_48] : memref<6x64x64xf32, #tpu.memory_space<vmem>>, vector<1x64x64xf32>
    %72 = vector.shape_cast %71 : vector<1x64x64xf32> to vector<64x64xf32>
    %cst_49 = arith.constant dense<0.000000e+00> : vector<1x64xf32>
    %73 = tpu.matmul %67, %72, %cst_49 {dimension_numbers = #tpu.dot_dimension_numbers<[1], [0], [0], [1], [0, 0, 1, 1], [], []>} : vector<1x64xf32>, vector<64x64xf32>, vector<1x64xf32> -> vector<1x64xf32>
    %74 = arith.addf %70, %73 : vector<1x64xf32>
    %75 = vector.broadcast %74 : vector<1x64xf32> to vector<8x64xf32>
    %76 = arith.mulf %0, %75 : vector<8x64xf32>
    %cst_50 = arith.constant dense<0.000000e+00> : vector<8x8xf32>
    %77 = tpu.matmul %76, %1, %cst_50 {dimension_numbers = #tpu.dot_dimension_numbers<[1], [0], [0], [1], [0, 0, 1, 1], [], []>} : vector<8x64xf32>, vector<64x8xf32>, vector<8x8xf32> -> vector<8x8xf32>
    %cst_51 = arith.constant dense<0.000000e+00> : vector<8x8xf32>
    %78 = tpu.matmul %61, %1, %cst_51 {dimension_numbers = #tpu.dot_dimension_numbers<[1], [0], [0], [1], [0, 0, 1, 1], [], []>} : vector<8x64xf32>, vector<64x8xf32>, vector<8x8xf32> -> vector<8x8xf32>
    %cst_52 = arith.constant 1.250000e-01 : f32
    %79 = vector.broadcast %cst_52 : f32 to vector<8x8xf32>
    %80 = arith.mulf %78, %79 : vector<8x8xf32>
    %cst_53 = arith.constant dense<0.000000e+00> : vector<8x8xf32>
    %81 = tpu.matmul %0, %61, %cst_53 {dimension_numbers = #tpu.dot_dimension_numbers<[1], [1], [0], [0], [0, 0, 1, 0], [], []>} : vector<8x64xf32>, vector<8x64xf32>, vector<8x8xf32> -> vector<8x8xf32>
    %cst_54 = arith.constant 1.250000e-01 : f32
    %82 = vector.broadcast %cst_54 : f32 to vector<8x8xf32>
    %83 = arith.mulf %81, %82 : vector<8x8xf32>
    %cst_55 = arith.constant dense<0xFF800000> : vector<8xf32>
    %84 = vector.multi_reduction <maximumf>, %77, %cst_55 [1] : vector<8x8xf32> to vector<8xf32>
    %85 = vector.shape_cast %84 : vector<8xf32> to vector<8x1xf32>
    %86 = vector.broadcast %85 : vector<8x1xf32> to vector<8x8xf32>
    %87 = arith.subf %77, %86 : vector<8x8xf32>
    %88 = math.exp %87 : vector<8x8xf32>
    %cst_56 = arith.constant dense<0.000000e+00> : vector<8xf32>
    %89 = vector.multi_reduction <add>, %88, %cst_56 [1] : vector<8x8xf32> to vector<8xf32>
    %90 = vector.shape_cast %89 : vector<8xf32> to vector<8x1xf32>
    %91 = tpu.reciprocal %90 {approx = true} : vector<8x1xf32> -> vector<8x1xf32>
    %92 = vector.broadcast %91 : vector<8x1xf32> to vector<8x8xf32>
    %93 = arith.mulf %88, %92 : vector<8x8xf32>
    %cst_57 = arith.constant dense<0xFF800000> : vector<8xf32>
    %94 = vector.multi_reduction <maximumf>, %77, %cst_57 [0] : vector<8x8xf32> to vector<8xf32>
    %95 = vector.shape_cast %94 : vector<8xf32> to vector<1x8xf32>
    %96 = vector.broadcast %95 : vector<1x8xf32> to vector<8x8xf32>
    %97 = arith.subf %77, %96 : vector<8x8xf32>
    %98 = math.exp %97 : vector<8x8xf32>
    %cst_58 = arith.constant dense<0.000000e+00> : vector<8xf32>
    %99 = vector.multi_reduction <add>, %98, %cst_58 [0] : vector<8x8xf32> to vector<8xf32>
    %100 = vector.shape_cast %99 : vector<8xf32> to vector<1x8xf32>
    %101 = tpu.reciprocal %100 {approx = true} : vector<1x8xf32> -> vector<1x8xf32>
    %102 = vector.broadcast %101 : vector<1x8xf32> to vector<8x8xf32>
    %103 = arith.mulf %98, %102 : vector<8x8xf32>
    %cst_59 = arith.constant dense<0.000000e+00> : vector<8x8xf32>
    %104 = tpu.matmul %93, %80, %cst_59 {dimension_numbers = #tpu.dot_dimension_numbers<[1], [1], [0], [0], [0, 0, 1, 0], [], []>} : vector<8x8xf32>, vector<8x8xf32>, vector<8x8xf32> -> vector<8x8xf32>
    %cst_60 = arith.constant dense<0.000000e+00> : vector<8x8xf32>
    %105 = tpu.matmul %103, %83, %cst_60 {dimension_numbers = #tpu.dot_dimension_numbers<[0], [0], [1], [1], [0, 1, 1, 1], [], []>} : vector<8x8xf32>, vector<8x8xf32>, vector<8x8xf32> -> vector<8x8xf32>
    %106 = vector.extract_strided_slice %10 {offsets = [16, 0], sizes = [8, 64], strides = [1, 1]} : vector<24x64xf32> to vector<8x64xf32>
    %cst_61 = arith.constant dense<0xFF800000> : vector<64xf32>
    %107 = vector.multi_reduction <maximumf>, %106, %cst_61 [0] : vector<8x64xf32> to vector<64xf32>
    %108 = vector.shape_cast %107 : vector<64xf32> to vector<1x64xf32>
    %cst_62 = arith.constant dense<0.000000e+00> : vector<64xf32>
    %109 = vector.multi_reduction <add>, %106, %cst_62 [0] : vector<8x64xf32> to vector<64xf32>
    %110 = vector.shape_cast %109 : vector<64xf32> to vector<1x64xf32>
    %cst_63 = arith.constant 1.250000e-01 : f32
    %111 = vector.broadcast %cst_63 : f32 to vector<1x64xf32>
    %112 = arith.mulf %110, %111 : vector<1x64xf32>
    %c2 = arith.constant 2 : index
    %c0_64 = arith.constant 0 : index
    %c0_65 = arith.constant 0 : index
    %113 = vector.load %arg9[%c2, %c0_64, %c0_65] : memref<6x64x64xf32, #tpu.memory_space<vmem>>, vector<1x64x64xf32>
    %114 = vector.shape_cast %113 : vector<1x64x64xf32> to vector<64x64xf32>
    %cst_66 = arith.constant dense<0.000000e+00> : vector<1x64xf32>
    %115 = tpu.matmul %108, %114, %cst_66 {dimension_numbers = #tpu.dot_dimension_numbers<[1], [0], [0], [1], [0, 0, 1, 1], [], []>} : vector<1x64xf32>, vector<64x64xf32>, vector<1x64xf32> -> vector<1x64xf32>
    %c2_67 = arith.constant 2 : index
    %c0_68 = arith.constant 0 : index
    %c0_69 = arith.constant 0 : index
    %116 = vector.load %arg10[%c2_67, %c0_68, %c0_69] : memref<6x64x64xf32, #tpu.memory_space<vmem>>, vector<1x64x64xf32>
    %117 = vector.shape_cast %116 : vector<1x64x64xf32> to vector<64x64xf32>
    %cst_70 = arith.constant dense<0.000000e+00> : vector<1x64xf32>
    %118 = tpu.matmul %112, %117, %cst_70 {dimension_numbers = #tpu.dot_dimension_numbers<[1], [0], [0], [1], [0, 0, 1, 1], [], []>} : vector<1x64xf32>, vector<64x64xf32>, vector<1x64xf32> -> vector<1x64xf32>
    %119 = arith.addf %115, %118 : vector<1x64xf32>
    %120 = vector.broadcast %119 : vector<1x64xf32> to vector<8x64xf32>
    %121 = arith.mulf %0, %120 : vector<8x64xf32>
    %cst_71 = arith.constant dense<0.000000e+00> : vector<8x8xf32>
    %122 = tpu.matmul %121, %1, %cst_71 {dimension_numbers = #tpu.dot_dimension_numbers<[1], [0], [0], [1], [0, 0, 1, 1], [], []>} : vector<8x64xf32>, vector<64x8xf32>, vector<8x8xf32> -> vector<8x8xf32>
    %cst_72 = arith.constant dense<0.000000e+00> : vector<8x8xf32>
    %123 = tpu.matmul %106, %1, %cst_72 {dimension_numbers = #tpu.dot_dimension_numbers<[1], [0], [0], [1], [0, 0, 1, 1], [], []>} : vector<8x64xf32>, vector<64x8xf32>, vector<8x8xf32> -> vector<8x8xf32>
    %cst_73 = arith.constant 1.250000e-01 : f32
    %124 = vector.broadcast %cst_73 : f32 to vector<8x8xf32>
    %125 = arith.mulf %123, %124 : vector<8x8xf32>
    %cst_74 = arith.constant dense<0.000000e+00> : vector<8x8xf32>
    %126 = tpu.matmul %0, %106, %cst_74 {dimension_numbers = #tpu.dot_dimension_numbers<[1], [1], [0], [0], [0, 0, 1, 0], [], []>} : vector<8x64xf32>, vector<8x64xf32>, vector<8x8xf32> -> vector<8x8xf32>
    %cst_75 = arith.constant 1.250000e-01 : f32
    %127 = vector.broadcast %cst_75 : f32 to vector<8x8xf32>
    %128 = arith.mulf %126, %127 : vector<8x8xf32>
    %cst_76 = arith.constant dense<0xFF800000> : vector<8xf32>
    %129 = vector.multi_reduction <maximumf>, %122, %cst_76 [1] : vector<8x8xf32> to vector<8xf32>
    %130 = vector.shape_cast %129 : vector<8xf32> to vector<8x1xf32>
    %131 = vector.broadcast %130 : vector<8x1xf32> to vector<8x8xf32>
    %132 = arith.subf %122, %131 : vector<8x8xf32>
    %133 = math.exp %132 : vector<8x8xf32>
    %cst_77 = arith.constant dense<0.000000e+00> : vector<8xf32>
    %134 = vector.multi_reduction <add>, %133, %cst_77 [1] : vector<8x8xf32> to vector<8xf32>
    %135 = vector.shape_cast %134 : vector<8xf32> to vector<8x1xf32>
    %136 = tpu.reciprocal %135 {approx = true} : vector<8x1xf32> -> vector<8x1xf32>
    %137 = vector.broadcast %136 : vector<8x1xf32> to vector<8x8xf32>
    %138 = arith.mulf %133, %137 : vector<8x8xf32>
    %cst_78 = arith.constant dense<0xFF800000> : vector<8xf32>
    %139 = vector.multi_reduction <maximumf>, %122, %cst_78 [0] : vector<8x8xf32> to vector<8xf32>
    %140 = vector.shape_cast %139 : vector<8xf32> to vector<1x8xf32>
    %141 = vector.broadcast %140 : vector<1x8xf32> to vector<8x8xf32>
    %142 = arith.subf %122, %141 : vector<8x8xf32>
    %143 = math.exp %142 : vector<8x8xf32>
    %cst_79 = arith.constant dense<0.000000e+00> : vector<8xf32>
    %144 = vector.multi_reduction <add>, %143, %cst_79 [0] : vector<8x8xf32> to vector<8xf32>
    %145 = vector.shape_cast %144 : vector<8xf32> to vector<1x8xf32>
    %146 = tpu.reciprocal %145 {approx = true} : vector<1x8xf32> -> vector<1x8xf32>
    %147 = vector.broadcast %146 : vector<1x8xf32> to vector<8x8xf32>
    %148 = arith.mulf %143, %147 : vector<8x8xf32>
    %cst_80 = arith.constant dense<0.000000e+00> : vector<8x8xf32>
    %149 = tpu.matmul %138, %125, %cst_80 {dimension_numbers = #tpu.dot_dimension_numbers<[1], [1], [0], [0], [0, 0, 1, 0], [], []>} : vector<8x8xf32>, vector<8x8xf32>, vector<8x8xf32> -> vector<8x8xf32>
    %cst_81 = arith.constant dense<0.000000e+00> : vector<8x8xf32>
    %150 = tpu.matmul %148, %128, %cst_81 {dimension_numbers = #tpu.dot_dimension_numbers<[0], [0], [1], [1], [0, 1, 1, 1], [], []>} : vector<8x8xf32>, vector<8x8xf32>, vector<8x8xf32> -> vector<8x8xf32>
    %151 = vector.extract_strided_slice %15 {offsets = [0, 0], sizes = [8, 64], strides = [1, 1]} : vector<24x64xf32> to vector<8x64xf32>
    %cst_82 = arith.constant dense<0xFF800000> : vector<64xf32>
    %152 = vector.multi_reduction <maximumf>, %151, %cst_82 [0] : vector<8x64xf32> to vector<64xf32>
    %153 = vector.shape_cast %152 : vector<64xf32> to vector<1x64xf32>
    %cst_83 = arith.constant dense<0.000000e+00> : vector<64xf32>
    %154 = vector.multi_reduction <add>, %151, %cst_83 [0] : vector<8x64xf32> to vector<64xf32>
    %155 = vector.shape_cast %154 : vector<64xf32> to vector<1x64xf32>
    %cst_84 = arith.constant 1.250000e-01 : f32
    %156 = vector.broadcast %cst_84 : f32 to vector<1x64xf32>
    %157 = arith.mulf %155, %156 : vector<1x64xf32>
    %c3 = arith.constant 3 : index
    %c0_85 = arith.constant 0 : index
    %c0_86 = arith.constant 0 : index
    %158 = vector.load %arg9[%c3, %c0_85, %c0_86] : memref<6x64x64xf32, #tpu.memory_space<vmem>>, vector<1x64x64xf32>
    %159 = vector.shape_cast %158 : vector<1x64x64xf32> to vector<64x64xf32>
    %cst_87 = arith.constant dense<0.000000e+00> : vector<1x64xf32>
    %160 = tpu.matmul %153, %159, %cst_87 {dimension_numbers = #tpu.dot_dimension_numbers<[1], [0], [0], [1], [0, 0, 1, 1], [], []>} : vector<1x64xf32>, vector<64x64xf32>, vector<1x64xf32> -> vector<1x64xf32>
    %c3_88 = arith.constant 3 : index
    %c0_89 = arith.constant 0 : index
    %c0_90 = arith.constant 0 : index
    %161 = vector.load %arg10[%c3_88, %c0_89, %c0_90] : memref<6x64x64xf32, #tpu.memory_space<vmem>>, vector<1x64x64xf32>
    %162 = vector.shape_cast %161 : vector<1x64x64xf32> to vector<64x64xf32>
    %cst_91 = arith.constant dense<0.000000e+00> : vector<1x64xf32>
    %163 = tpu.matmul %157, %162, %cst_91 {dimension_numbers = #tpu.dot_dimension_numbers<[1], [0], [0], [1], [0, 0, 1, 1], [], []>} : vector<1x64xf32>, vector<64x64xf32>, vector<1x64xf32> -> vector<1x64xf32>
    %164 = arith.addf %160, %163 : vector<1x64xf32>
    %165 = vector.broadcast %164 : vector<1x64xf32> to vector<8x64xf32>
    %166 = arith.mulf %0, %165 : vector<8x64xf32>
    %cst_92 = arith.constant dense<0.000000e+00> : vector<8x8xf32>
    %167 = tpu.matmul %166, %1, %cst_92 {dimension_numbers = #tpu.dot_dimension_numbers<[1], [0], [0], [1], [0, 0, 1, 1], [], []>} : vector<8x64xf32>, vector<64x8xf32>, vector<8x8xf32> -> vector<8x8xf32>
    %cst_93 = arith.constant dense<0.000000e+00> : vector<8x8xf32>
    %168 = tpu.matmul %151, %1, %cst_93 {dimension_numbers = #tpu.dot_dimension_numbers<[1], [0], [0], [1], [0, 0, 1, 1], [], []>} : vector<8x64xf32>, vector<64x8xf32>, vector<8x8xf32> -> vector<8x8xf32>
    %cst_94 = arith.constant 1.250000e-01 : f32
    %169 = vector.broadcast %cst_94 : f32 to vector<8x8xf32>
    %170 = arith.mulf %168, %169 : vector<8x8xf32>
    %cst_95 = arith.constant dense<0.000000e+00> : vector<8x8xf32>
    %171 = tpu.matmul %0, %151, %cst_95 {dimension_numbers = #tpu.dot_dimension_numbers<[1], [1], [0], [0], [0, 0, 1, 0], [], []>} : vector<8x64xf32>, vector<8x64xf32>, vector<8x8xf32> -> vector<8x8xf32>
    %cst_96 = arith.constant 1.250000e-01 : f32
    %172 = vector.broadcast %cst_96 : f32 to vector<8x8xf32>
    %173 = arith.mulf %171, %172 : vector<8x8xf32>
    %cst_97 = arith.constant dense<0xFF800000> : vector<8xf32>
    %174 = vector.multi_reduction <maximumf>, %167, %cst_97 [1] : vector<8x8xf32> to vector<8xf32>
    %175 = vector.shape_cast %174 : vector<8xf32> to vector<8x1xf32>
    %176 = vector.broadcast %175 : vector<8x1xf32> to vector<8x8xf32>
    %177 = arith.subf %167, %176 : vector<8x8xf32>
    %178 = math.exp %177 : vector<8x8xf32>
    %cst_98 = arith.constant dense<0.000000e+00> : vector<8xf32>
    %179 = vector.multi_reduction <add>, %178, %cst_98 [1] : vector<8x8xf32> to vector<8xf32>
    %180 = vector.shape_cast %179 : vector<8xf32> to vector<8x1xf32>
    %181 = tpu.reciprocal %180 {approx = true} : vector<8x1xf32> -> vector<8x1xf32>
    %182 = vector.broadcast %181 : vector<8x1xf32> to vector<8x8xf32>
    %183 = arith.mulf %178, %182 : vector<8x8xf32>
    %cst_99 = arith.constant dense<0xFF800000> : vector<8xf32>
    %184 = vector.multi_reduction <maximumf>, %167, %cst_99 [0] : vector<8x8xf32> to vector<8xf32>
    %185 = vector.shape_cast %184 : vector<8xf32> to vector<1x8xf32>
    %186 = vector.broadcast %185 : vector<1x8xf32> to vector<8x8xf32>
    %187 = arith.subf %167, %186 : vector<8x8xf32>
    %188 = math.exp %187 : vector<8x8xf32>
    %cst_100 = arith.constant dense<0.000000e+00> : vector<8xf32>
    %189 = vector.multi_reduction <add>, %188, %cst_100 [0] : vector<8x8xf32> to vector<8xf32>
    %190 = vector.shape_cast %189 : vector<8xf32> to vector<1x8xf32>
    %191 = tpu.reciprocal %190 {approx = true} : vector<1x8xf32> -> vector<1x8xf32>
    %192 = vector.broadcast %191 : vector<1x8xf32> to vector<8x8xf32>
    %193 = arith.mulf %188, %192 : vector<8x8xf32>
    %cst_101 = arith.constant dense<0.000000e+00> : vector<8x8xf32>
    %194 = tpu.matmul %183, %170, %cst_101 {dimension_numbers = #tpu.dot_dimension_numbers<[1], [1], [0], [0], [0, 0, 1, 0], [], []>} : vector<8x8xf32>, vector<8x8xf32>, vector<8x8xf32> -> vector<8x8xf32>
    %cst_102 = arith.constant dense<0.000000e+00> : vector<8x8xf32>
    %195 = tpu.matmul %193, %173, %cst_102 {dimension_numbers = #tpu.dot_dimension_numbers<[0], [0], [1], [1], [0, 1, 1, 1], [], []>} : vector<8x8xf32>, vector<8x8xf32>, vector<8x8xf32> -> vector<8x8xf32>
    %196 = vector.extract_strided_slice %15 {offsets = [8, 0], sizes = [8, 64], strides = [1, 1]} : vector<24x64xf32> to vector<8x64xf32>
    %cst_103 = arith.constant dense<0xFF800000> : vector<64xf32>
    %197 = vector.multi_reduction <maximumf>, %196, %cst_103 [0] : vector<8x64xf32> to vector<64xf32>
    %198 = vector.shape_cast %197 : vector<64xf32> to vector<1x64xf32>
    %cst_104 = arith.constant dense<0.000000e+00> : vector<64xf32>
    %199 = vector.multi_reduction <add>, %196, %cst_104 [0] : vector<8x64xf32> to vector<64xf32>
    %200 = vector.shape_cast %199 : vector<64xf32> to vector<1x64xf32>
    %cst_105 = arith.constant 1.250000e-01 : f32
    %201 = vector.broadcast %cst_105 : f32 to vector<1x64xf32>
    %202 = arith.mulf %200, %201 : vector<1x64xf32>
    %c4 = arith.constant 4 : index
    %c0_106 = arith.constant 0 : index
    %c0_107 = arith.constant 0 : index
    %203 = vector.load %arg9[%c4, %c0_106, %c0_107] : memref<6x64x64xf32, #tpu.memory_space<vmem>>, vector<1x64x64xf32>
    %204 = vector.shape_cast %203 : vector<1x64x64xf32> to vector<64x64xf32>
    %cst_108 = arith.constant dense<0.000000e+00> : vector<1x64xf32>
    %205 = tpu.matmul %198, %204, %cst_108 {dimension_numbers = #tpu.dot_dimension_numbers<[1], [0], [0], [1], [0, 0, 1, 1], [], []>} : vector<1x64xf32>, vector<64x64xf32>, vector<1x64xf32> -> vector<1x64xf32>
    %c4_109 = arith.constant 4 : index
    %c0_110 = arith.constant 0 : index
    %c0_111 = arith.constant 0 : index
    %206 = vector.load %arg10[%c4_109, %c0_110, %c0_111] : memref<6x64x64xf32, #tpu.memory_space<vmem>>, vector<1x64x64xf32>
    %207 = vector.shape_cast %206 : vector<1x64x64xf32> to vector<64x64xf32>
    %cst_112 = arith.constant dense<0.000000e+00> : vector<1x64xf32>
    %208 = tpu.matmul %202, %207, %cst_112 {dimension_numbers = #tpu.dot_dimension_numbers<[1], [0], [0], [1], [0, 0, 1, 1], [], []>} : vector<1x64xf32>, vector<64x64xf32>, vector<1x64xf32> -> vector<1x64xf32>
    %209 = arith.addf %205, %208 : vector<1x64xf32>
    %210 = vector.broadcast %209 : vector<1x64xf32> to vector<8x64xf32>
    %211 = arith.mulf %0, %210 : vector<8x64xf32>
    %cst_113 = arith.constant dense<0.000000e+00> : vector<8x8xf32>
    %212 = tpu.matmul %211, %1, %cst_113 {dimension_numbers = #tpu.dot_dimension_numbers<[1], [0], [0], [1], [0, 0, 1, 1], [], []>} : vector<8x64xf32>, vector<64x8xf32>, vector<8x8xf32> -> vector<8x8xf32>
    %cst_114 = arith.constant dense<0.000000e+00> : vector<8x8xf32>
    %213 = tpu.matmul %196, %1, %cst_114 {dimension_numbers = #tpu.dot_dimension_numbers<[1], [0], [0], [1], [0, 0, 1, 1], [], []>} : vector<8x64xf32>, vector<64x8xf32>, vector<8x8xf32> -> vector<8x8xf32>
    %cst_115 = arith.constant 1.250000e-01 : f32
    %214 = vector.broadcast %cst_115 : f32 to vector<8x8xf32>
    %215 = arith.mulf %213, %214 : vector<8x8xf32>
    %cst_116 = arith.constant dense<0.000000e+00> : vector<8x8xf32>
    %216 = tpu.matmul %0, %196, %cst_116 {dimension_numbers = #tpu.dot_dimension_numbers<[1], [1], [0], [0], [0, 0, 1, 0], [], []>} : vector<8x64xf32>, vector<8x64xf32>, vector<8x8xf32> -> vector<8x8xf32>
    %cst_117 = arith.constant 1.250000e-01 : f32
    %217 = vector.broadcast %cst_117 : f32 to vector<8x8xf32>
    %218 = arith.mulf %216, %217 : vector<8x8xf32>
    %cst_118 = arith.constant dense<0xFF800000> : vector<8xf32>
    %219 = vector.multi_reduction <maximumf>, %212, %cst_118 [1] : vector<8x8xf32> to vector<8xf32>
    %220 = vector.shape_cast %219 : vector<8xf32> to vector<8x1xf32>
    %221 = vector.broadcast %220 : vector<8x1xf32> to vector<8x8xf32>
    %222 = arith.subf %212, %221 : vector<8x8xf32>
    %223 = math.exp %222 : vector<8x8xf32>
    %cst_119 = arith.constant dense<0.000000e+00> : vector<8xf32>
    %224 = vector.multi_reduction <add>, %223, %cst_119 [1] : vector<8x8xf32> to vector<8xf32>
    %225 = vector.shape_cast %224 : vector<8xf32> to vector<8x1xf32>
    %226 = tpu.reciprocal %225 {approx = true} : vector<8x1xf32> -> vector<8x1xf32>
    %227 = vector.broadcast %226 : vector<8x1xf32> to vector<8x8xf32>
    %228 = arith.mulf %223, %227 : vector<8x8xf32>
    %cst_120 = arith.constant dense<0xFF800000> : vector<8xf32>
    %229 = vector.multi_reduction <maximumf>, %212, %cst_120 [0] : vector<8x8xf32> to vector<8xf32>
    %230 = vector.shape_cast %229 : vector<8xf32> to vector<1x8xf32>
    %231 = vector.broadcast %230 : vector<1x8xf32> to vector<8x8xf32>
    %232 = arith.subf %212, %231 : vector<8x8xf32>
    %233 = math.exp %232 : vector<8x8xf32>
    %cst_121 = arith.constant dense<0.000000e+00> : vector<8xf32>
    %234 = vector.multi_reduction <add>, %233, %cst_121 [0] : vector<8x8xf32> to vector<8xf32>
    %235 = vector.shape_cast %234 : vector<8xf32> to vector<1x8xf32>
    %236 = tpu.reciprocal %235 {approx = true} : vector<1x8xf32> -> vector<1x8xf32>
    %237 = vector.broadcast %236 : vector<1x8xf32> to vector<8x8xf32>
    %238 = arith.mulf %233, %237 : vector<8x8xf32>
    %cst_122 = arith.constant dense<0.000000e+00> : vector<8x8xf32>
    %239 = tpu.matmul %228, %215, %cst_122 {dimension_numbers = #tpu.dot_dimension_numbers<[1], [1], [0], [0], [0, 0, 1, 0], [], []>} : vector<8x8xf32>, vector<8x8xf32>, vector<8x8xf32> -> vector<8x8xf32>
    %cst_123 = arith.constant dense<0.000000e+00> : vector<8x8xf32>
    %240 = tpu.matmul %238, %218, %cst_123 {dimension_numbers = #tpu.dot_dimension_numbers<[0], [0], [1], [1], [0, 1, 1, 1], [], []>} : vector<8x8xf32>, vector<8x8xf32>, vector<8x8xf32> -> vector<8x8xf32>
    %241 = vector.extract_strided_slice %15 {offsets = [16, 0], sizes = [8, 64], strides = [1, 1]} : vector<24x64xf32> to vector<8x64xf32>
    %cst_124 = arith.constant dense<0xFF800000> : vector<64xf32>
    %242 = vector.multi_reduction <maximumf>, %241, %cst_124 [0] : vector<8x64xf32> to vector<64xf32>
    %243 = vector.shape_cast %242 : vector<64xf32> to vector<1x64xf32>
    %cst_125 = arith.constant dense<0.000000e+00> : vector<64xf32>
    %244 = vector.multi_reduction <add>, %241, %cst_125 [0] : vector<8x64xf32> to vector<64xf32>
    %245 = vector.shape_cast %244 : vector<64xf32> to vector<1x64xf32>
    %cst_126 = arith.constant 1.250000e-01 : f32
    %246 = vector.broadcast %cst_126 : f32 to vector<1x64xf32>
    %247 = arith.mulf %245, %246 : vector<1x64xf32>
    %c5 = arith.constant 5 : index
    %c0_127 = arith.constant 0 : index
    %c0_128 = arith.constant 0 : index
    %248 = vector.load %arg9[%c5, %c0_127, %c0_128] : memref<6x64x64xf32, #tpu.memory_space<vmem>>, vector<1x64x64xf32>
    %249 = vector.shape_cast %248 : vector<1x64x64xf32> to vector<64x64xf32>
    %cst_129 = arith.constant dense<0.000000e+00> : vector<1x64xf32>
    %250 = tpu.matmul %243, %249, %cst_129 {dimension_numbers = #tpu.dot_dimension_numbers<[1], [0], [0], [1], [0, 0, 1, 1], [], []>} : vector<1x64xf32>, vector<64x64xf32>, vector<1x64xf32> -> vector<1x64xf32>
    %c5_130 = arith.constant 5 : index
    %c0_131 = arith.constant 0 : index
    %c0_132 = arith.constant 0 : index
    %251 = vector.load %arg10[%c5_130, %c0_131, %c0_132] : memref<6x64x64xf32, #tpu.memory_space<vmem>>, vector<1x64x64xf32>
    %252 = vector.shape_cast %251 : vector<1x64x64xf32> to vector<64x64xf32>
    %cst_133 = arith.constant dense<0.000000e+00> : vector<1x64xf32>
    %253 = tpu.matmul %247, %252, %cst_133 {dimension_numbers = #tpu.dot_dimension_numbers<[1], [0], [0], [1], [0, 0, 1, 1], [], []>} : vector<1x64xf32>, vector<64x64xf32>, vector<1x64xf32> -> vector<1x64xf32>
    %254 = arith.addf %250, %253 : vector<1x64xf32>
    %255 = vector.broadcast %254 : vector<1x64xf32> to vector<8x64xf32>
    %256 = arith.mulf %0, %255 : vector<8x64xf32>
    %cst_134 = arith.constant dense<0.000000e+00> : vector<8x8xf32>
    %257 = tpu.matmul %256, %1, %cst_134 {dimension_numbers = #tpu.dot_dimension_numbers<[1], [0], [0], [1], [0, 0, 1, 1], [], []>} : vector<8x64xf32>, vector<64x8xf32>, vector<8x8xf32> -> vector<8x8xf32>
    %cst_135 = arith.constant dense<0.000000e+00> : vector<8x8xf32>
    %258 = tpu.matmul %241, %1, %cst_135 {dimension_numbers = #tpu.dot_dimension_numbers<[1], [0], [0], [1], [0, 0, 1, 1], [], []>} : vector<8x64xf32>, vector<64x8xf32>, vector<8x8xf32> -> vector<8x8xf32>
    %cst_136 = arith.constant 1.250000e-01 : f32
    %259 = vector.broadcast %cst_136 : f32 to vector<8x8xf32>
    %260 = arith.mulf %258, %259 : vector<8x8xf32>
    %cst_137 = arith.constant dense<0.000000e+00> : vector<8x8xf32>
    %261 = tpu.matmul %0, %241, %cst_137 {dimension_numbers = #tpu.dot_dimension_numbers<[1], [1], [0], [0], [0, 0, 1, 0], [], []>} : vector<8x64xf32>, vector<8x64xf32>, vector<8x8xf32> -> vector<8x8xf32>
    %cst_138 = arith.constant 1.250000e-01 : f32
    %262 = vector.broadcast %cst_138 : f32 to vector<8x8xf32>
    %263 = arith.mulf %261, %262 : vector<8x8xf32>
    %cst_139 = arith.constant dense<0xFF800000> : vector<8xf32>
    %264 = vector.multi_reduction <maximumf>, %257, %cst_139 [1] : vector<8x8xf32> to vector<8xf32>
    %265 = vector.shape_cast %264 : vector<8xf32> to vector<8x1xf32>
    %266 = vector.broadcast %265 : vector<8x1xf32> to vector<8x8xf32>
    %267 = arith.subf %257, %266 : vector<8x8xf32>
    %268 = math.exp %267 : vector<8x8xf32>
    %cst_140 = arith.constant dense<0.000000e+00> : vector<8xf32>
    %269 = vector.multi_reduction <add>, %268, %cst_140 [1] : vector<8x8xf32> to vector<8xf32>
    %270 = vector.shape_cast %269 : vector<8xf32> to vector<8x1xf32>
    %271 = tpu.reciprocal %270 {approx = true} : vector<8x1xf32> -> vector<8x1xf32>
    %272 = vector.broadcast %271 : vector<8x1xf32> to vector<8x8xf32>
    %273 = arith.mulf %268, %272 : vector<8x8xf32>
    %cst_141 = arith.constant dense<0xFF800000> : vector<8xf32>
    %274 = vector.multi_reduction <maximumf>, %257, %cst_141 [0] : vector<8x8xf32> to vector<8xf32>
    %275 = vector.shape_cast %274 : vector<8xf32> to vector<1x8xf32>
    %276 = vector.broadcast %275 : vector<1x8xf32> to vector<8x8xf32>
    %277 = arith.subf %257, %276 : vector<8x8xf32>
    %278 = math.exp %277 : vector<8x8xf32>
    %cst_142 = arith.constant dense<0.000000e+00> : vector<8xf32>
    %279 = vector.multi_reduction <add>, %278, %cst_142 [0] : vector<8x8xf32> to vector<8xf32>
    %280 = vector.shape_cast %279 : vector<8xf32> to vector<1x8xf32>
    %281 = tpu.reciprocal %280 {approx = true} : vector<1x8xf32> -> vector<1x8xf32>
    %282 = vector.broadcast %281 : vector<1x8xf32> to vector<8x8xf32>
    %283 = arith.mulf %278, %282 : vector<8x8xf32>
    %cst_143 = arith.constant dense<0.000000e+00> : vector<8x8xf32>
    %284 = tpu.matmul %273, %260, %cst_143 {dimension_numbers = #tpu.dot_dimension_numbers<[1], [1], [0], [0], [0, 0, 1, 0], [], []>} : vector<8x8xf32>, vector<8x8xf32>, vector<8x8xf32> -> vector<8x8xf32>
    %cst_144 = arith.constant dense<0.000000e+00> : vector<8x8xf32>
    %285 = tpu.matmul %283, %263, %cst_144 {dimension_numbers = #tpu.dot_dimension_numbers<[0], [0], [1], [1], [0, 1, 1, 1], [], []>} : vector<8x8xf32>, vector<8x8xf32>, vector<8x8xf32> -> vector<8x8xf32>
    %286 = vector.shape_cast %194 : vector<8x8xf32> to vector<8x8x1xf32>
    %cst_145 = arith.constant 8.000000e+00 : f32
    %287 = vector.broadcast %cst_145 : f32 to vector<8x8x1xf32>
    %288 = arith.mulf %287, %286 : vector<8x8x1xf32>
    %289 = vector.shape_cast %104 : vector<8x8xf32> to vector<8x1x8xf32>
    %290 = vector.broadcast %288 : vector<8x8x1xf32> to vector<8x8x8xf32>
    %291 = vector.broadcast %289 : vector<8x1x8xf32> to vector<8x8x8xf32>
    %292 = arith.mulf %290, %291 : vector<8x8x8xf32>
    %cst_146 = arith.constant dense<0xFF800000> : vector<8x8xf32>
    %293 = vector.multi_reduction <maximumf>, %292, %cst_146 [2] : vector<8x8x8xf32> to vector<8x8xf32>
    %294 = vector.shape_cast %293 : vector<8x8xf32> to vector<8x8x1xf32>
    %295 = vector.broadcast %294 : vector<8x8x1xf32> to vector<8x8x8xf32>
    %296 = arith.subf %292, %295 : vector<8x8x8xf32>
    %297 = math.exp %296 : vector<8x8x8xf32>
    %cst_147 = arith.constant dense<0.000000e+00> : vector<8x8xf32>
    %298 = vector.multi_reduction <add>, %297, %cst_147 [2] : vector<8x8x8xf32> to vector<8x8xf32>
    %299 = vector.shape_cast %149 : vector<8x8xf32> to vector<8x1x8xf32>
    %300 = vector.broadcast %299 : vector<8x1x8xf32> to vector<8x8x8xf32>
    %301 = arith.mulf %297, %300 : vector<8x8x8xf32>
    %cst_148 = arith.constant dense<0.000000e+00> : vector<8x8xf32>
    %302 = vector.multi_reduction <add>, %301, %cst_148 [2] : vector<8x8x8xf32> to vector<8x8xf32>
    %303 = tpu.reciprocal %298 {approx = true} : vector<8x8xf32> -> vector<8x8xf32>
    %304 = arith.mulf %302, %303 : vector<8x8xf32>
    %305 = vector.shape_cast %195 : vector<8x8xf32> to vector<8x8x1xf32>
    %cst_149 = arith.constant 8.000000e+00 : f32
    %306 = vector.broadcast %cst_149 : f32 to vector<8x8x1xf32>
    %307 = arith.mulf %306, %305 : vector<8x8x1xf32>
    %308 = vector.shape_cast %105 : vector<8x8xf32> to vector<8x1x8xf32>
    %309 = vector.broadcast %307 : vector<8x8x1xf32> to vector<8x8x8xf32>
    %310 = vector.broadcast %308 : vector<8x1x8xf32> to vector<8x8x8xf32>
    %311 = arith.mulf %309, %310 : vector<8x8x8xf32>
    %cst_150 = arith.constant dense<0xFF800000> : vector<8x8xf32>
    %312 = vector.multi_reduction <maximumf>, %311, %cst_150 [2] : vector<8x8x8xf32> to vector<8x8xf32>
    %313 = vector.shape_cast %312 : vector<8x8xf32> to vector<8x8x1xf32>
    %314 = vector.broadcast %313 : vector<8x8x1xf32> to vector<8x8x8xf32>
    %315 = arith.subf %311, %314 : vector<8x8x8xf32>
    %316 = math.exp %315 : vector<8x8x8xf32>
    %cst_151 = arith.constant dense<0.000000e+00> : vector<8x8xf32>
    %317 = vector.multi_reduction <add>, %316, %cst_151 [2] : vector<8x8x8xf32> to vector<8x8xf32>
    %318 = vector.shape_cast %150 : vector<8x8xf32> to vector<8x1x8xf32>
    %319 = vector.broadcast %318 : vector<8x1x8xf32> to vector<8x8x8xf32>
    %320 = arith.mulf %316, %319 : vector<8x8x8xf32>
    %cst_152 = arith.constant dense<0.000000e+00> : vector<8x8xf32>
    %321 = vector.multi_reduction <add>, %320, %cst_152 [2] : vector<8x8x8xf32> to vector<8x8xf32>
    %322 = tpu.reciprocal %317 {approx = true} : vector<8x8xf32> -> vector<8x8xf32>
    %323 = arith.mulf %321, %322 : vector<8x8xf32>
    %324 = arith.addf %304, %323 : vector<8x8xf32>
    %325 = vector.shape_cast %59 : vector<8x8xf32> to vector<8x8x1xf32>
    %cst_153 = arith.constant 8.000000e+00 : f32
    %326 = vector.broadcast %cst_153 : f32 to vector<8x8x1xf32>
    %327 = arith.mulf %326, %325 : vector<8x8x1xf32>
    %328 = vector.shape_cast %239 : vector<8x8xf32> to vector<8x1x8xf32>
    %329 = vector.broadcast %327 : vector<8x8x1xf32> to vector<8x8x8xf32>
    %330 = vector.broadcast %328 : vector<8x1x8xf32> to vector<8x8x8xf32>
    %331 = arith.mulf %329, %330 : vector<8x8x8xf32>
    %cst_154 = arith.constant dense<0xFF800000> : vector<8x8xf32>
    %332 = vector.multi_reduction <maximumf>, %331, %cst_154 [2] : vector<8x8x8xf32> to vector<8x8xf32>
    %333 = vector.shape_cast %332 : vector<8x8xf32> to vector<8x8x1xf32>
    %334 = vector.broadcast %333 : vector<8x8x1xf32> to vector<8x8x8xf32>
    %335 = arith.subf %331, %334 : vector<8x8x8xf32>
    %336 = math.exp %335 : vector<8x8x8xf32>
    %cst_155 = arith.constant dense<0.000000e+00> : vector<8x8xf32>
    %337 = vector.multi_reduction <add>, %336, %cst_155 [2] : vector<8x8x8xf32> to vector<8x8xf32>
    %338 = vector.shape_cast %284 : vector<8x8xf32> to vector<8x1x8xf32>
    %339 = vector.broadcast %338 : vector<8x1x8xf32> to vector<8x8x8xf32>
    %340 = arith.mulf %336, %339 : vector<8x8x8xf32>
    %cst_156 = arith.constant dense<0.000000e+00> : vector<8x8xf32>
    %341 = vector.multi_reduction <add>, %340, %cst_156 [2] : vector<8x8x8xf32> to vector<8x8xf32>
    %342 = tpu.reciprocal %337 {approx = true} : vector<8x8xf32> -> vector<8x8xf32>
    %343 = arith.mulf %341, %342 : vector<8x8xf32>
    %344 = vector.shape_cast %60 : vector<8x8xf32> to vector<8x8x1xf32>
    %cst_157 = arith.constant 8.000000e+00 : f32
    %345 = vector.broadcast %cst_157 : f32 to vector<8x8x1xf32>
    %346 = arith.mulf %345, %344 : vector<8x8x1xf32>
    %347 = vector.shape_cast %240 : vector<8x8xf32> to vector<8x1x8xf32>
    %348 = vector.broadcast %346 : vector<8x8x1xf32> to vector<8x8x8xf32>
    %349 = vector.broadcast %347 : vector<8x1x8xf32> to vector<8x8x8xf32>
    %350 = arith.mulf %348, %349 : vector<8x8x8xf32>
    %cst_158 = arith.constant dense<0xFF800000> : vector<8x8xf32>
    %351 = vector.multi_reduction <maximumf>, %350, %cst_158 [2] : vector<8x8x8xf32> to vector<8x8xf32>
    %352 = vector.shape_cast %351 : vector<8x8xf32> to vector<8x8x1xf32>
    %353 = vector.broadcast %352 : vector<8x8x1xf32> to vector<8x8x8xf32>
    %354 = arith.subf %350, %353 : vector<8x8x8xf32>
    %355 = math.exp %354 : vector<8x8x8xf32>
    %cst_159 = arith.constant dense<0.000000e+00> : vector<8x8xf32>
    %356 = vector.multi_reduction <add>, %355, %cst_159 [2] : vector<8x8x8xf32> to vector<8x8xf32>
    %357 = vector.shape_cast %285 : vector<8x8xf32> to vector<8x1x8xf32>
    %358 = vector.broadcast %357 : vector<8x1x8xf32> to vector<8x8x8xf32>
    %359 = arith.mulf %355, %358 : vector<8x8x8xf32>
    %cst_160 = arith.constant dense<0.000000e+00> : vector<8x8xf32>
    %360 = vector.multi_reduction <add>, %359, %cst_160 [2] : vector<8x8x8xf32> to vector<8x8xf32>
    %361 = tpu.reciprocal %356 {approx = true} : vector<8x8xf32> -> vector<8x8xf32>
    %362 = arith.mulf %360, %361 : vector<8x8xf32>
    %363 = arith.addf %343, %362 : vector<8x8xf32>
    %c0_161 = arith.constant 0 : index
    %364 = memref.load %arg11[%c0_161] : memref<2xf32, #tpu.memory_space<smem>>
    %c1_162 = arith.constant 1 : index
    %365 = memref.load %arg11[%c1_162] : memref<2xf32, #tpu.memory_space<smem>>
    %cst_163 = arith.constant dense<0.000000e+00> : vector<8x64xf32>
    %366 = tpu.matmul %324, %0, %cst_163 {dimension_numbers = #tpu.dot_dimension_numbers<[0], [0], [1], [1], [0, 1, 1, 1], [], []>} : vector<8x8xf32>, vector<8x64xf32>, vector<8x64xf32> -> vector<8x64xf32>
    %cst_164 = arith.constant dense<0.000000e+00> : vector<8x64xf32>
    %367 = tpu.matmul %363, %0, %cst_164 {dimension_numbers = #tpu.dot_dimension_numbers<[0], [0], [1], [1], [0, 1, 1, 1], [], []>} : vector<8x8xf32>, vector<8x64xf32>, vector<8x64xf32> -> vector<8x64xf32>
    %cst_165 = arith.constant 0.000000e+00 : f32
    %368 = vector.broadcast %cst_165 : f32 to vector<16x9xf32>
    %c0_166 = arith.constant 0 : index
    %c0_167 = arith.constant 0 : index
    %369 = vector.load %arg17[%c0_166, %c0_167] : memref<16x82xf32, #tpu.memory_space<vmem>>, vector<16x9xf32>
    tpu.vector_store %arg17[%c0_166, %c0_167], %368 {strides = array<i32>} : memref<16x82xf32, #tpu.memory_space<vmem>>, vector<16x9xf32>,
    %cst_168 = arith.constant 0.000000e+00 : f32
    %370 = vector.broadcast %cst_168 : f32 to vector<16x9xf32>
    %c0_169 = arith.constant 0 : index
    %c73 = arith.constant 73 : index
    %371 = vector.load %arg17[%c0_169, %c73] : memref<16x82xf32, #tpu.memory_space<vmem>>, vector<16x9xf32>
    tpu.vector_store %arg17[%c0_169, %c73], %370 {strides = array<i32>} : memref<16x82xf32, #tpu.memory_space<vmem>>, vector<16x9xf32>,
    %372 = vector.broadcast %364 : f32 to vector<8x64xf32>
    %373 = arith.mulf %372, %366 : vector<8x64xf32>
    %374 = arith.addf %373, %3 : vector<8x64xf32>
    %c0_170 = arith.constant 0 : index
    %c9 = arith.constant 9 : index
    %375 = vector.load %arg17[%c0_170, %c9] : memref<16x82xf32, #tpu.memory_space<vmem>>, vector<8x64xf32>
    tpu.vector_store %arg17[%c0_170, %c9], %374 {strides = array<i32>} : memref<16x82xf32, #tpu.memory_space<vmem>>, vector<8x64xf32>,
    %376 = vector.broadcast %365 : f32 to vector<8x64xf32>
    %377 = arith.mulf %376, %367 : vector<8x64xf32>
    %378 = arith.addf %377, %5 : vector<8x64xf32>
    %c8 = arith.constant 8 : index
    %c9_171 = arith.constant 9 : index
    %379 = vector.load %arg17[%c8, %c9_171] : memref<16x82xf32, #tpu.memory_space<vmem>>, vector<8x64xf32>
    tpu.vector_store %arg17[%c8, %c9_171], %378 {strides = array<i32>} : memref<16x82xf32, #tpu.memory_space<vmem>>, vector<8x64xf32>,
    %c0_172 = arith.constant 0 : index
    %c0_173 = arith.constant 0 : index
    %380 = vector.load %arg17[%c0_172, %c0_173] : memref<16x82xf32, #tpu.memory_space<vmem>>, vector<16x64xf32>
    %c0_174 = arith.constant 0 : index
    %c0_175 = arith.constant 0 : index
    %381 = vector.load %arg13[%c0_174, %c0_175] : memref<3x64xf32, #tpu.memory_space<vmem>>, vector<1x64xf32>
    %382 = vector.broadcast %381 : vector<1x64xf32> to vector<16x64xf32>
    %383 = arith.mulf %380, %382 : vector<16x64xf32>
    %c0_176 = arith.constant 0 : index
    %c1_177 = arith.constant 1 : index
    %384 = vector.load %arg17[%c0_176, %c1_177] : memref<16x82xf32, #tpu.memory_space<vmem>>, vector<16x64xf32>
    %c0_178 = arith.constant 0 : index
    %c2_179 = arith.constant 2 : index
    %385 = vector.load %arg17[%c0_178, %c2_179] : memref<16x82xf32, #tpu.memory_space<vmem>>, vector<16x64xf32>
    %c2_180 = arith.constant 2 : index
    %c0_181 = arith.constant 0 : index
    %386 = vector.load %arg13[%c2_180, %c0_181] : memref<3x64xf32, #tpu.memory_space<vmem>>, vector<1x64xf32>
    %387 = vector.broadcast %386 : vector<1x64xf32> to vector<16x64xf32>
    %388 = arith.mulf %385, %387 : vector<16x64xf32>
    %c0_182 = arith.constant 0 : index
    %c8_183 = arith.constant 8 : index
    %389 = vector.load %arg17[%c0_182, %c8_183] : memref<16x82xf32, #tpu.memory_space<vmem>>, vector<16x64xf32>
    %c0_184 = arith.constant 0 : index
    %c0_185 = arith.constant 0 : index
    %390 = vector.load %arg13[%c0_184, %c0_185] : memref<3x64xf32, #tpu.memory_space<vmem>>, vector<1x64xf32>
    %391 = vector.broadcast %390 : vector<1x64xf32> to vector<16x64xf32>
    %392 = arith.mulf %389, %391 : vector<16x64xf32>
    %c0_186 = arith.constant 0 : index
    %c9_187 = arith.constant 9 : index
    %393 = vector.load %arg17[%c0_186, %c9_187] : memref<16x82xf32, #tpu.memory_space<vmem>>, vector<16x64xf32>
    %c0_188 = arith.constant 0 : index
    %c10 = arith.constant 10 : index
    %394 = vector.load %arg17[%c0_188, %c10] : memref<16x82xf32, #tpu.memory_space<vmem>>, vector<16x64xf32>
    %c2_189 = arith.constant 2 : index
    %c0_190 = arith.constant 0 : index
    %395 = vector.load %arg13[%c2_189, %c0_190] : memref<3x64xf32, #tpu.memory_space<vmem>>, vector<1x64xf32>
    %396 = vector.broadcast %395 : vector<1x64xf32> to vector<16x64xf32>
    %397 = arith.mulf %394, %396 : vector<16x64xf32>
    %c0_191 = arith.constant 0 : index
    %c16 = arith.constant 16 : index
    %398 = vector.load %arg17[%c0_191, %c16] : memref<16x82xf32, #tpu.memory_space<vmem>>, vector<16x64xf32>
    %c0_192 = arith.constant 0 : index
    %c0_193 = arith.constant 0 : index
    %399 = vector.load %arg13[%c0_192, %c0_193] : memref<3x64xf32, #tpu.memory_space<vmem>>, vector<1x64xf32>
    %400 = vector.broadcast %399 : vector<1x64xf32> to vector<16x64xf32>
    %401 = arith.mulf %398, %400 : vector<16x64xf32>
    %c0_194 = arith.constant 0 : index
    %c17 = arith.constant 17 : index
    %402 = vector.load %arg17[%c0_194, %c17] : memref<16x82xf32, #tpu.memory_space<vmem>>, vector<16x64xf32>
    %c0_195 = arith.constant 0 : index
    %c18 = arith.constant 18 : index
    %403 = vector.load %arg17[%c0_195, %c18] : memref<16x82xf32, #tpu.memory_space<vmem>>, vector<16x64xf32>
    %c2_196 = arith.constant 2 : index
    %c0_197 = arith.constant 0 : index
    %404 = vector.load %arg13[%c2_196, %c0_197] : memref<3x64xf32, #tpu.memory_space<vmem>>, vector<1x64xf32>
    %405 = vector.broadcast %404 : vector<1x64xf32> to vector<16x64xf32>
    %406 = arith.mulf %403, %405 : vector<16x64xf32>
    %407 = tpu.concatenate %383, %384, %388, %392, %393, %397, %401, %402, %406 in 0 : vector<16x64xf32>, vector<16x64xf32>, vector<16x64xf32>, vector<16x64xf32>, vector<16x64xf32>, vector<16x64xf32>, vector<16x64xf32>, vector<16x64xf32>, vector<16x64xf32> -> vector<144x64xf32>
    %c0_198 = arith.constant 0 : index
    %c0_199 = arith.constant 0 : index
    %408 = vector.load %arg12[%c0_198, %c0_199] : memref<8x144xf32, #tpu.memory_space<vmem>>, vector<8x144xf32>
    %cst_200 = arith.constant dense<0.000000e+00> : vector<8x64xf32>
    %409 = tpu.matmul %408, %407, %cst_200 {dimension_numbers = #tpu.dot_dimension_numbers<[1], [0], [0], [1], [0, 0, 1, 1], [], []>} : vector<8x144xf32>, vector<144x64xf32>, vector<8x64xf32> -> vector<8x64xf32>
    %c0_201 = arith.constant 0 : index
    %c0_202 = arith.constant 0 : index
    %410 = vector.load %arg14[%c0_201, %c0_202] : memref<8x1xf32, #tpu.memory_space<vmem>>, vector<8x1xf32>
    %411 = vector.broadcast %410 : vector<8x1xf32> to vector<8x64xf32>
    %412 = arith.mulf %409, %411 : vector<8x64xf32>
    %c0_203 = arith.constant 0 : index
    %c0_204 = arith.constant 0 : index
    %413 = vector.load %arg15[%c0_203, %c0_204] : memref<8x1xf32, #tpu.memory_space<vmem>>, vector<8x1xf32>
    %414 = vector.broadcast %413 : vector<8x1xf32> to vector<8x64xf32>
    %415 = arith.addf %412, %414 : vector<8x64xf32>
    %cst_205 = arith.constant 0.000000e+00 : f32
    %416 = vector.broadcast %cst_205 : f32 to vector<8x64xf32>
    %417 = arith.maximumf %415, %416 : vector<8x64xf32>
    %c0_206 = arith.constant 0 : index
    %c0_207 = arith.constant 0 : index
    %c0_208 = arith.constant 0 : index
    %418 = vector.load %arg16[%c0_206, %c0_207, %c0_208] : memref<1x8x64xf32, #tpu.memory_space<vmem>>, vector<1x8x64xf32>
    %419 = vector.shape_cast %418 : vector<1x8x64xf32> to vector<8x64xf32>
    %420 = vector.shape_cast %417 : vector<8x64xf32> to vector<1x8x64xf32>
    tpu.vector_store %arg16[%c0_206, %c0_207, %c0_208], %420 {strides = array<i32>} : memref<1x8x64xf32, #tpu.memory_space<vmem>>, vector<1x8x64xf32>,
    return
  }
  func.func @transform_0(%arg0: i32) -> (i32, i32, i32) {
    %c0_i32 = arith.constant 0 : i32
    %c0_i32_0 = arith.constant 0 : i32
    %c0_i32_1 = arith.constant 0 : i32
    return %arg0, %c0_i32, %c0_i32_0 : i32, i32, i32
  }
  func.func @transform_1(%arg0: i32) -> (i32, i32, i32) {
    %c0_i32 = arith.constant 0 : i32
    %c0_i32_0 = arith.constant 0 : i32
    %c0_i32_1 = arith.constant 0 : i32
    return %arg0, %c0_i32, %c0_i32_0 : i32, i32, i32
  }
  func.func @transform_2(%arg0: i32) -> (i32, i32) {
    %c0_i32 = arith.constant 0 : i32
    %c0_i32_0 = arith.constant 0 : i32
    %c0_i32_1 = arith.constant 0 : i32
    return %c0_i32, %c0_i32_0 : i32, i32
  }
  func.func @transform_3(%arg0: i32) -> (i32, i32) {
    %c0_i32 = arith.constant 0 : i32
    %c0_i32_0 = arith.constant 0 : i32
    %c0_i32_1 = arith.constant 0 : i32
    return %c0_i32, %c0_i32_0 : i32, i32
  }
  func.func @transform_4(%arg0: i32) -> (i32, i32) {
    %c0_i32 = arith.constant 0 : i32
    %c0_i32_0 = arith.constant 0 : i32
    %c0_i32_1 = arith.constant 0 : i32
    return %c0_i32, %c0_i32_0 : i32, i32
  }
  func.func @transform_5(%arg0: i32) -> (i32, i32) {
    %c0_i32 = arith.constant 0 : i32
    %c0_i32_0 = arith.constant 0 : i32
    %c0_i32_1 = arith.constant 0 : i32
    return %c0_i32, %c0_i32_0 : i32, i32
  }
  func.func @transform_6(%arg0: i32) -> (i32, i32) {
    %c0_i32 = arith.constant 0 : i32
    %c0_i32_0 = arith.constant 0 : i32
    %c0_i32_1 = arith.constant 0 : i32
    return %c0_i32, %c0_i32_0 : i32, i32
  }
  func.func @transform_7(%arg0: i32) -> (i32, i32) {
    %c0_i32 = arith.constant 0 : i32
    %c0_i32_0 = arith.constant 0 : i32
    %c0_i32_1 = arith.constant 0 : i32
    return %c0_i32, %c0_i32_0 : i32, i32
  }
  func.func @transform_8(%arg0: i32) -> (i32, i32, i32) {
    %c0_i32 = arith.constant 0 : i32
    %c0_i32_0 = arith.constant 0 : i32
    %c0_i32_1 = arith.constant 0 : i32
    %c0_i32_2 = arith.constant 0 : i32
    return %c0_i32, %c0_i32_0, %c0_i32_1 : i32, i32, i32
  }
  func.func @transform_9(%arg0: i32) -> (i32, i32, i32) {
    %c0_i32 = arith.constant 0 : i32
    %c0_i32_0 = arith.constant 0 : i32
    %c0_i32_1 = arith.constant 0 : i32
    %c0_i32_2 = arith.constant 0 : i32
    return %c0_i32, %c0_i32_0, %c0_i32_1 : i32, i32, i32
  }
  func.func @transform_10(%arg0: i32) -> i32 {
    %c0_i32 = arith.constant 0 : i32
    %c0_i32_0 = arith.constant 0 : i32
    return %c0_i32 : i32
  }
  func.func @transform_11(%arg0: i32) -> (i32, i32) {
    %c0_i32 = arith.constant 0 : i32
    %c0_i32_0 = arith.constant 0 : i32
    %c0_i32_1 = arith.constant 0 : i32
    return %c0_i32, %c0_i32_0 : i32, i32
  }
  func.func @transform_12(%arg0: i32) -> (i32, i32) {
    %c0_i32 = arith.constant 0 : i32
    %c0_i32_0 = arith.constant 0 : i32
    %c0_i32_1 = arith.constant 0 : i32
    return %c0_i32, %c0_i32_0 : i32, i32
  }
  func.func @transform_13(%arg0: i32) -> (i32, i32) {
    %c0_i32 = arith.constant 0 : i32
    %c0_i32_0 = arith.constant 0 : i32
    %c0_i32_1 = arith.constant 0 : i32
    return %c0_i32, %c0_i32_0 : i32, i32
  }
  func.func @transform_14(%arg0: i32) -> (i32, i32) {
    %c0_i32 = arith.constant 0 : i32
    %c0_i32_0 = arith.constant 0 : i32
    %c0_i32_1 = arith.constant 0 : i32
    return %c0_i32, %c0_i32_0 : i32, i32
  }
  func.func @transform_15(%arg0: i32) -> (i32, i32, i32) {
    %c0_i32 = arith.constant 0 : i32
    %c0_i32_0 = arith.constant 0 : i32
    %c0_i32_1 = arith.constant 0 : i32
    return %arg0, %c0_i32, %c0_i32_0 : i32, i32, i32
  }
}

</mosaic_0001>

<bundles_post_ra>
// kernel: cross_att_forward.1
= control target key start
LH: loop header
LB: loop body
LE: loop exit
PB: predicated region body
PF: predicated region fallthrough
CT: control target
= control target key end

     0   :  { %20 = vsyncpa [#allocation4], 0  ;;  %s8253_s18 = smov 0   ;;  %s9934_s0 = inlined_call_operand.vmem [shape: f32[2,8,64], index: 0, kind: input, shape index: {}]   ;;  %s9935_s1 = inlined_call_operand.vmem [shape: f32[2,8,64], index: 1, kind: input, shape index: {}]   ;;  %s9936_s2 = inlined_call_operand.vmem [shape: f32[24,8], index: 2, kind: input, shape index: {}]   ;;  %s9937_s3 = inlined_call_operand.vmem [shape: f32[24,1], index: 3, kind: input, shape index: {}]   ;;  %s9938_s4 = inlined_call_operand.vmem [shape: f32[24,8], index: 4, kind: input, shape index: {}]   ;;  %s9939_s5 = inlined_call_operand.vmem [shape: f32[24,1], index: 5, kind: input, shape index: {}]   ;;  %s9940_s6 = inlined_call_operand.vmem [shape: f32[8,64], index: 6, kind: input, shape index: {}]   ;;  %s9941_s7 = inlined_call_operand.vmem [shape: f32[64,8], index: 7, kind: input, shape index: {}]   ;;  %s9942_s8 = inlined_call_operand.vmem [shape: f32[6,64,64], index: 8, kind: input, shape index: {}]   ;;  %s9943_s9 = inlined_call_operand.vmem [shape: f32[6,64,64], index: 9, kind: input, shape index: {}]   ;;  %s9944_s10 = inlined_call_operand.vmem [shape: f32[2], index: 10, kind: input, shape index: {}]   ;;  %s9945_s11 = inlined_call_operand.vmem [shape: f32[8,144], index: 11, kind: input, shape index: {}]   ;;  %s9946_s12 = inlined_call_operand.vmem [shape: f32[3,64], index: 12, kind: input, shape index: {}]   ;;  %s9947_s13 = inlined_call_operand.vmem [shape: f32[8,1], index: 13, kind: input, shape index: {}]   ;;  %s9948_s14 = inlined_call_operand.vmem [shape: f32[8,1], index: 14, kind: input, shape index: {}]   ;;  %s9949_s15 = inlined_call_operand.vmem [shape: f32[2,8,64], index: 15, kind: output, shape index: {}]  }
   0x1 LB: > { %s8259_s19 = sadd.s32 4294967295, %s8151_s18   ;;  %p6543_p0 = scmp.ge.s32.totalorder %s8151_s18, 1  ;;  %s8151_s18 = sphi %s8253_s18, %s26_s18  }
   0x2   : > { %p382_p1 = scmp.lt.s32.totalorder %s8151_s18, 3  ;;  %s419_s22 = sshll.u32 %s9944_s10, 4  ;;  %s420_s22 = int_to_ptr.vmem [resolvable:$true] %s419_s22 }
   0x3   : > { %p7875_p3 = scmp.eq.s32.totalorder %s8259_s19, 0  ;;  %s8126_s24 = scalar_lea.vmem %s420_s22, 16 }
   0x4   : > { %p8266_p2 = pnand %p6543_p0, %p382_p1  ;;  %p8127_p6 = scmp.ne.s32.totalorder %s420_s22, %s8126_s24 }
   0x5   : > { %p8134_p10 = scmp.lt.s32.totalorder %s420_s22, %s420_s22  ;;  %p8135_p11 = scmp.lt.s32.totalorder %s8126_s24, %s8126_s24 }
   0x6   : > { %p7871_p4 = pneg %p8266_p2 }
   0x7   : > { %p8136_p12 = por %p8135_p11, %p8134_p10 }
   0x8   : > { %p7872_p5 = pnand %p7875_p3, %p7871_p4 }
   0xa   : > { %p8128_p7 = pneg %p7872_p5 }
   0xc   : > { %p8129_p8 = pnand %p8128_p7, %p8127_p6 }
   0xe   : > { %p8130_p9 = pneg %p8129_p8 }
  0x10   : > { %p8137_p13 = pnand %p8136_p12, %p8130_p9 }
  0x12   : > { %8140 = shalt.err (!%p8137_p13)
}
  0x13   : > { %s8153_s25 = smov [#allocation3]   ;;  %458 = sbr.rel (%p8266_p2) target bundleno = 6153 (0x1809), region = 80 }
  0x14   : > { %7874 = dma.vmem_to_smem (!%p7872_p5), %s420_s22, 16, %s8153_s25, [#allocation4]  }
  0x1a   : > { %8146 = dma.done.wait (%p7875_p3), [#allocation4], 16  }
  0x1b   : > { %8148 = vsyncadd (%p7875_p3), [#allocation4], 4294967280 }
  0x1c   : > { %464 = sfence }
  0x1d   : > { %p509_p0 = scmp.lt.s32.totalorder %s8259_s19, 1  ;;  %v8154_v0 = vmov 0.0   ;;  %vm8155_vm0 = vmmov 0   ;;  %v535_v1 = vld [vmem:[%s9937_s3] sm:$0xff]  ;;  %v8156_v2 = vmov 0   ;;  %v770_v4 = vld [vmem:[%s9942_s8 + $0x8] sm:$0xff] }
  0x1e   : > { %6963 = vmatprep.subr.mxu0 %v8154_v0  ;;  %6965 = vmatprep.mubr.msk.f32.mxu0 %vm8155_vm0, %v8154_v0  ;;  %v769_v3 = vld [vmem:[%s9942_s8] sm:$0xff]  ;;  %vm553_vm1 = vcmask 64512   ;;  %v771_v8 = vld [vmem:[%s9942_s8 + $0x10] sm:$0xff]  ;;  %v772_v9 = vld [vmem:[%s9942_s8 + $0x18] sm:$0xff]  ;;  %v8157_v10 = vmov 0.0|0.0   ;;  %vm753_vm2 = vcmask 523264  }
  0x1f   : > { %s9952_s19 = smov (!%p509_p0, %s8259_s19), 1  ;;  %7905 = vset.pattern.permute.xlu0 %v8156_v2  ;;  %6974 = vmatprep.subr.mxu1 %v8154_v0  ;;  %v532_v5 = vld [vmem:[%s9936_s2] sm:$0xff]  ;;  %v7554_v6 = vpack.c.bf16 %v770_v4, %v769_v3  ;;  %v7557_v11 = vpack.c.bf16 %v772_v9, %v771_v8  ;;  %v778_v14 = vld [vmem:[%s9943_s9 + $0x8] sm:$0xff]  ;;  %v779_v20 = vld [vmem:[%s9943_s9 + $0x10] sm:$0xff]  ;;  %vm5975_vm3 = vcmask 1041409   ;;  %vm5977_vm4 = vcmask 1042434  }
  0x20   : > { %540 = vperm.xlu0 %7905, %v535_v1   ;;  %6976 = vmatprep.mubr.msk.f32.mxu1 %vm8155_vm0, %v8154_v0  ;;  %s8298_s17 = sshll.u32 %s9952_s19, 3  ;;  %v777_v13 = vld [vmem:[%s9943_s9] sm:$0xff]  ;;  %v774_v18 = vld [vmem:[%s9942_s8 + $0x28] sm:$0xff]  ;;  %v780_v21 = vld [vmem:[%s9943_s9 + $0x18] sm:$0xff]  ;;  %vm5979_vm5 = vcmask 1043459   ;;  %vm5981_vm6 = vcmask 1044484  }
  0x21   : > { %7906 = vset.pattern.permute.xlu1 %v8156_v2  ;;  %s8304_s22 = scalar_lea.vmem %s9934_s0, %s8298_s17  ;;  %s8326_s30 = scalar_lea.vmem %s9935_s1, %s8298_s17  ;;  %v643_v15 = vld [vmem:[%s9938_s4] sm:$0xff]  ;;  %v7542_v16 = vpack.c.bf16 %v778_v14, %v777_v13  ;;  %v775_v22 = vld [vmem:[%s9942_s8 + $0x30] sm:$0xff]  ;;  %v7545_v23 = vpack.c.bf16 %v780_v21, %v779_v20  ;;  %v776_v24 = vld [vmem:[%s9942_s8 + $0x38] sm:$0xff]  ;;  %vm5983_vm7 = vcmask 1045509   ;;  %vm5985_vm8 = vcmask 1046534  }
  0x22   : > { %v530_v7 = vld [vmem:[%s8304_s22] sm:$0xff]  ;;  %v7563_v25 = vpack.c.bf16 %v776_v24, %v775_v22  ;;  %v533_v26 = vld [vmem:[%s9936_s2 + $0x8] sm:$0xff]  ;;  %v534_v31 = vld [vmem:[%s9936_s2 + $0x10] sm:$0xff]  ;;  %vm5987_vm9 = vcmask 1047559   ;;  %vm6248_vm10 = vcmask 72704   ;;  %vm6251_vm11 = vcmask 671304  }
  0x23   : > { %6964 = vmatpush3.msra.mxu0 %v530_v7  ;;  %v531_v12 = vld [vmem:[%s8326_s30] sm:$0xff]  ;;  %v644_v27 = vld [vmem:[%s9938_s4 + $0x8] sm:$0xff]  ;;  %v645_v32 = vld [vmem:[%s9938_s4 + $0x10] sm:$0xff]  ;;  %6250 = vst.msk [vmem:[#allocation2 + $0x8] sm:$0xff] %vm6248_vm10, %v8154_v0  ;;  %s5931_s24 = sld [smem:[#allocation3]]  ;;  %s6691_s25 = sld [smem:[#allocation3 + $0x1]] }
  0x24   : > { %6966 = vmatmul.mubr.msk.f32.vlgmr.msra.gmra.mrb[0].mxu0 %vm553_vm1, %v532_v5  ;;  %7553 = vmatprep.subr.bf16.mxu0 %v8157_v10  ;;  %v773_v17 = vld [vmem:[%s9942_s8 + $0x20] sm:$0xff]  ;;  %v782_v29 = vld [vmem:[%s9943_s9 + $0x28] sm:$0xff]  ;;  %v783_v33 = vld [vmem:[%s9943_s9 + $0x30] sm:$0xff]  ;;  %6249 = vst.msk [vmem:[#allocation2] sm:$0xff] %vm6248_vm10, %v8154_v0  ;;  %s8159_s26 = smov 9   ;;  %s8160_s28 = smov 16  }
  0x25   : > { %7555 = vmatpush3.bf16.msra.mxu0 %v7554_v6  ;;  %6968 = vmatprep.mubr.msk.f32.mxu0 %vm8155_vm0, %v8154_v0  ;;  %v7560_v19 = vpack.c.bf16 %v774_v18, %v773_v17  ;;  %v781_v28 = vld [vmem:[%s9943_s9 + $0x20] sm:$0xff]  ;;  %v784_v34 = vld [vmem:[%s9943_s9 + $0x38] sm:$0xff]  ;;  %v523_v53 = vld [vmem:[%s9941_s7 + $0x8] sm:$0xff]  ;;  %6253 = vst.msk [vmem:[#allocation2 + $0x8] sm:$0xff] %vm6251_vm11, %v8154_v0  ;;  %s8162_s20 = smov 8   ;;  %s8163_s21 = smov 10  }
  0x26   : > { %7556 = vmatprep.subr.bf16.mxu0 %v8157_v10  ;;  %6975 = vmatpush3.msra.mxu1 %v531_v12  ;;  %v7548_v30 = vpack.c.bf16 %v782_v29, %v781_v28  ;;  %v7551_v35 = vpack.c.bf16 %v784_v34, %v783_v33  ;;  %v522_v52 = vld [vmem:[%s9941_s7] sm:$0xff]  ;;  %v524_v58 = vld [vmem:[%s9941_s7 + $0x10] sm:$0xff]  ;;  %v525_v59 = vld [vmem:[%s9941_s7 + $0x18] sm:$0xff]  ;;  %6252 = vst.msk [vmem:[#allocation2] sm:$0xff] %vm6251_vm11, %v8154_v0  ;;  %s8164_s23 = smov 18   ;;  %vm6261_vm12 = vcmask 597064  }
  0x27   : > { %6977 = vmatmul.mubr.msk.f32.vlgmr.msra.gmra.mrb[0].mxu1 %vm553_vm1, %v643_v15  ;;  %7541 = vmatprep.subr.bf16.mxu1 %v8157_v10  ;;  %v8414_v56 = vpack.c.bf16 %v523_v53, %v522_v52  ;;  %v8430_v60 = vpack.c.bf16 %v525_v59, %v524_v58  ;;  %v526_v8 = vld [vmem:[%s9941_s7 + $0x20] sm:$0xff]  ;;  %v527_v9 = vld [vmem:[%s9941_s7 + $0x28] sm:$0xff]  ;;  %v528_v13 = vld [vmem:[%s9941_s7 + $0x30] sm:$0xff]  ;;  %s8169_s19 = smov 118   ;;  %s8170_s27 = smov 112   ;;  %vm6374_vm13 = vcmask 130048  }
  0x28   : > { %7543 = vmatpush3.bf16.msra.mxu1 %v7542_v16  ;;  %6979 = vmatprep.mubr.msk.f32.mxu1 %vm8155_vm0, %v8154_v0  ;;  %v8458_v12 = vld [vmem:[%s9940_s6] sm:$0xff]  ;;  %v529_v14 = vld [vmem:[%s9941_s7 + $0x38] sm:$0xff]  ;;  %v931_v16 = vlaneseq  ;;  %s8172_s29 = smov 110  }
  0x29   : > { %7558 = vmatpush3.bf16.msra.mxu0 %v7557_v11  ;;  %7544 = vmatprep.subr.bf16.mxu1 %v8157_v10  ;;  %v8453_v11 = vpack.c.bf16 %v527_v9, %v526_v8  ;;  %v8472_v15 = vpack.c.bf16 %v529_v14, %v528_v13 }
  0x2a   : > { %7559 = vmatprep.subr.bf16.mxu0 %v8157_v10  ;;  %6969 = vmatmul.mubr.msk.f32.gmra.mrb[2].mxu0 %vm553_vm1, %v533_v26  ;;  %v8477_v17 = vshrl.u32 %v931_v16, 7 }
  0x2b   : > { %6980 = vmatmul.mubr.msk.f32.gmra.mrb[2].mxu1 %vm553_vm1, %v644_v27  ;;  %6971 = vmatprep.mubr.msk.f32.mxu0 %vm8155_vm0, %v8154_v0 }
  0x2c   : > { %7546 = vmatpush3.bf16.msra.mxu1 %v7545_v23  ;;  %6982 = vmatprep.mubr.msk.f32.mxu1 %vm8155_vm0, %v8154_v0  ;;  %v8480_v20 = vsub.s32 0, %v8477_v17 }
  0x2d   : > { %7561 = vmatpush3.bf16.msra.mxu0 %v7560_v19  ;;  %7547 = vmatprep.subr.bf16.mxu1 %v8157_v10 }
  0x2e   : > { %7562 = vmatprep.subr.bf16.mxu0 %v8157_v10  ;;  %6972 = vmatmul.mubr.msk.f32.gmra.mrb[4].mxu0 %vm553_vm1, %v534_v31 }
  0x2f   : > { %6983 = vmatmul.mubr.msk.f32.gmra.mrb[4].mxu1 %vm553_vm1, %v645_v32  ;;  %7020 = vmatprep.mubr.msk.f32.mxu0 %vm8155_vm0, %v8154_v0 }
  0x30   : > { %7549 = vmatpush3.bf16.msra.mxu1 %v7548_v30  ;;  %7001 = vmatprep.mubr.msk.f32.mxu1 %vm8155_vm0, %v8154_v0 }
  0x31   : > { %7564 = vmatpush3.bf16.msra.mxu0 %v7563_v25  ;;  %7550 = vmatprep.subr.bf16.mxu1 %v8157_v10 }
  0x32   : > { %7061 = vmatprep.subr.mxu0 %v8154_v0 }
  0x34   : > { %7552 = vmatpush3.bf16.msra.mxu1 %v7551_v35 }
  0x35   : > { %7565 = vmatprep.subr.bf16.mxu1 %v8157_v10 }
  0x9f   : > { %v541_v36 = vpop.permute.xlu0 %540 }
  0xf7   : > { %v629_v37 = vpop.f32.mrb[0].mxu0 }
  0xf8   : > { %v8402_v38 = vadd.f32 %v629_v37, %v541_v36  ;;  %v6967_v39 = vpop.f32.mrb[1].mxu0 }
  0xfa   : > { %v754_v40 = vsel %vm753_vm2, %v8402_v38, -inf  ;;  %v761_v41 = vsel %vm753_vm2, %v8402_v38, 0.0  ;;  %v8437_v61 = vpop.f32.mrb[0].mxu1 }
  0xfb   : > { %v755_v42 = vrot.slane %v754_v40, 4  ;;  %v762_v43 = vrot.slane %v761_v41, 4  ;;  %v6978_v62 = vpop.f32.mrb[1].mxu1 }
  0xfd   : > { %v756_v44 = vmax.f32 %v754_v40, %v755_v42  ;;  %v763_v45 = vadd.f32 %v762_v43, %v761_v41  ;;  %v8439_v63 = vpop.f32.mrb[2].mxu0 }
  0xfe   : > { %v8441_v1 = vpop.f32.mrb[2].mxu1  ;;  %v6970_v2 = vpop.f32.mrb[3].mxu0 }
  0xff   : > { %v757_v46 = vrot.slane %v756_v44, 2  ;;  %v764_v47 = vrot.slane %v763_v45, 2  ;;  %v6981_v3 = vpop.f32.mrb[3].mxu1 }
 0x100   : > { %v6574_v3 = vld [vmem:[%s9943_s9 + $0x40] sm:$0xff] }
 0x101   : > { %v758_v48 = vmax.f32 %v756_v44, %v757_v46  ;;  %v765_v49 = vadd.f32 %v764_v47, %v763_v45  ;;  %v8443_v4 = vpop.f32.mrb[4].mxu0  ;;  %v536_v46 = vld [vmem:[%s9937_s3 + $0x8] sm:$0xff] }
 0x102   : > { %v8445_v5 = vpop.f32.mrb[4].mxu1  ;;  %v6973_v6 = vpop.f32.mrb[5].mxu0 }
 0x103   : > { %v759_v50 = vrot.slane %v758_v48, 1  ;;  %v766_v51 = vrot.slane %v765_v49, 1  ;;  %v6984_v7 = vpop.f32.mrb[5].mxu1  ;;  %v6575_v6 = vld [vmem:[%s9943_s9 + $0x48] sm:$0xff] }
 0x104   : > { %v7590_v9 = vpack.c.bf16 %v6575_v6, %v6574_v3 }
 0x105   : > { %v760_v54 = vmax.f32 %v758_v48, %v759_v50  ;;  %v767_v55 = vadd.f32 %v766_v51, %v765_v49 }
 0x107   : > { %v768_v57 = vmul.f32 0.125, %v767_v55  ;;  %7021 = vmatmul.mubr.msk.f32.vlgmr.msra.gmra.mrb[6].mxu0 %vm753_vm2, %v760_v54 }
 0x108   : > { %7062 = vmatpush3.xpose.msk.msra.mxu0 %vm753_vm2, %v8402_v38  ;;  %7063 = vmatprep.mubr.msk.f32.mxu0 %vm8155_vm0, %v8154_v0 }
 0x109   : > { %7002 = vmatmul.mubr.msk.f32.vlgmr.msra.gmra.mrb[6].mxu1 %vm753_vm2, %v768_v57  ;;  %7071 = vmatprep.subr.mxu0 %v8154_v0 }
 0x10a   : > { %7567 = vmatpush3.bf16.msra.mxu1 %v8414_v56  ;;  %7039 = vmatprep.mubr.msk.f32.mxu1 %vm8155_vm0, %v8154_v0 }
 0x10b   : > { %7568 = vmatprep.subr.bf16.mxu1 %v8157_v10  ;;  %7064 = vmatmul.mubr.msk.f32.vlgmr.msra.gmra.mrb[8].mxu0 %vm753_vm2, %v8458_v12 }
 0x10c   : > { %7073 = vmatprep.mubr.msk.f32.mxu0 %vm8155_vm0, %v8154_v0 }
 0x10e   : > { %7570 = vmatpush3.bf16.msra.mxu1 %v8430_v60 }
 0x10f   : > { %7571 = vmatprep.subr.bf16.mxu1 %v8157_v10 }
 0x112   : > { %7573 = vmatpush3.bf16.msra.mxu1 %v8453_v11 }
 0x113   : > { %7574 = vmatprep.subr.bf16.mxu1 %v8157_v10 }
 0x116   : > { %7576 = vmatpush3.bf16.msra.mxu1 %v8472_v15 }
 0x117   : > { %7577 = vmatprep.subr.bf16.mxu1 %v8157_v10 }
 0x1da   : > { %v927_v18 = vpop.f32.mrb[6].mxu0 }
 0x1db   : > { %v7022_v19 = vpop.f32.mrb[7].mxu0 }
 0x1dc   : > { %v854_v21 = vpop.f32.mrb[6].mxu1 }
 0x1dd   : > { %v928_v22 = vadd.f32 %v927_v18, %v854_v21  ;;  %v7003_v23 = vpop.f32.mrb[7].mxu1  ;;  %v6577_v18 = vld [vmem:[%s9943_s9 + $0x58] sm:$0xff] }
 0x1de   : > { %v6579_v23 = vld [vmem:[%s9943_s9 + $0x68] sm:$0xff] }
 0x1df   : > { %v934_v24 = vrot.slane %v928_v22, %v8480_v20  ;;  %v6578_v22 = vld [vmem:[%s9943_s9 + $0x60] sm:$0xff] }
 0x1e1   : > { %v935_v25 = vmul.f32 %v934_v24, %v8458_v12  ;;  %v7596_v24 = vpack.c.bf16 %v6579_v23, %v6578_v22 }
 0x1e3   : > { %7040 = vmatmul.mubr.msk.f32.vlgmr.msra.gmra.mrb[8].mxu1 %vm753_vm2, %v935_v25  ;;  %v6580_v25 = vld [vmem:[%s9943_s9 + $0x70] sm:$0xff] }
 0x1e4   : > { %7579 = vmatpush3.bf16.msra.mxu1 %v8414_v56  ;;  %7058 = vmatprep.mubr.msk.f32.mxu1 %vm8155_vm0, %v8154_v0 }
 0x1e5   : > { %7580 = vmatprep.subr.bf16.mxu1 %v8157_v10 }
 0x1e8   : > { %7582 = vmatpush3.bf16.msra.mxu1 %v8430_v60 }
 0x1e9   : > { %7583 = vmatprep.subr.bf16.mxu1 %v8157_v10 }
 0x1ec   : > { %7585 = vmatpush3.bf16.msra.mxu1 %v8453_v11 }
 0x1ed   : > { %7586 = vmatprep.subr.bf16.mxu1 %v8157_v10 }
 0x1f0   : > { %7588 = vmatpush3.bf16.msra.mxu1 %v8472_v15 }
 0x1f1   : > { %7066 = vmatprep.subr.mxu1 %v8154_v0 }
 0x1f3   : > { %7059 = vmatmul.mubr.msk.f32.vlgmr.msra.gmra.mrb[10].mxu1 %vm753_vm2, %v8402_v38 }
 0x1f4   : > { %7068 = vmatprep.mubr.msk.f32.mxu1 %vm8155_vm0, %v8154_v0 }
 0x2b6   : > { %v1005_v26 = vpop.f32.mrb[8].mxu1 }
 0x2b7   : > { %v7041_v27 = vpop.f32.mrb[9].mxu1  ;;  %v1157_v28 = vsel %vm553_vm1, %v1005_v26, -inf }
 0x2b8   : > { %1158 = vmax.xlane.f32.xlu0 %v1157_v28  ;;  %v1168_v29 = vrot.slane %v1157_v28, 4 }
 0x2ba   : > { %v1169_v30 = vmax.f32 %v1157_v28, %v1168_v29 }
 0x2bc   : > { %v1170_v31 = vrot.slane %v1169_v30, 2 }
 0x2be   : > { %v1171_v32 = vmax.f32 %v1169_v30, %v1170_v31 }
 0x2c0   : > { %v1172_v33 = vrot.slane %v1171_v32, 1 }
 0x2c2   : > { %v1173_v34 = vmax.f32 %v1171_v32, %v1172_v33  ;;  %v6566_v32 = vld [vmem:[%s9942_s8 + $0x40] sm:$0xff]  ;;  %v6567_v33 = vld [vmem:[%s9942_s8 + $0x48] sm:$0xff] }
 0x2c4   : > { %v1174_v35 = vsub.f32 %v1005_v26, %v1173_v34  ;;  %v7602_v34 = vpack.c.bf16 %v6567_v33, %v6566_v32 }
 0x2c6   : > { %v1078_v36 = vpop.f32.mrb[10].mxu1  ;;  %v1175_v43 = vmul.f32 1.442695, %v1174_v35 }
 0x2c7   : > { %v1082_v37 = vmul.f32 0.125, %v1078_v36  ;;  %v7060_v39 = vpop.f32.mrb[11].mxu1 }
 0x2c8   : > { %v6569_v39 = vld [vmem:[%s9942_s8 + $0x58] sm:$0xff] }
 0x2c9   : > { %7067 = vmatpush3.xpose.msk.msra.mxu1 %vm553_vm1, %v1082_v37  ;;  %v6568_v37 = vld [vmem:[%s9942_s8 + $0x50] sm:$0xff] }
 0x2ca   : > { %7589 = vmatprep.subr.bf16.mxu1 %v8157_v10 }
 0x345   : > { %v1159_v38 = vpop.xlane.xlu0 %1158 }
 0x346   : > { %v1160_v40 = vsub.f32 %v1005_v26, %v1159_v38  ;;  %v6581_v26 = vld [vmem:[%s9943_s9 + $0x78] sm:$0xff]  ;;  %v7605_v38 = vpack.c.bf16 %v6569_v39, %v6568_v37 }
 0x347   : > { %v7599_v29 = vpack.c.bf16 %v6581_v26, %v6580_v25 }
 0x348   : > { %v1161_v41 = vmul.f32 1.442695, %v1160_v40 }
 0x34a   : > { %7947 = vpow2.f32 %v1161_v41  ;;  %v6570_v41 = vld [vmem:[%s9942_s8 + $0x60] sm:$0xff] }
 0x34b   : > { %7949 = vpow2.f32 %v1175_v43 }
 0x354   : > { %v7948_v42 = vpop.eup %7947 }
 0x355   : > { %v1163_v44 = vsel %vm553_vm1, %v7948_v42, 0.0  ;;  %v7950_v45 = vpop.eup %7949 }
 0x356   : > { %1164 = vadd.xlane.f32.xlu1 %v1163_v44  ;;  %v1177_v47 = vsel %vm553_vm1, %v7950_v45, 0.0 }
 0x357   : > { %v1178_v48 = vrot.slane %v1177_v47, 4 }
 0x359   : > { %v1179_v49 = vadd.f32 %v1178_v48, %v1177_v47 }
 0x35b   : > { %v1180_v50 = vrot.slane %v1179_v49, 2 }
 0x35d   : > { %v1181_v51 = vadd.f32 %v1180_v50, %v1179_v49  ;;  %v1152_v50 = vpop.f32.mrb[8].mxu0 }
 0x35f   : > { %v1182_v52 = vrot.slane %v1181_v51, 1 }
 0x361   : > { %v1183_v53 = vadd.f32 %v1182_v52, %v1181_v51  ;;  %v1156_v51 = vmul.f32 0.125, %v1152_v50  ;;  %v7065_v52 = vpop.f32.mrb[9].mxu0 }
 0x362   : > { %v6601_v52 = vld [vmem:[%s9943_s9 + $0x90] sm:$0xff] }
 0x363   : > { %7951 = vrcp.f32 %v1183_v53  ;;  %7072 = vmatpush3.msra.mxu0 %v1156_v51 }
 0x364   : > { %7613 = vmatprep.subr.bf16.mxu0 %v8157_v10 }
 0x367   : > { %545 = vperm.xlu1 %7906, %v536_v46   ;;  %v6573_v46 = vld [vmem:[%s9942_s8 + $0x78] sm:$0xff] }
 0x36d   : > { %v7952_v54 = vpop.eup %7951 }
 0x36e   : > { %v1185_v55 = vmul.f32 %v7952_v54, %v7950_v45  ;;  %v6572_v45 = vld [vmem:[%s9942_s8 + $0x70] sm:$0xff] }
 0x36f   : > { %v7611_v47 = vpack.c.bf16 %v6573_v46, %v6572_v45  ;;  %v6600_v45 = vld [vmem:[%s9943_s9 + $0x88] sm:$0xff] }
 0x390   : > { %1262 = vxpose.xlu1.b32.start.end [1/1] (short) (narrow) %v1185_v55, 8 }
 0x3e3   : > { %v1165_v57 = vpop.xlane.xlu1 %1164 }
 0x3e4   : > { %7953 = vrcp.f32 %v1165_v57 }
 0x3e7   : > { %v546_v58 = vpop.permute.xlu1 %545 }
 0x3e8   : > { %v8508_v59 = vadd.f32 %v8439_v63, %v546_v58  ;;  %v6576_v63 = vld [vmem:[%s9943_s9 + $0x50] sm:$0xff] }
 0x3e9   : > { %v7593_v19 = vpack.c.bf16 %v6577_v18, %v6576_v63 }
 0x3ea   : > { %v1374_v62 = vsel %vm753_vm2, %v8508_v59, 0.0  ;;  %v1367_v28 = vsel %vm753_vm2, %v8508_v59, -inf }
 0x3eb   : > { %v1375_v2 = vrot.slane %v1374_v62, 4  ;;  %v1368_v30 = vrot.slane %v1367_v28, 4 }
 0x3ed   : > { %v1376_v7 = vadd.f32 %v1375_v2, %v1374_v62  ;;  %v1369_v35 = vmax.f32 %v1367_v28, %v1368_v30 }
 0x3ee   : > { %v7954_v8 = vpop.eup %7953 }
 0x3ef   : > { %v1377_v13 = vrot.slane %v1376_v7, 2  ;;  %v1167_v14 = vmul.f32 %v7954_v8, %v7948_v42  ;;  %v1370_v40 = vrot.slane %v1369_v35, 2  ;;  %v6571_v42 = vld [vmem:[%s9942_s8 + $0x68] sm:$0xff] }
 0x3f0   : > { %v7608_v43 = vpack.c.bf16 %v6571_v42, %v6570_v41  ;;  %v537_v41 = vld [vmem:[%s9937_s3 + $0x10] sm:$0xff] }
 0x3f1   : > { %7069 = vmatmul.mubr.msk.f32.vlgmr.msra.gmra.mrb[12].mxu1 %vm553_vm1, %v1167_v14  ;;  %v1378_v21 = vadd.f32 %v1377_v13, %v1376_v7  ;;  %v1371_v44 = vmax.f32 %v1369_v35, %v1370_v40 }
 0x3f2   : > { %7591 = vmatpush3.bf16.msra.mxu1 %v7590_v9  ;;  %7092 = vmatprep.mubr.msk.f32.mxu1 %vm8155_vm0, %v8154_v0 }
 0x3f3   : > { %7592 = vmatprep.subr.bf16.mxu1 %v8157_v10  ;;  %v1379_v27 = vrot.slane %v1378_v21, 1  ;;  %v1372_v48 = vrot.slane %v1371_v44, 1 }
 0x3f5   : > { %v1380_v31 = vadd.f32 %v1379_v27, %v1378_v21  ;;  %v1373_v49 = vmax.f32 %v1371_v44, %v1372_v48  ;;  %v6599_v44 = vld [vmem:[%s9943_s9 + $0x80] sm:$0xff] }
 0x3f6   : > { %7594 = vmatpush3.bf16.msra.mxu1 %v7593_v19 }
 0x3f7   : > { %7595 = vmatprep.subr.bf16.mxu1 %v8157_v10  ;;  %v1381_v36 = vmul.f32 0.125, %v1380_v31 }
 0x3fa   : > { %7597 = vmatpush3.bf16.msra.mxu1 %v7596_v24 }
 0x3fb   : > { %7598 = vmatprep.subr.bf16.mxu1 %v8157_v10 }
 0x3fe   : > { %7600 = vmatpush3.bf16.msra.mxu1 %v7599_v29 }
 0x3ff   : > { %7601 = vmatprep.subr.bf16.mxu1 %v8157_v10 }
 0x401   : > { %7093 = vmatmul.mubr.msk.f32.vlgmr.msra.gmra.mrb[14].mxu1 %vm753_vm2, %v1381_v36 }
 0x402   : > { %7603 = vmatpush3.bf16.msra.mxu1 %v7602_v34  ;;  %7111 = vmatprep.mubr.msk.f32.mxu1 %vm8155_vm0, %v8154_v0 }
 0x403   : > { %7604 = vmatprep.subr.bf16.mxu1 %v8157_v10 }
 0x406   : > { %7606 = vmatpush3.bf16.msra.mxu1 %v7605_v38 }
 0x407   : > { %7607 = vmatprep.subr.bf16.mxu1 %v8157_v10 }
 0x40a   : > { %7609 = vmatpush3.bf16.msra.mxu1 %v7608_v43 }
 0x40b   : > { %7610 = vmatprep.subr.bf16.mxu1 %v8157_v10 }
 0x40e   : > { %7612 = vmatpush3.bf16.msra.mxu1 %v7611_v47 }
 0x40f   : > { %7152 = vmatprep.subr.mxu1 %v8154_v0 }
 0x410   : > { %v1278_v53 = vpop.trf.xlu1 }
 0x411   : > { %7112 = vmatmul.mubr.msk.f32.vlgmr.msra.gmra.mrb[14].mxu1 %vm753_vm2, %v1373_v49  ;;  %7074 = vmatmul.mubr.msk.f32.vlgmr.msra.gmra.mrb[10].mxu0 %vm553_vm1, %v1278_v53  ;;  %v7638_v49 = vpack.c.bf16 %v6600_v45, %v6599_v44  ;;  %v6602_v53 = vld [vmem:[%s9943_s9 + $0x98] sm:$0xff] }
 0x412   : > { %7154 = vmatprep.mubr.msk.f32.mxu1 %vm8155_vm0, %v8154_v0  ;;  %7615 = vmatpush3.bf16.msra.mxu0 %v8414_v56 }
 0x413   : > { %7130 = vmatprep.mubr.msk.f32.mxu0 %vm8155_vm0, %v8154_v0  ;;  %7616 = vmatprep.subr.bf16.mxu0 %v8157_v10 }
 0x416   : > { %7618 = vmatpush3.bf16.msra.mxu0 %v8430_v60 }
 0x417   : > { %7153 = vmatpush3.xpose.msk.msra.mxu1 %vm753_vm2, %v8508_v59  ;;  %7619 = vmatprep.subr.bf16.mxu0 %v8157_v10 }
 0x418   : > { %7162 = vmatprep.subr.mxu1 %v8154_v0 }
 0x41a   : > { %7155 = vmatmul.mubr.msk.f32.vlgmr.msra.gmra.mrb[16].mxu1 %vm753_vm2, %v8458_v12  ;;  %7621 = vmatpush3.bf16.msra.mxu0 %v8453_v11 }
 0x41b   : > { %7164 = vmatprep.mubr.msk.f32.mxu1 %vm8155_vm0, %v8154_v0  ;;  %7622 = vmatprep.subr.bf16.mxu0 %v8157_v10 }
 0x41e   : > { %7624 = vmatpush3.bf16.msra.mxu0 %v8472_v15 }
 0x41f   : > { %7625 = vmatprep.subr.bf16.mxu0 %v8157_v10 }
 0x4c4   : > { %v8598_v54 = vpop.f32.mrb[12].mxu1 }
 0x4c5   : > { %v7070_v55 = vpop.f32.mrb[13].mxu1 }
 0x4e4   : > { %v1542_v57 = vpop.f32.mrb[14].mxu1  ;;  %v8617_v3 = vpop.f32.mrb[10].mxu0 }
 0x4e5   : > { %v1549_v58 = vrot.slane %v1542_v57, %v8480_v20  ;;  %v7113_v62 = vpop.f32.mrb[15].mxu1  ;;  %v7075_v6 = vpop.f32.mrb[11].mxu0 }
 0x4e6   : > { %v6604_v62 = vld [vmem:[%s9943_s9 + $0xa8] sm:$0xff] }
 0x4e7   : > { %v1550_v2 = vmul.f32 %v1549_v58, %v8458_v12  ;;  %v6603_v58 = vld [vmem:[%s9943_s9 + $0xa0] sm:$0xff] }
 0x4e8   : > { %v7644_v6 = vpack.c.bf16 %v6604_v62, %v6603_v58 }
 0x4e9   : > { %7131 = vmatmul.mubr.msk.f32.vlgmr.msra.gmra.mrb[12].mxu0 %vm753_vm2, %v1550_v2 }
 0x4ea   : > { %7627 = vmatpush3.bf16.msra.mxu0 %v8414_v56  ;;  %7149 = vmatprep.mubr.msk.f32.mxu0 %vm8155_vm0, %v8154_v0 }
 0x4eb   : > { %7628 = vmatprep.subr.bf16.mxu0 %v8157_v10 }
 0x4ee   : > { %7630 = vmatpush3.bf16.msra.mxu0 %v8430_v60 }
 0x4ef   : > { %7631 = vmatprep.subr.bf16.mxu0 %v8157_v10 }
 0x4f2   : > { %7633 = vmatpush3.bf16.msra.mxu0 %v8453_v11 }
 0x4f3   : > { %7634 = vmatprep.subr.bf16.mxu0 %v8157_v10 }
 0x4f6   : > { %7636 = vmatpush3.bf16.msra.mxu0 %v8472_v15 }
 0x4f7   : > { %7157 = vmatprep.subr.mxu0 %v8154_v0 }
 0x4f9   : > { %7150 = vmatmul.mubr.msk.f32.vlgmr.msra.gmra.mrb[14].mxu0 %vm753_vm2, %v8508_v59 }
 0x4fa   : > { %7159 = vmatprep.mubr.msk.f32.mxu0 %vm8155_vm0, %v8154_v0 }
 0x5bc   : > { %v1620_v7 = vpop.f32.mrb[12].mxu0 }
 0x5bd   : > { %v7132_v8 = vpop.f32.mrb[13].mxu0  ;;  %v1769_v9 = vsel %vm553_vm1, %v1620_v7, -inf }
 0x5be   : > { %1770 = vmax.xlane.f32.xlu0 %v1769_v9  ;;  %v1780_v13 = vrot.slane %v1769_v9, 4  ;;  %v6606_v8 = vld [vmem:[%s9943_s9 + $0xb8] sm:$0xff] }
 0x5c0   : > { %v1781_v14 = vmax.f32 %v1769_v9, %v1780_v13 }
 0x5c2   : > { %v1782_v63 = vrot.slane %v1781_v14, 2 }
 0x5c4   : > { %v1783_v18 = vmax.f32 %v1781_v14, %v1782_v63 }
 0x5c6   : > { %v1784_v19 = vrot.slane %v1783_v18, 1 }
 0x5c8   : > { %v1785_v21 = vmax.f32 %v1783_v18, %v1784_v19  ;;  %v6591_v19 = vld [vmem:[%s9942_s8 + $0x80] sm:$0xff] }
 0x5ca   : > { %v1786_v22 = vsub.f32 %v1620_v7, %v1785_v21  ;;  %v6592_v21 = vld [vmem:[%s9942_s8 + $0x88] sm:$0xff] }
 0x5cc   : > { %v1787_v23 = vmul.f32 1.442695, %v1786_v22  ;;  %v1693_v59 = vpop.f32.mrb[14].mxu0  ;;  %v7650_v22 = vpack.c.bf16 %v6592_v21, %v6591_v19 }
 0x5cd   : > { %v1697_v24 = vmul.f32 0.125, %v1693_v59  ;;  %v7151_v25 = vpop.f32.mrb[15].mxu0 }
 0x5ce   : > { %7955 = vpow2.f32 %v1787_v23  ;;  %v6594_v25 = vld [vmem:[%s9942_s8 + $0x98] sm:$0xff] }
 0x5cf   : > { %7158 = vmatpush3.xpose.msk.msra.mxu0 %vm553_vm1, %v1697_v24  ;;  %v6593_v24 = vld [vmem:[%s9942_s8 + $0x90] sm:$0xff] }
 0x5d0   : > { %7637 = vmatprep.subr.bf16.mxu0 %v8157_v10 }
 0x5d8   : > { %v7956_v26 = vpop.eup %7955 }
 0x5d9   : > { %v1789_v27 = vsel %vm553_vm1, %v7956_v26, 0.0 }
 0x5da   : > { %v1790_v28 = vrot.slane %v1789_v27, 4 }
 0x5dc   : > { %v1791_v29 = vadd.f32 %v1790_v28, %v1789_v27  ;;  %v6595_v28 = vld [vmem:[%s9942_s8 + $0xa0] sm:$0xff] }
 0x5de   : > { %v1792_v30 = vrot.slane %v1791_v29, 2 }
 0x5e0   : > { %v1793_v31 = vadd.f32 %v1792_v30, %v1791_v29  ;;  %v6596_v29 = vld [vmem:[%s9942_s8 + $0xa8] sm:$0xff] }
 0x5e1   : > { %v7656_v30 = vpack.c.bf16 %v6596_v29, %v6595_v28 }
 0x5e2   : > { %v1794_v32 = vrot.slane %v1793_v31, 1 }
 0x5e4   : > { %v1795_v33 = vadd.f32 %v1794_v32, %v1793_v31  ;;  %v6597_v32 = vld [vmem:[%s9942_s8 + $0xb0] sm:$0xff] }
 0x5e6   : > { %7957 = vrcp.f32 %v1795_v33  ;;  %v6598_v33 = vld [vmem:[%s9942_s8 + $0xb8] sm:$0xff] }
 0x5f0   : > { %v7958_v34 = vpop.eup %7957 }
 0x5f1   : > { %v1797_v35 = vmul.f32 %v7958_v34, %v7956_v26  ;;  %v7653_v26 = vpack.c.bf16 %v6594_v25, %v6593_v24  ;;  %v7659_v34 = vpack.c.bf16 %v6598_v33, %v6597_v32 }
 0x5f3   : > { %1874 = vxpose.xlu1.b32.start.end [1/1] (short) (narrow) %v1797_v35, 8 }
 0x64b   : > { %v1771_v36 = vpop.xlane.xlu0 %1770 }
 0x64c   : > { %v1772_v37 = vsub.f32 %v1620_v7, %v1771_v36  ;;  %v6605_v7 = vld [vmem:[%s9943_s9 + $0xb0] sm:$0xff] }
 0x64d   : > { %v7647_v14 = vpack.c.bf16 %v6606_v8, %v6605_v7  ;;  %v646_v8 = vld [vmem:[%s9939_s5] sm:$0xff] }
 0x64e   : > { %v1773_v39 = vmul.f32 1.442695, %v1772_v37  ;;  %v1764_v37 = vpop.f32.mrb[16].mxu1 }
 0x650   : > { %7959 = vpow2.f32 %v1773_v39  ;;  %v1768_v39 = vmul.f32 0.125, %v1764_v37  ;;  %v6625_v37 = vld [vmem:[%s9943_s9 + $0xc8] sm:$0xff] }
 0x652   : > { %7163 = vmatpush3.msra.mxu1 %v1768_v39 }
 0x653   : > { %7661 = vmatprep.subr.bf16.mxu1 %v8157_v10 }
 0x65a   : > { %v7960_v38 = vpop.eup %7959 }
 0x65b   : > { %v1775_v40 = vsel %vm553_vm1, %v7960_v38, 0.0 }
 0x65c   : > { %1776 = vadd.xlane.f32.xlu0 %v1775_v40 }
 0x672   : > { %550 = vperm.xlu0 %7905, %v537_v41  }
 0x673   : > { %v1890_v40 = vpop.trf.xlu1 }
 0x674   : > { %7165 = vmatmul.mubr.msk.f32.vlgmr.msra.gmra.mrb[18].mxu1 %vm553_vm1, %v1890_v40 }
 0x675   : > { %7663 = vmatpush3.bf16.msra.mxu1 %v8414_v56  ;;  %7221 = vmatprep.mubr.msk.f32.mxu1 %vm8155_vm0, %v8154_v0 }
 0x676   : > { %7664 = vmatprep.subr.bf16.mxu1 %v8157_v10 }
 0x679   : > { %7666 = vmatpush3.bf16.msra.mxu1 %v8430_v60 }
 0x67a   : > { %7667 = vmatprep.subr.bf16.mxu1 %v8157_v10 }
 0x67d   : > { %7669 = vmatpush3.bf16.msra.mxu1 %v8453_v11 }
 0x67e   : > { %7670 = vmatprep.subr.bf16.mxu1 %v8157_v10 }
 0x681   : > { %7672 = vmatpush3.bf16.msra.mxu1 %v8472_v15 }
 0x682   : > { %7673 = vmatprep.subr.bf16.mxu1 %v8157_v10 }
 0x6e9   : > { %v1777_v42 = vpop.xlane.xlu0 %1776 }
 0x6ea   : > { %7961 = vrcp.f32 %v1777_v42 }
 0x6f1   : > { %v551_v43 = vpop.permute.xlu0 %550 }
 0x6f2   : > { %v8634_v46 = vadd.f32 %v8443_v4, %v551_v43  ;;  %v7641_v4 = vpack.c.bf16 %v6602_v53, %v6601_v52 }
 0x6f4   : > { %v7962_v47 = vpop.eup %7961  ;;  %v1986_v48 = vsel %vm753_vm2, %v8634_v46, 0.0  ;;  %v1979_v13 = vsel %vm753_vm2, %v8634_v46, -inf }
 0x6f5   : > { %v1987_v50 = vrot.slane %v1986_v48, 4  ;;  %v1779_v51 = vmul.f32 %v7962_v47, %v7960_v38  ;;  %v1980_v63 = vrot.slane %v1979_v13, 4  ;;  %v7156_v38 = vpop.f32.mrb[17].mxu1 }
 0x6f7   : > { %v1988_v55 = vadd.f32 %v1987_v50, %v1986_v48  ;;  %7160 = vmatmul.mubr.msk.f32.vlgmr.msra.gmra.mrb[16].mxu0 %vm553_vm1, %v1779_v51  ;;  %v1981_v23 = vmax.f32 %v1979_v13, %v1980_v63 }
 0x6f8   : > { %7639 = vmatpush3.bf16.msra.mxu0 %v7638_v49  ;;  %7183 = vmatprep.mubr.msk.f32.mxu0 %vm8155_vm0, %v8154_v0 }
 0x6f9   : > { %v1989_v57 = vrot.slane %v1988_v55, 2  ;;  %7640 = vmatprep.subr.bf16.mxu0 %v8157_v10  ;;  %v1982_v27 = vrot.slane %v1981_v23, 2 }
 0x6fb   : > { %v1990_v2 = vadd.f32 %v1989_v57, %v1988_v55  ;;  %v1983_v31 = vmax.f32 %v1981_v23, %v1982_v27 }
 0x6fc   : > { %7642 = vmatpush3.bf16.msra.mxu0 %v7641_v4 }
 0x6fd   : > { %7643 = vmatprep.subr.bf16.mxu0 %v8157_v10  ;;  %v1991_v9 = vrot.slane %v1990_v2, 1  ;;  %v1984_v35 = vrot.slane %v1983_v31, 1 }
 0x6ff   : > { %v1992_v18 = vadd.f32 %v1991_v9, %v1990_v2  ;;  %v1985_v36 = vmax.f32 %v1983_v31, %v1984_v35 }
 0x700   : > { %7645 = vmatpush3.bf16.msra.mxu0 %v7644_v6 }
 0x701   : > { %7646 = vmatprep.subr.bf16.mxu0 %v8157_v10  ;;  %v1993_v59 = vmul.f32 0.125, %v1992_v18 }
 0x704   : > { %7648 = vmatpush3.bf16.msra.mxu0 %v7647_v14 }
 0x705   : > { %7649 = vmatprep.subr.bf16.mxu0 %v8157_v10 }
 0x707   : > { %7184 = vmatmul.mubr.msk.f32.vlgmr.msra.gmra.mrb[18].mxu0 %vm753_vm2, %v1993_v59 }
 0x708   : > { %7651 = vmatpush3.bf16.msra.mxu0 %v7650_v22  ;;  %7202 = vmatprep.mubr.msk.f32.mxu0 %vm8155_vm0, %v8154_v0 }
 0x709   : > { %7652 = vmatprep.subr.bf16.mxu0 %v8157_v10 }
 0x70c   : > { %7654 = vmatpush3.bf16.msra.mxu0 %v7653_v26 }
 0x70d   : > { %7655 = vmatprep.subr.bf16.mxu0 %v8157_v10 }
 0x710   : > { %7657 = vmatpush3.bf16.msra.mxu0 %v7656_v30 }
 0x711   : > { %7658 = vmatprep.subr.bf16.mxu0 %v8157_v10 }
 0x714   : > { %7660 = vmatpush3.bf16.msra.mxu0 %v7659_v34 }
 0x715   : > { %7243 = vmatprep.subr.mxu0 %v8154_v0 }
 0x717   : > { %7203 = vmatmul.mubr.msk.f32.vlgmr.msra.gmra.mrb[18].mxu0 %vm753_vm2, %v1985_v36  ;;  %v6624_v36 = vld [vmem:[%s9943_s9 + $0xc0] sm:$0xff] }
 0x718   : > { %7245 = vmatprep.mubr.msk.f32.mxu0 %vm8155_vm0, %v8154_v0  ;;  %v7686_v38 = vpack.c.bf16 %v6625_v37, %v6624_v36 }
 0x71d   : > { %7244 = vmatpush3.xpose.msk.msra.mxu0 %vm753_vm2, %v8634_v46 }
 0x71e   : > { %7253 = vmatprep.subr.mxu0 %v8154_v0 }
 0x720   : > { %7246 = vmatmul.mubr.msk.f32.vlgmr.msra.gmra.mrb[20].mxu0 %vm753_vm2, %v8458_v12 }
 0x721   : > { %7255 = vmatprep.mubr.msk.f32.mxu0 %vm8155_vm0, %v8154_v0 }
 0x747   : > { %v8737_v48 = vpop.f32.mrb[18].mxu1 }
 0x748   : > { %v7166_v49 = vpop.f32.mrb[19].mxu1 }
 0x749   : > { %v6629_v49 = vld [vmem:[%s9943_s9 + $0xe8] sm:$0xff] }
 0x7ca   : > { %v8718_v41 = vpop.f32.mrb[16].mxu0 }
 0x7cb   : > { %v7161_v42 = vpop.f32.mrb[17].mxu0 }
 0x7cc   : > { %v6626_v42 = vld [vmem:[%s9943_s9 + $0xd0] sm:$0xff] }
 0x7ea   : > { %v2154_v43 = vpop.f32.mrb[18].mxu0 }
 0x7eb   : > { %v2161_v44 = vrot.slane %v2154_v43, %v8480_v20  ;;  %v7204_v45 = vpop.f32.mrb[19].mxu0  ;;  %v6627_v43 = vld [vmem:[%s9943_s9 + $0xd8] sm:$0xff] }
 0x7ed   : > { %v2162_v47 = vmul.f32 %v2161_v44, %v8458_v12  ;;  %v7689_v44 = vpack.c.bf16 %v6627_v43, %v6626_v42 }
 0x7ef   : > { %7222 = vmatmul.mubr.msk.f32.vlgmr.msra.gmra.mrb[20].mxu1 %vm753_vm2, %v2162_v47  ;;  %v6628_v47 = vld [vmem:[%s9943_s9 + $0xe0] sm:$0xff] }
 0x7f0   : > { %7675 = vmatpush3.bf16.msra.mxu1 %v8414_v56  ;;  %7240 = vmatprep.mubr.msk.f32.mxu1 %vm8155_vm0, %v8154_v0 }
 0x7f1   : > { %7676 = vmatprep.subr.bf16.mxu1 %v8157_v10 }
 0x7f4   : > { %7678 = vmatpush3.bf16.msra.mxu1 %v8430_v60 }
 0x7f5   : > { %7679 = vmatprep.subr.bf16.mxu1 %v8157_v10 }
 0x7f8   : > { %7681 = vmatpush3.bf16.msra.mxu1 %v8453_v11 }
 0x7f9   : > { %7682 = vmatprep.subr.bf16.mxu1 %v8157_v10 }
 0x7fc   : > { %7684 = vmatpush3.bf16.msra.mxu1 %v8472_v15 }
 0x7fd   : > { %7248 = vmatprep.subr.mxu1 %v8154_v0 }
 0x7ff   : > { %7241 = vmatmul.mubr.msk.f32.vlgmr.msra.gmra.mrb[22].mxu1 %vm753_vm2, %v8634_v46 }
 0x800   : > { %7250 = vmatprep.mubr.msk.f32.mxu1 %vm8155_vm0, %v8154_v0 }
 0x8c2   : > { %v2232_v50 = vpop.f32.mrb[20].mxu1 }
 0x8c3   : > { %v7223_v51 = vpop.f32.mrb[21].mxu1  ;;  %v2381_v52 = vsel %vm553_vm1, %v2232_v50, -inf }
 0x8c4   : > { %2382 = vmax.xlane.f32.xlu0 %v2381_v52  ;;  %v2392_v53 = vrot.slane %v2381_v52, 4  ;;  %v6630_v51 = vld [vmem:[%s9943_s9 + $0xf0] sm:$0xff] }
 0x8c6   : > { %v2393_v55 = vmax.f32 %v2381_v52, %v2392_v53  ;;  %v6631_v52 = vld [vmem:[%s9943_s9 + $0xf8] sm:$0xff] }
 0x8c8   : > { %v2394_v4 = vrot.slane %v2393_v55, 2 }
 0x8ca   : > { %v2395_v57 = vmax.f32 %v2393_v55, %v2394_v4  ;;  %v7695_v4 = vpack.c.bf16 %v6631_v52, %v6630_v51 }
 0x8cc   : > { %v2396_v58 = vrot.slane %v2395_v57, 1 }
 0x8ce   : > { %v2397_v62 = vmax.f32 %v2395_v57, %v2396_v58 }
 0x8d0   : > { %v2398_v2 = vsub.f32 %v2232_v50, %v2397_v62  ;;  %v6616_v62 = vld [vmem:[%s9942_s8 + $0xc0] sm:$0xff] }
 0x8d2   : > { %v2305_v6 = vpop.f32.mrb[22].mxu1  ;;  %v2399_v63 = vmul.f32 1.442695, %v2398_v2  ;;  %v6617_v2 = vld [vmem:[%s9942_s8 + $0xc8] sm:$0xff] }
 0x8d3   : > { %v2309_v46 = vmul.f32 0.125, %v2305_v6  ;;  %v7242_v7 = vpop.f32.mrb[23].mxu1  ;;  %v7698_v6 = vpack.c.bf16 %v6617_v2, %v6616_v62 }
 0x8d5   : > { %7249 = vmatpush3.xpose.msk.msra.mxu1 %vm553_vm1, %v2309_v46 }
 0x8d6   : > { %7685 = vmatprep.subr.bf16.mxu1 %v8157_v10 }
 0x8da   : > { %651 = vperm.xlu0 %7905, %v646_v8   ;;  %v6618_v8 = vld [vmem:[%s9942_s8 + $0xd0] sm:$0xff] }
 0x951   : > { %v2383_v9 = vpop.xlane.xlu0 %2382 }
 0x952   : > { %v2384_v13 = vsub.f32 %v2232_v50, %v2383_v9  ;;  %v7692_v50 = vpack.c.bf16 %v6629_v49, %v6628_v47  ;;  %v6619_v9 = vld [vmem:[%s9942_s8 + $0xd8] sm:$0xff] }
 0x954   : > { %v2385_v14 = vmul.f32 1.442695, %v2384_v13  ;;  %v7701_v13 = vpack.c.bf16 %v6619_v9, %v6618_v8 }
 0x956   : > { %7963 = vpow2.f32 %v2385_v14 }
 0x957   : > { %7965 = vpow2.f32 %v2399_v63  ;;  %v6620_v63 = vld [vmem:[%s9942_s8 + $0xe0] sm:$0xff] }
 0x959   : > { %v652_v30 = vpop.permute.xlu0 %651 }
 0x95a   : > { %v8748_v31 = vadd.f32 %v8437_v61, %v652_v30 }
 0x95c   : > { %v2598_v33 = vsel %vm753_vm2, %v8748_v31, 0.0  ;;  %v2591_v55 = vsel %vm753_vm2, %v8748_v31, -inf }
 0x95d   : > { %v2599_v34 = vrot.slane %v2598_v33, 4  ;;  %v2592_v57 = vrot.slane %v2591_v55, 4 }
 0x95f   : > { %v2600_v35 = vadd.f32 %v2599_v34, %v2598_v33  ;;  %v2593_v46 = vmax.f32 %v2591_v55, %v2592_v57 }
 0x960   : > { %v7964_v18 = vpop.eup %7963 }
 0x961   : > { %v2387_v19 = vsel %vm553_vm1, %v7964_v18, 0.0  ;;  %v7966_v21 = vpop.eup %7965  ;;  %v2601_v40 = vrot.slane %v2600_v35, 2  ;;  %v2594_v14 = vrot.slane %v2593_v46, 2 }
 0x962   : > { %2388 = vadd.xlane.f32.xlu1 %v2387_v19  ;;  %v2401_v22 = vsel %vm553_vm1, %v7966_v21, 0.0 }
 0x963   : > { %v2402_v23 = vrot.slane %v2401_v22, 4  ;;  %v2602_v45 = vadd.f32 %v2601_v40, %v2600_v35 }
 0x965   : > { %v2403_v59 = vadd.f32 %v2402_v23, %v2401_v22  ;;  %v2603_v53 = vrot.slane %v2602_v45, 1  ;;  %v6622_v22 = vld [vmem:[%s9942_s8 + $0xf0] sm:$0xff]  ;;  %v6623_v23 = vld [vmem:[%s9942_s8 + $0xf8] sm:$0xff] }
 0x967   : > { %v2404_v24 = vrot.slane %v2403_v59, 2  ;;  %v2604_v58 = vadd.f32 %v2603_v53, %v2602_v45 }
 0x969   : > { %v2405_v25 = vadd.f32 %v2404_v24, %v2403_v59  ;;  %v2605_v7 = vmul.f32 0.125, %v2604_v58  ;;  %v7707_v59 = vpack.c.bf16 %v6623_v23, %v6622_v22  ;;  %v6649_v22 = vld [vmem:[%s9943_s9 + $0x100] sm:$0xff]  ;;  %v6650_v23 = vld [vmem:[%s9943_s9 + $0x108] sm:$0xff] }
 0x96b   : > { %v2406_v26 = vrot.slane %v2405_v25, 1 }
 0x96d   : > { %v2407_v27 = vadd.f32 %v2406_v26, %v2405_v25  ;;  %v2376_v26 = vpop.f32.mrb[20].mxu0 }
 0x96f   : > { %7967 = vrcp.f32 %v2407_v27  ;;  %v2380_v27 = vmul.f32 0.125, %v2376_v26  ;;  %v7734_v26 = vpack.c.bf16 %v6650_v23, %v6649_v22 }
 0x971   : > { %7254 = vmatpush3.msra.mxu0 %v2380_v27 }
 0x972   : > { %7709 = vmatprep.subr.bf16.mxu0 %v8157_v10 }
 0x979   : > { %v7968_v28 = vpop.eup %7967 }
 0x97a   : > { %v2409_v29 = vmul.f32 %v7968_v28, %v7966_v21  ;;  %v2595_v21 = vmax.f32 %v2593_v46, %v2594_v14  ;;  %v7247_v28 = vpop.f32.mrb[21].mxu0 }
 0x97c   : > { %v2596_v24 = vrot.slane %v2595_v21, 1 }
 0x97e   : > { %v2597_v25 = vmax.f32 %v2595_v21, %v2596_v24 }
 0x995   : > { %2486 = vxpose.xlu1.b32.start.end [1/1] (short) (narrow) %v2409_v29, 8 }
 0x9ef   : > { %v2389_v32 = vpop.xlane.xlu1 %2388 }
 0x9f0   : > { %7969 = vrcp.f32 %v2389_v32 }
 0x9fa   : > { %v7970_v39 = vpop.eup %7969 }
 0x9fb   : > { %v2391_v61 = vmul.f32 %v7970_v39, %v7964_v18  ;;  %v6621_v18 = vld [vmem:[%s9942_s8 + $0xe8] sm:$0xff] }
 0x9fc   : > { %v7704_v19 = vpack.c.bf16 %v6621_v18, %v6620_v63  ;;  %v647_v18 = vld [vmem:[%s9939_s5 + $0x8] sm:$0xff] }
 0x9fd   : > { %7251 = vmatmul.mubr.msk.f32.vlgmr.msra.gmra.mrb[24].mxu1 %vm553_vm1, %v2391_v61 }
 0x9fe   : > { %7687 = vmatpush3.bf16.msra.mxu1 %v7686_v38  ;;  %7274 = vmatprep.mubr.msk.f32.mxu1 %vm8155_vm0, %v8154_v0 }
 0x9ff   : > { %7688 = vmatprep.subr.bf16.mxu1 %v8157_v10 }
 0xa02   : > { %7690 = vmatpush3.bf16.msra.mxu1 %v7689_v44 }
 0xa03   : > { %7691 = vmatprep.subr.bf16.mxu1 %v8157_v10 }
 0xa06   : > { %7693 = vmatpush3.bf16.msra.mxu1 %v7692_v50 }
 0xa07   : > { %7694 = vmatprep.subr.bf16.mxu1 %v8157_v10 }
 0xa0a   : > { %7696 = vmatpush3.bf16.msra.mxu1 %v7695_v4 }
 0xa0b   : > { %7697 = vmatprep.subr.bf16.mxu1 %v8157_v10 }
 0xa0d   : > { %7275 = vmatmul.mubr.msk.f32.vlgmr.msra.gmra.mrb[26].mxu1 %vm753_vm2, %v2605_v7 }
 0xa0e   : > { %7699 = vmatpush3.bf16.msra.mxu1 %v7698_v6  ;;  %7293 = vmatprep.mubr.msk.f32.mxu1 %vm8155_vm0, %v8154_v0 }
 0xa0f   : > { %7700 = vmatprep.subr.bf16.mxu1 %v8157_v10 }
 0xa12   : > { %7702 = vmatpush3.bf16.msra.mxu1 %v7701_v13 }
 0xa13   : > { %7703 = vmatprep.subr.bf16.mxu1 %v8157_v10 }
 0xa15   : > { %v2502_v29 = vpop.trf.xlu1 }
 0xa16   : > { %7705 = vmatpush3.bf16.msra.mxu1 %v7704_v19  ;;  %7256 = vmatmul.mubr.msk.f32.vlgmr.msra.gmra.mrb[22].mxu0 %vm553_vm1, %v2502_v29  ;;  %v6651_v29 = vld [vmem:[%s9943_s9 + $0x110] sm:$0xff] }
 0xa17   : > { %7706 = vmatprep.subr.bf16.mxu1 %v8157_v10  ;;  %7711 = vmatpush3.bf16.msra.mxu0 %v8414_v56 }
 0xa18   : > { %7312 = vmatprep.mubr.msk.f32.mxu0 %vm8155_vm0, %v8154_v0  ;;  %7712 = vmatprep.subr.bf16.mxu0 %v8157_v10 }
 0xa1a   : > { %7708 = vmatpush3.bf16.msra.mxu1 %v7707_v59 }
 0xa1b   : > { %7334 = vmatprep.subr.mxu1 %v8154_v0  ;;  %7714 = vmatpush3.bf16.msra.mxu0 %v8430_v60 }
 0xa1c   : > { %7715 = vmatprep.subr.bf16.mxu0 %v8157_v10 }
 0xa1d   : > { %7294 = vmatmul.mubr.msk.f32.vlgmr.msra.gmra.mrb[26].mxu1 %vm753_vm2, %v2597_v25 }
 0xa1e   : > { %7336 = vmatprep.mubr.msk.f32.mxu1 %vm8155_vm0, %v8154_v0 }
 0xa1f   : > { %7717 = vmatpush3.bf16.msra.mxu0 %v8453_v11 }
 0xa20   : > { %7718 = vmatprep.subr.bf16.mxu0 %v8157_v10 }
 0xa23   : > { %7335 = vmatpush3.xpose.msk.msra.mxu1 %vm753_vm2, %v8748_v31  ;;  %7720 = vmatpush3.bf16.msra.mxu0 %v8472_v15 }
 0xa24   : > { %7344 = vmatprep.subr.mxu1 %v8154_v0  ;;  %7721 = vmatprep.subr.bf16.mxu0 %v8157_v10 }
 0xa26   : > { %7337 = vmatmul.mubr.msk.f32.vlgmr.msra.gmra.mrb[28].mxu1 %vm753_vm2, %v8458_v12 }
 0xa27   : > { %7346 = vmatprep.mubr.msk.f32.mxu1 %vm8155_vm0, %v8154_v0 }
 0xad0   : > { %v8838_v30 = vpop.f32.mrb[24].mxu1 }
 0xad1   : > { %v7252_v32 = vpop.f32.mrb[25].mxu1 }
 0xad2   : > { %v6652_v32 = vld [vmem:[%s9943_s9 + $0x118] sm:$0xff] }
 0xaf0   : > { %v2766_v33 = vpop.f32.mrb[26].mxu1 }
 0xaf1   : > { %v2773_v34 = vrot.slane %v2766_v33, %v8480_v20  ;;  %v7295_v35 = vpop.f32.mrb[27].mxu1 }
 0xaf2   : > { %v6653_v35 = vld [vmem:[%s9943_s9 + $0x120] sm:$0xff] }
 0xaf3   : > { %v2774_v36 = vmul.f32 %v2773_v34, %v8458_v12  ;;  %v8857_v12 = vpop.f32.mrb[22].mxu0 }
 0xaf4   : > { %v7257_v37 = vpop.f32.mrb[23].mxu0 }
 0xaf5   : > { %7313 = vmatmul.mubr.msk.f32.vlgmr.msra.gmra.mrb[24].mxu0 %vm753_vm2, %v2774_v36  ;;  %v6654_v36 = vld [vmem:[%s9943_s9 + $0x128] sm:$0xff] }
 0xaf6   : > { %7723 = vmatpush3.bf16.msra.mxu0 %v8414_v56  ;;  %7331 = vmatprep.mubr.msk.f32.mxu0 %vm8155_vm0, %v8154_v0 }
 0xaf7   : > { %7724 = vmatprep.subr.bf16.mxu0 %v8157_v10 }
 0xafa   : > { %7726 = vmatpush3.bf16.msra.mxu0 %v8430_v60 }
 0xafb   : > { %7727 = vmatprep.subr.bf16.mxu0 %v8157_v10 }
 0xafe   : > { %7729 = vmatpush3.bf16.msra.mxu0 %v8453_v11 }
 0xaff   : > { %7730 = vmatprep.subr.bf16.mxu0 %v8157_v10 }
 0xb02   : > { %7732 = vmatpush3.bf16.msra.mxu0 %v8472_v15 }
 0xb03   : > { %7339 = vmatprep.subr.mxu0 %v8154_v0 }
 0xb05   : > { %7332 = vmatmul.mubr.msk.f32.vlgmr.msra.gmra.mrb[26].mxu0 %vm753_vm2, %v8748_v31 }
 0xb06   : > { %7341 = vmatprep.mubr.msk.f32.mxu0 %vm8155_vm0, %v8154_v0 }
 0xbc8   : > { %v2844_v39 = vpop.f32.mrb[24].mxu0 }
 0xbc9   : > { %v7314_v38 = vpop.f32.mrb[25].mxu0  ;;  %v2993_v40 = vsel %vm553_vm1, %v2844_v39, -inf }
 0xbca   : > { %2994 = vmax.xlane.f32.xlu0 %v2993_v40  ;;  %v3004_v61 = vrot.slane %v2993_v40, 4  ;;  %v6655_v38 = vld [vmem:[%s9943_s9 + $0x130] sm:$0xff] }
 0xbcc   : > { %v3005_v42 = vmax.f32 %v2993_v40, %v3004_v61  ;;  %v6656_v40 = vld [vmem:[%s9943_s9 + $0x138] sm:$0xff] }
 0xbce   : > { %v3006_v43 = vrot.slane %v3005_v42, 2 }
 0xbd0   : > { %v3007_v44 = vmax.f32 %v3005_v42, %v3006_v43  ;;  %v7743_v43 = vpack.c.bf16 %v6656_v40, %v6655_v38 }
 0xbd2   : > { %v3008_v45 = vrot.slane %v3007_v44, 1 }
 0xbd4   : > { %v3009_v47 = vmax.f32 %v3007_v44, %v3008_v45 }
 0xbd6   : > { %v3010_v49 = vsub.f32 %v2844_v39, %v3009_v47  ;;  %v6641_v47 = vld [vmem:[%s9942_s8 + $0x100] sm:$0xff] }
 0xbd8   : > { %v3011_v50 = vmul.f32 1.442695, %v3010_v49  ;;  %v2917_v31 = vpop.f32.mrb[26].mxu0  ;;  %v6642_v49 = vld [vmem:[%s9942_s8 + $0x108] sm:$0xff] }
 0xbd9   : > { %v2921_v51 = vmul.f32 0.125, %v2917_v31  ;;  %v7333_v52 = vpop.f32.mrb[27].mxu0 }
 0xbda   : > { %7971 = vpow2.f32 %v3011_v50  ;;  %v7746_v50 = vpack.c.bf16 %v6642_v49, %v6641_v47  ;;  %v6643_v52 = vld [vmem:[%s9942_s8 + $0x110] sm:$0xff] }
 0xbdb   : > { %7340 = vmatpush3.xpose.msk.msra.mxu0 %vm553_vm1, %v2921_v51 }
 0xbdc   : > { %7733 = vmatprep.subr.bf16.mxu0 %v8157_v10 }
 0xbe4   : > { %v7972_v53 = vpop.eup %7971 }
 0xbe5   : > { %v3013_v55 = vsel %vm553_vm1, %v7972_v53, 0.0 }
 0xbe6   : > { %v3014_v4 = vrot.slane %v3013_v55, 4 }
 0xbe8   : > { %v3015_v57 = vadd.f32 %v3014_v4, %v3013_v55 }
 0xbea   : > { %v3016_v58 = vrot.slane %v3015_v57, 2 }
 0xbec   : > { %v3017_v62 = vadd.f32 %v3016_v58, %v3015_v57  ;;  %v6645_v57 = vld [vmem:[%s9942_s8 + $0x120] sm:$0xff]  ;;  %v6646_v58 = vld [vmem:[%s9942_s8 + $0x128] sm:$0xff] }
 0xbee   : > { %v3018_v2 = vrot.slane %v3017_v62, 1 }
 0xbf0   : > { %v3019_v6 = vadd.f32 %v3018_v2, %v3017_v62  ;;  %v7752_v62 = vpack.c.bf16 %v6646_v58, %v6645_v57 }
 0xbf2   : > { %7973 = vrcp.f32 %v3019_v6  ;;  %v6647_v6 = vld [vmem:[%s9942_s8 + $0x130] sm:$0xff] }
 0xbfc   : > { %v7974_v46 = vpop.eup %7973 }
 0xbfd   : > { %v3021_v7 = vmul.f32 %v7974_v46, %v7972_v53  ;;  %v6644_v53 = vld [vmem:[%s9942_s8 + $0x118] sm:$0xff] }
 0xbfe   : > { %v7749_v55 = vpack.c.bf16 %v6644_v53, %v6643_v52  ;;  %v6648_v46 = vld [vmem:[%s9942_s8 + $0x138] sm:$0xff] }
 0xbff   : > { %3098 = vxpose.xlu1.b32.start.end [1/1] (short) (narrow) %v3021_v7, 8  ;;  %v7755_v7 = vpack.c.bf16 %v6648_v46, %v6647_v6 }
 0xc57   : > { %v2995_v8 = vpop.xlane.xlu0 %2994 }
 0xc58   : > { %v2996_v9 = vsub.f32 %v2844_v39, %v2995_v8  ;;  %v7740_v39 = vpack.c.bf16 %v6654_v36, %v6653_v35 }
 0xc5a   : > { %v2997_v13 = vmul.f32 1.442695, %v2996_v9 }
 0xc5c   : > { %7975 = vpow2.f32 %v2997_v13  ;;  %v8945_v13 = vld [vmem:[%s9940_s6] sm:$0xff] }
 0xc66   : > { %v7976_v14 = vpop.eup %7975 }
 0xc67   : > { %v2999_v63 = vsel %vm553_vm1, %v7976_v14, 0.0 }
 0xc68   : > { %3000 = vadd.xlane.f32.xlu0 %v2999_v63 }
 0xc7e   : > { %656 = vperm.xlu0 %7905, %v647_v18  }
 0xcf5   : > { %v3001_v19 = vpop.xlane.xlu0 %3000 }
 0xcf6   : > { %7977 = vrcp.f32 %v3001_v19  ;;  %v3114_v19 = vpop.trf.xlu1 }
 0xcfd   : > { %v657_v21 = vpop.permute.xlu0 %656 }
 0xcfe   : > { %v8874_v59 = vadd.f32 %v8441_v1, %v657_v21  ;;  %v7737_v1 = vpack.c.bf16 %v6652_v32, %v6651_v29 }
 0xd00   : > { %v7978_v24 = vpop.eup %7977  ;;  %v3210_v25 = vsel %vm753_vm2, %v8874_v59, 0.0  ;;  %v3203_v42 = vsel %vm753_vm2, %v8874_v59, -inf }
 0xd01   : > { %v3211_v27 = vrot.slane %v3210_v25, 4  ;;  %v3003_v28 = vmul.f32 %v7978_v24, %v7976_v14  ;;  %v3204_v44 = vrot.slane %v3203_v42, 4  ;;  %v2988_v14 = vpop.f32.mrb[28].mxu1 }
 0xd02   : > { %v2992_v63 = vmul.f32 0.125, %v2988_v14  ;;  %v7338_v18 = vpop.f32.mrb[29].mxu1 }
 0xd03   : > { %v3212_v33 = vadd.f32 %v3211_v27, %v3210_v25  ;;  %7342 = vmatmul.mubr.msk.f32.vlgmr.msra.gmra.mrb[28].mxu0 %vm553_vm1, %v3003_v28  ;;  %v3205_v31 = vmax.f32 %v3203_v42, %v3204_v44  ;;  %v6675_v18 = vld [vmem:[%s9943_s9 + $0x148] sm:$0xff] }
 0xd04   : > { %7735 = vmatpush3.bf16.msra.mxu0 %v7734_v26  ;;  %7365 = vmatprep.mubr.msk.f32.mxu0 %vm8155_vm0, %v8154_v0 }
 0xd05   : > { %v3213_v34 = vrot.slane %v3212_v33, 2  ;;  %7736 = vmatprep.subr.bf16.mxu0 %v8157_v10  ;;  %v3206_v4 = vrot.slane %v3205_v31, 2  ;;  %7345 = vmatpush3.msra.mxu1 %v2992_v63  ;;  %v6674_v63 = vld [vmem:[%s9943_s9 + $0x140] sm:$0xff] }
 0xd06   : > { %7757 = vmatprep.subr.bf16.mxu1 %v8157_v10  ;;  %7347 = vmatmul.mubr.msk.f32.vlgmr.msra.gmra.mrb[30].mxu1 %vm553_vm1, %v3114_v19 }
 0xd07   : > { %v3214_v37 = vadd.f32 %v3213_v34, %v3212_v33  ;;  %v3207_v2 = vmax.f32 %v3205_v31, %v3206_v4  ;;  %7759 = vmatpush3.bf16.msra.mxu1 %v8414_v56  ;;  %7403 = vmatprep.mubr.msk.f32.mxu1 %vm8155_vm0, %v8154_v0 }
 0xd08   : > { %7738 = vmatpush3.bf16.msra.mxu0 %v7737_v1  ;;  %7760 = vmatprep.subr.bf16.mxu1 %v8157_v10 }
 0xd09   : > { %7739 = vmatprep.subr.bf16.mxu0 %v8157_v10  ;;  %v3215_v61 = vrot.slane %v3214_v37, 1  ;;  %v3208_v8 = vrot.slane %v3207_v2, 1 }
 0xd0b   : > { %v3216_v45 = vadd.f32 %v3215_v61, %v3214_v37  ;;  %v3209_v9 = vmax.f32 %v3207_v2, %v3208_v8  ;;  %7762 = vmatpush3.bf16.msra.mxu1 %v8430_v60 }
 0xd0c   : > { %7741 = vmatpush3.bf16.msra.mxu0 %v7740_v39  ;;  %7763 = vmatprep.subr.bf16.mxu1 %v8157_v10 }
 0xd0d   : > { %7742 = vmatprep.subr.bf16.mxu0 %v8157_v10  ;;  %v3217_v51 = vmul.f32 0.125, %v3216_v45 }
 0xd0f   : > { %7765 = vmatpush3.bf16.msra.mxu1 %v8453_v11 }
 0xd10   : > { %7744 = vmatpush3.bf16.msra.mxu0 %v7743_v43  ;;  %7766 = vmatprep.subr.bf16.mxu1 %v8157_v10 }
 0xd11   : > { %7745 = vmatprep.subr.bf16.mxu0 %v8157_v10 }
 0xd13   : > { %7366 = vmatmul.mubr.msk.f32.vlgmr.msra.gmra.mrb[30].mxu0 %vm753_vm2, %v3217_v51  ;;  %7768 = vmatpush3.bf16.msra.mxu1 %v8472_v15 }
 0xd14   : > { %7747 = vmatpush3.bf16.msra.mxu0 %v7746_v50  ;;  %7384 = vmatprep.mubr.msk.f32.mxu0 %vm8155_vm0, %v8154_v0 }
 0xd15   : > { %7748 = vmatprep.subr.bf16.mxu0 %v8157_v10  ;;  %7769 = vmatprep.subr.bf16.mxu1 %v8157_v10 }
 0xd18   : > { %7750 = vmatpush3.bf16.msra.mxu0 %v7749_v55 }
 0xd19   : > { %7751 = vmatprep.subr.bf16.mxu0 %v8157_v10 }
 0xd1c   : > { %7753 = vmatpush3.bf16.msra.mxu0 %v7752_v62 }
 0xd1d   : > { %7754 = vmatprep.subr.bf16.mxu0 %v8157_v10 }
 0xd20   : > { %7756 = vmatpush3.bf16.msra.mxu0 %v7755_v7 }
 0xd21   : > { %7425 = vmatprep.subr.mxu0 %v8154_v0 }
 0xd23   : > { %7385 = vmatmul.mubr.msk.f32.vlgmr.msra.gmra.mrb[30].mxu0 %vm753_vm2, %v3209_v9 }
 0xd24   : > { %7427 = vmatprep.mubr.msk.f32.mxu0 %vm8155_vm0, %v8154_v0 }
 0xd29   : > { %7426 = vmatpush3.xpose.msk.msra.mxu0 %vm753_vm2, %v8874_v59 }
 0xd2a   : > { %7435 = vmatprep.subr.mxu0 %v8154_v0 }
 0xd2c   : > { %7428 = vmatmul.mubr.msk.f32.vlgmr.msra.gmra.mrb[32].mxu0 %vm753_vm2, %v8945_v13 }
 0xd2d   : > { %7437 = vmatprep.mubr.msk.f32.mxu0 %vm8155_vm0, %v8154_v0 }
 0xdd6   : > { %v8963_v21 = vpop.f32.mrb[28].mxu0 }
 0xdd7   : > { %v7343_v22 = vpop.f32.mrb[29].mxu0 }
 0xdd8   : > { %v7782_v22 = vpack.c.bf16 %v6675_v18, %v6674_v63 }
 0xdd9   : > { %v8982_v27 = vpop.f32.mrb[30].mxu1 }
 0xdda   : > { %v7348_v28 = vpop.f32.mrb[31].mxu1 }
 0xdf6   : > { %v3378_v23 = vpop.f32.mrb[30].mxu0 }
 0xdf7   : > { %v3385_v24 = vrot.slane %v3378_v23, %v8480_v20  ;;  %v7386_v25 = vpop.f32.mrb[31].mxu0 }
 0xdf8   : > { %v6677_v25 = vld [vmem:[%s9943_s9 + $0x158] sm:$0xff] }
 0xdf9   : > { %v3386_v26 = vmul.f32 %v8945_v13, %v3385_v24  ;;  %v6676_v24 = vld [vmem:[%s9943_s9 + $0x150] sm:$0xff] }
 0xdfb   : > { %7404 = vmatmul.mubr.msk.f32.vlgmr.msra.gmra.mrb[32].mxu1 %vm753_vm2, %v3386_v26  ;;  %v7785_v26 = vpack.c.bf16 %v6677_v25, %v6676_v24 }
 0xdfc   : > { %7771 = vmatpush3.bf16.msra.mxu1 %v8414_v56  ;;  %7422 = vmatprep.mubr.msk.f32.mxu1 %vm8155_vm0, %v8154_v0 }
 0xdfd   : > { %7772 = vmatprep.subr.bf16.mxu1 %v8157_v10 }
 0xe00   : > { %7774 = vmatpush3.bf16.msra.mxu1 %v8430_v60 }
 0xe01   : > { %7775 = vmatprep.subr.bf16.mxu1 %v8157_v10 }
 0xe04   : > { %7777 = vmatpush3.bf16.msra.mxu1 %v8453_v11 }
 0xe05   : > { %7778 = vmatprep.subr.bf16.mxu1 %v8157_v10 }
 0xe08   : > { %7780 = vmatpush3.bf16.msra.mxu1 %v8472_v15 }
 0xe09   : > { %7430 = vmatprep.subr.mxu1 %v8154_v0 }
 0xe0b   : > { %7423 = vmatmul.mubr.msk.f32.vlgmr.msra.gmra.mrb[34].mxu1 %vm753_vm2, %v8874_v59  ;;  %v648_v59 = vld [vmem:[%s9939_s5 + $0x10] sm:$0xff] }
 0xe0c   : > { %7432 = vmatprep.mubr.msk.f32.mxu1 %vm8155_vm0, %v8154_v0 }
 0xece   : > { %v3456_v29 = vpop.f32.mrb[32].mxu1 }
 0xecf   : > { %v7405_v32 = vpop.f32.mrb[33].mxu1  ;;  %v3605_v33 = vsel %vm553_vm1, %v3456_v29, -inf }
 0xed0   : > { %3606 = vmax.xlane.f32.xlu1 %v3605_v33  ;;  %v3616_v1 = vrot.slane %v3605_v33, 4  ;;  %v6679_v32 = vld [vmem:[%s9943_s9 + $0x168] sm:$0xff] }
 0xed2   : > { %v3617_v34 = vmax.f32 %v3605_v33, %v3616_v1  ;;  %v6680_v1 = vld [vmem:[%s9943_s9 + $0x170] sm:$0xff] }
 0xed4   : > { %v3618_v35 = vrot.slane %v3617_v34, 2 }
 0xed6   : > { %v3619_v36 = vmax.f32 %v3617_v34, %v3618_v35  ;;  %v6681_v34 = vld [vmem:[%s9943_s9 + $0x178] sm:$0xff] }
 0xed8   : > { %v3620_v37 = vrot.slane %v3619_v36, 1 }
 0xeda   : > { %v3621_v39 = vmax.f32 %v3619_v36, %v3620_v37  ;;  %v7791_v37 = vpack.c.bf16 %v6681_v34, %v6680_v1 }
 0xedc   : > { %v3622_v38 = vsub.f32 %v3456_v29, %v3621_v39 }
 0xede   : > { %v3529_v40 = vpop.f32.mrb[34].mxu1  ;;  %v3623_v45 = vmul.f32 1.442695, %v3622_v38 }
 0xedf   : > { %v3533_v61 = vmul.f32 0.125, %v3529_v40  ;;  %v7424_v42 = vpop.f32.mrb[35].mxu1  ;;  %v6666_v40 = vld [vmem:[%s9942_s8 + $0x140] sm:$0xff] }
 0xee1   : > { %7431 = vmatpush3.xpose.msk.msra.mxu1 %vm553_vm1, %v3533_v61  ;;  %661 = vperm.xlu1 %7906, %v648_v59   ;;  %v6667_v59 = vld [vmem:[%s9942_s8 + $0x148] sm:$0xff] }
 0xee2   : > { %7781 = vmatprep.subr.bf16.mxu1 %v8157_v10  ;;  %v7794_v61 = vpack.c.bf16 %v6667_v59, %v6666_v40 }
 0xf5d   : > { %v3607_v43 = vpop.xlane.xlu1 %3606 }
 0xf5e   : > { %v3608_v44 = vsub.f32 %v3456_v29, %v3607_v43  ;;  %v6678_v29 = vld [vmem:[%s9943_s9 + $0x160] sm:$0xff] }
 0xf5f   : > { %v7788_v33 = vpack.c.bf16 %v6679_v32, %v6678_v29 }
 0xf60   : > { %v3609_v47 = vmul.f32 1.442695, %v3608_v44  ;;  %v6668_v44 = vld [vmem:[%s9942_s8 + $0x150] sm:$0xff] }
 0xf61   : > { %v662_v6 = vpop.permute.xlu1 %661 }
 0xf62   : > { %7979 = vpow2.f32 %v3609_v47  ;;  %v8993_v46 = vadd.f32 %v8445_v5, %v662_v6 }
 0xf63   : > { %7981 = vpow2.f32 %v3623_v45  ;;  %v6669_v45 = vld [vmem:[%s9942_s8 + $0x158] sm:$0xff] }
 0xf64   : > { %v3822_v8 = vsel %vm753_vm2, %v8993_v46, 0.0  ;;  %v3815_v36 = vsel %vm753_vm2, %v8993_v46, -inf  ;;  %v7797_v47 = vpack.c.bf16 %v6669_v45, %v6668_v44  ;;  %v5554_v45 = vrot.slane %v8617_v3, %v8480_v20 }
 0xf65   : > { %v3823_v9 = vrot.slane %v3822_v8, 4  ;;  %v3816_v39 = vrot.slane %v3815_v36, 4 }
 0xf67   : > { %v3824_v14 = vadd.f32 %v3823_v9, %v3822_v8  ;;  %v3817_v42 = vmax.f32 %v3815_v36, %v3816_v39 }
 0xf69   : > { %v3825_v23 = vrot.slane %v3824_v14, 2 }
 0xf6b   : > { %v3826_v28 = vadd.f32 %v3825_v23, %v3824_v14 }
 0xf6c   : > { %v7980_v49 = vpop.eup %7979 }
 0xf6d   : > { %v3611_v50 = vsel %vm553_vm1, %v7980_v49, 0.0  ;;  %v7982_v31 = vpop.eup %7981  ;;  %v3827_v35 = vrot.slane %v3826_v28, 1 }
 0xf6e   : > { %3612 = vadd.xlane.f32.xlu0 %v3611_v50  ;;  %v3625_v51 = vsel %vm553_vm1, %v7982_v31, 0.0  ;;  %v6670_v50 = vld [vmem:[%s9942_s8 + $0x160] sm:$0xff] }
 0xf6f   : > { %v3626_v52 = vrot.slane %v3625_v51, 4  ;;  %v3828_v38 = vadd.f32 %v3827_v35, %v3826_v28 }
 0xf71   : > { %v3627_v53 = vadd.f32 %v3626_v52, %v3625_v51  ;;  %v3829_v43 = vmul.f32 0.125, %v3828_v38 }
 0xf73   : > { %v3628_v55 = vrot.slane %v3627_v53, 2 }
 0xf75   : > { %v3629_v4 = vadd.f32 %v3628_v55, %v3627_v53  ;;  %v6672_v53 = vld [vmem:[%s9942_s8 + $0x170] sm:$0xff]  ;;  %v6673_v55 = vld [vmem:[%s9942_s8 + $0x178] sm:$0xff] }
 0xf77   : > { %v3630_v57 = vrot.slane %v3629_v4, 1 }
 0xf79   : > { %v3631_v58 = vadd.f32 %v3630_v57, %v3629_v4  ;;  %v7803_v4 = vpack.c.bf16 %v6673_v55, %v6672_v53  ;;  %v4457_v53 = vsub.s32 4, %v8477_v17 }
 0xf7b   : > { %7983 = vrcp.f32 %v3631_v58  ;;  %v4458_v55 = vrot.slane %v8963_v21, %v4457_v53 }
 0xf85   : > { %v7984_v62 = vpop.eup %7983 }
 0xf86   : > { %v3633_v2 = vmul.f32 %v7984_v62, %v7982_v31  ;;  %v6671_v31 = vld [vmem:[%s9942_s8 + $0x168] sm:$0xff]  ;;  %v3600_v62 = vpop.f32.mrb[32].mxu0 }
 0xf87   : > { %v7800_v51 = vpack.c.bf16 %v6671_v31, %v6670_v50  ;;  %v7429_v6 = vpop.f32.mrb[33].mxu0  ;;  %v4450_v31 = vsub.s32 3, %v8477_v17 }
 0xf9b   : > { %3710 = vxpose.xlu0.b32.start.end [1/1] (short) (narrow) %v3633_v2, 8  ;;  %v3604_v2 = vmul.f32 0.125, %v3600_v62 }
 0xf9d   : > { %7436 = vmatpush3.msra.mxu0 %v3604_v2  ;;  %v4471_v2 = vsub.s32 6, %v8477_v17 }
 0xf9e   : > { %7805 = vmatprep.subr.bf16.mxu0 %v8157_v10 }
 0xf9f   : > { %v4472_v6 = vrot.slane %v8963_v21, %v4471_v2 }
 0xffb   : > { %v3613_v7 = vpop.xlane.xlu0 %3612 }
 0xffc   : > { %7985 = vrcp.f32 %v3613_v7 }
0x1006   : > { %v7986_v19 = vpop.eup %7985 }
0x1007   : > { %v3615_v5 = vmul.f32 %v7986_v19, %v7980_v49  ;;  %v3818_v49 = vrot.slane %v3817_v42, 2 }
0x1009   : > { %7433 = vmatmul.mubr.msk.f32.vlgmr.msra.gmra.mrb[36].mxu1 %vm553_vm1, %v3615_v5  ;;  %v3819_v52 = vmax.f32 %v3817_v42, %v3818_v49 }
0x100a   : > { %7783 = vmatpush3.bf16.msra.mxu1 %v7782_v22  ;;  %7456 = vmatprep.mubr.msk.f32.mxu1 %vm8155_vm0, %v8154_v0 }
0x100b   : > { %7784 = vmatprep.subr.bf16.mxu1 %v8157_v10  ;;  %v3820_v57 = vrot.slane %v3819_v52, 1 }
0x100d   : > { %v3821_v58 = vmax.f32 %v3819_v52, %v3820_v57  ;;  %v5203_v52 = vrot.slane %v8598_v54, %v4450_v31  ;;  %v4464_v57 = vsub.s32 5, %v8477_v17 }
0x100e   : > { %7786 = vmatpush3.bf16.msra.mxu1 %v7785_v26 }
0x100f   : > { %7787 = vmatprep.subr.bf16.mxu1 %v8157_v10  ;;  %v5217_v62 = vrot.slane %v8598_v54, %v4464_v57 }
0x1012   : > { %7789 = vmatpush3.bf16.msra.mxu1 %v7788_v33 }
0x1013   : > { %7790 = vmatprep.subr.bf16.mxu1 %v8157_v10 }
0x1016   : > { %7792 = vmatpush3.bf16.msra.mxu1 %v7791_v37 }
0x1017   : > { %7793 = vmatprep.subr.bf16.mxu1 %v8157_v10 }
0x1019   : > { %7457 = vmatmul.mubr.msk.f32.vlgmr.msra.gmra.mrb[38].mxu1 %vm753_vm2, %v3829_v43  ;;  %v4436_v43 = vsub.s32 1, %v8477_v17 }
0x101a   : > { %7795 = vmatpush3.bf16.msra.mxu1 %v7794_v61  ;;  %7475 = vmatprep.mubr.msk.f32.mxu1 %vm8155_vm0, %v8154_v0 }
0x101b   : > { %7796 = vmatprep.subr.bf16.mxu1 %v8157_v10  ;;  %v3726_v7 = vpop.trf.xlu0  ;;  %v4437_v44 = vrot.slane %v8963_v21, %v4436_v43 }
0x101c   : > { %7438 = vmatmul.mubr.msk.f32.vlgmr.msra.gmra.mrb[34].mxu0 %vm553_vm1, %v3726_v7 }
0x101d   : > { %7807 = vmatpush3.bf16.msra.mxu0 %v8414_v56  ;;  %7494 = vmatprep.mubr.msk.f32.mxu0 %vm8155_vm0, %v8154_v0 }
0x101e   : > { %7798 = vmatpush3.bf16.msra.mxu1 %v7797_v47  ;;  %7808 = vmatprep.subr.bf16.mxu0 %v8157_v10  ;;  %v4443_v47 = vsub.s32 2, %v8477_v17 }
0x101f   : > { %7799 = vmatprep.subr.bf16.mxu1 %v8157_v10 }
0x1020   : > { %v4444_v49 = vrot.slane %v8963_v21, %v4443_v47  ;;  %v5196_v50 = vrot.slane %v8598_v54, %v4443_v47 }
0x1021   : > { %7810 = vmatpush3.bf16.msra.mxu0 %v8430_v60 }
0x1022   : > { %7801 = vmatpush3.bf16.msra.mxu1 %v7800_v51  ;;  %7811 = vmatprep.subr.bf16.mxu0 %v8157_v10  ;;  %v4451_v51 = vrot.slane %v8963_v21, %v4450_v31 }
0x1023   : > { %7802 = vmatprep.subr.bf16.mxu1 %v8157_v10 }
0x1025   : > { %7813 = vmatpush3.bf16.msra.mxu0 %v8453_v11 }
0x1026   : > { %7804 = vmatpush3.bf16.msra.mxu1 %v7803_v4  ;;  %7814 = vmatprep.subr.bf16.mxu0 %v8157_v10  ;;  %v5210_v4 = vrot.slane %v8598_v54, %v4457_v53 }
0x1027   : > { %7516 = vmatprep.subr.mxu1 %v8154_v0 }
0x1029   : > { %7476 = vmatmul.mubr.msk.f32.vlgmr.msra.gmra.mrb[38].mxu1 %vm753_vm2, %v3821_v58  ;;  %7816 = vmatpush3.bf16.msra.mxu0 %v8472_v15  ;;  %v4465_v58 = vrot.slane %v8963_v21, %v4464_v57 }
0x102a   : > { %7518 = vmatprep.mubr.msk.f32.mxu1 %vm8155_vm0, %v8154_v0  ;;  %7817 = vmatprep.subr.bf16.mxu0 %v8157_v10 }
0x102f   : > { %7517 = vmatpush3.xpose.msk.msra.mxu1 %vm753_vm2, %v8993_v46 }
0x1030   : > { %7526 = vmatprep.subr.mxu1 %v8154_v0 }
0x1032   : > { %7519 = vmatmul.mubr.msk.f32.vlgmr.msra.gmra.mrb[40].mxu1 %vm753_vm2, %v8945_v13 }
0x1033   : > { %7528 = vmatprep.mubr.msk.f32.mxu1 %vm8155_vm0, %v8154_v0 }
0x10dc   : > { %v9083_v8 = vpop.f32.mrb[36].mxu1 }
0x10dd   : > { %v7434_v9 = vpop.f32.mrb[37].mxu1 }
0x10fc   : > { %v3990_v14 = vpop.f32.mrb[38].mxu1 }
0x10fd   : > { %v3997_v63 = vrot.slane %v3990_v14, %v8480_v20  ;;  %v7477_v18 = vpop.f32.mrb[39].mxu1 }
0x10fe   : > { %v4478_v18 = vsub.s32 7, %v8477_v17 }
0x10ff   : > { %v3998_v19 = vmul.f32 %v8945_v13, %v3997_v63  ;;  %v5224_v63 = vrot.slane %v8598_v54, %v4471_v2 }
0x1101   : > { %7495 = vmatmul.mubr.msk.f32.vlgmr.msra.gmra.mrb[36].mxu0 %vm753_vm2, %v3998_v19  ;;  %v4479_v19 = vrot.slane %v8963_v21, %v4478_v18 }
0x1102   : > { %7819 = vmatpush3.bf16.msra.mxu0 %v8414_v56  ;;  %7513 = vmatprep.mubr.msk.f32.mxu0 %vm8155_vm0, %v8154_v0  ;;  %v9102_v56 = vpop.f32.mrb[34].mxu0 }
0x1103   : > { %7820 = vmatprep.subr.bf16.mxu0 %v8157_v10  ;;  %v7439_v22 = vpop.f32.mrb[35].mxu0 }
0x1104   : > { %v5231_v22 = vrot.slane %v8598_v54, %v4478_v18 }
0x1105   : > { %v4212_v7 = vpop.f32.mrb[40].mxu1 }
0x1106   : > { %7822 = vmatpush3.bf16.msra.mxu0 %v8430_v60  ;;  %v4216_v9 = vmul.f32 0.125, %v4212_v7  ;;  %v7520_v14 = vpop.f32.mrb[41].mxu1 }
0x1107   : > { %7823 = vmatprep.subr.bf16.mxu0 %v8157_v10 }
0x1108   : > { %7527 = vmatpush3.msra.mxu1 %v4216_v9 }
0x1109   : > { %7536 = vmatprep.subr.mxu1 %v8154_v0 }
0x110a   : > { %7825 = vmatpush3.bf16.msra.mxu0 %v8453_v11 }
0x110b   : > { %7826 = vmatprep.subr.bf16.mxu0 %v8157_v10 }
0x110e   : > { %7828 = vmatpush3.bf16.msra.mxu0 %v8472_v15 }
0x110f   : > { %7521 = vmatprep.subr.mxu0 %v8154_v0 }
0x1111   : > { %7514 = vmatmul.mubr.msk.f32.vlgmr.msra.gmra.mrb[38].mxu0 %vm753_vm2, %v8993_v46 }
0x1112   : > { %7523 = vmatprep.mubr.msk.f32.mxu0 %vm8155_vm0, %v8154_v0 }
0x11d4   : > { %v9104_v60 = vpop.f32.mrb[36].mxu0 }
0x11d5   : > { %v7496_v23 = vpop.f32.mrb[37].mxu0  ;;  %v4217_v11 = vsel %vm553_vm1, %v9104_v60, -inf }
0x11d6   : > { %4218 = vmax.xlane.f32.xlu1 %v4217_v11  ;;  %v4228_v5 = vrot.slane %v4217_v11, 4 }
0x11d8   : > { %v4229_v15 = vmax.f32 %v4217_v11, %v4228_v5 }
0x11da   : > { %v4230_v24 = vrot.slane %v4229_v15, 2 }
0x11dc   : > { %v4231_v25 = vmax.f32 %v4229_v15, %v4230_v24 }
0x11de   : > { %v4232_v26 = vrot.slane %v4231_v25, 1 }
0x11e0   : > { %v4233_v28 = vmax.f32 %v4231_v25, %v4232_v26  ;;  %v4430_v25 = vrot.slane %v8963_v21, %v8480_v20  ;;  %v5189_v21 = vrot.slane %v8598_v54, %v4436_v43 }
0x11e2   : > { %v4234_v46 = vsub.f32 %v9104_v60, %v4233_v28  ;;  %v4802_v28 = vrot.slane %v8982_v27, %v8480_v20 }
0x11e4   : > { %v4235_v29 = vmul.f32 1.442695, %v4234_v46  ;;  %v4141_v32 = vpop.f32.mrb[38].mxu0  ;;  %v5182_v46 = vrot.slane %v8598_v54, %v8480_v20  ;;  %v5582_v54 = vrot.slane %v8617_v3, %v4457_v53 }
0x11e5   : > { %v4145_v33 = vmul.f32 0.125, %v4141_v32  ;;  %v7515_v1 = vpop.f32.mrb[39].mxu0  ;;  %v4816_v32 = vrot.slane %v8982_v27, %v4443_v47 }
0x11e6   : > { %7987 = vpow2.f32 %v4235_v29  ;;  %v5561_v29 = vrot.slane %v8617_v3, %v4436_v43  ;;  %v4823_v1 = vrot.slane %v8982_v27, %v4450_v31 }
0x11e7   : > { %7522 = vmatpush3.xpose.msk.msra.mxu0 %vm553_vm1, %v4145_v33  ;;  %v5568_v33 = vrot.slane %v8617_v3, %v4443_v47 }
0x11e8   : > { %7531 = vmatprep.subr.mxu0 %v8154_v0 }
0x11f0   : > { %v7988_v34 = vpop.eup %7987 }
0x11f1   : > { %v4237_v35 = vsel %vm553_vm1, %v7988_v34, 0.0 }
0x11f2   : > { %v4238_v36 = vrot.slane %v4237_v35, 4 }
0x11f4   : > { %v4239_v37 = vadd.f32 %v4238_v36, %v4237_v35  ;;  %v4830_v35 = vrot.slane %v8982_v27, %v4457_v53  ;;  %v4837_v36 = vrot.slane %v8982_v27, %v4464_v57 }
0x11f6   : > { %v4240_v39 = vrot.slane %v4239_v37, 2 }
0x11f8   : > { %v4241_v38 = vadd.f32 %v4240_v39, %v4239_v37  ;;  %v5589_v37 = vrot.slane %v8617_v3, %v4464_v57  ;;  %v4844_v39 = vrot.slane %v8982_v27, %v4471_v2 }
0x11fa   : > { %v4242_v40 = vrot.slane %v4241_v38, 1 }
0x11fc   : > { %v4243_v59 = vadd.f32 %v4242_v40, %v4241_v38  ;;  %v5596_v38 = vrot.slane %v8617_v3, %v4471_v2  ;;  %v4851_v40 = vrot.slane %v8982_v27, %v4478_v18 }
0x11fe   : > { %7989 = vrcp.f32 %v4243_v59  ;;  %v5603_v59 = vrot.slane %v8617_v3, %v4478_v18 }
0x1208   : > { %v7990_v61 = vpop.eup %7989 }
0x1209   : > { %v4245_v42 = vmul.f32 %v7990_v61, %v7988_v34  ;;  %v5575_v34 = vrot.slane %v8617_v3, %v4450_v31  ;;  %v8158_v61 = vmov 1966171168  }
0x120b   : > { %4322 = vxpose.xlu1.b32.start.end [1/1] (short) (narrow) %v4245_v42, 8  ;;  %v4494_v42 = vunpack.c.l.s4 %v8158_v61 }
0x1229   : > { %4439 = vbcast.lane.b32.xlu1 %v4437_v44, 256 }
0x122d   : > { %5556 = vbcast.lane.b32.xlu1 %v5554_v45, 256 }
0x1231   : > { %4446 = vbcast.lane.b32.xlu1 %v4444_v49, 256 }
0x1235   : > { %5198 = vbcast.lane.b32.xlu1 %v5196_v50, 256 }
0x1239   : > { %4453 = vbcast.lane.b32.xlu1 %v4451_v51, 256 }
0x123d   : > { %5205 = vbcast.lane.b32.xlu1 %v5203_v52, 256 }
0x1241   : > { %4460 = vbcast.lane.b32.xlu1 %v4458_v55, 256 }
0x1245   : > { %5212 = vbcast.lane.b32.xlu1 %v5210_v4, 256 }
0x1249   : > { %4467 = vbcast.lane.b32.xlu1 %v4465_v58, 256 }
0x124d   : > { %5219 = vbcast.lane.b32.xlu1 %v5217_v62, 256 }
0x1251   : > { %4474 = vbcast.lane.b32.xlu1 %v4472_v6, 256 }
0x1255   : > { %5226 = vbcast.lane.b32.xlu1 %v5224_v63, 256 }
0x1259   : > { %4481 = vbcast.lane.b32.xlu1 %v4479_v19, 256 }
0x125d   : > { %5233 = vbcast.lane.b32.xlu1 %v5231_v22, 256 }
0x1263   : > { %v4219_v23 = vpop.xlane.xlu1 %4218 }
0x1264   : > { %v4220_v11 = vsub.f32 %v9104_v60, %v4219_v23  ;;  %v4809_v60 = vrot.slane %v8982_v27, %v4436_v43  ;;  %v4495_v43 = vunpack.c.0.s8 %v4494_v42 }
0x1266   : > { %v4221_v5 = vmul.f32 1.442695, %v4220_v11  ;;  %v9166_v44 = vsub.s32 %v4495_v43, %v8477_v17 }
0x1268   : > { %7991 = vpow2.f32 %v4221_v5  ;;  %v4499_v45 = vrot.slane %v8718_v41, %v9166_v44  ;;  %v4871_v57 = vrot.slane %v8737_v48, %v9166_v44  ;;  %v5251_v63 = vrot.slane %v9083_v8, %v9166_v44 }
0x126a   : > { %v4507_v47 = vcombine.high %v4499_v45, %v4499_v45  ;;  %v4515_v4 = vrot.slane %v4499_v45, %v9166_v44  ;;  %v4879_v2 = vcombine.high %v4871_v57, %v4871_v57  ;;  %v9183_v6 = vrot.slane %v4871_v57, %v9166_v44 }
0x126c   : > { %v9171_v50 = vrot.slane %v4507_v47, %v9166_v44  ;;  %v4544_v9 = vrot.slane %v4515_v4, %v8480_v20  ;;  %v9193_v22 = vrot.slane %v4879_v2, %v9166_v44  ;;  %v4916_v5 = vrot.slane %v9183_v6, %v8480_v20 }
0x126e   : > { %v4548_v27 = vrot.slane %v9171_v50, %v8480_v20 }
0x1272   : > { %v9136_v15 = vpop.eup %7991 }
0x1273   : > { %v4223_v24 = vsel %vm553_vm1, %v9136_v15, 0.0 }
0x1274   : > { %4224 = vadd.xlane.f32.xlu0 %v4223_v24 }
0x128a   : > { %4432 = vbcast.lane.b32.xlu0 %v4430_v25, 256  ;;  %v5623_v25 = vrot.slane %v9102_v56, %v9166_v44 }
0x128b   : > { %v4338_v26 = vpop.trf.xlu1 }
0x128c   : > { %7529 = vmatmul.mubr.msk.f32.vlgmr.msra.gmra.mrb[42].mxu1 %vm553_vm1, %v4338_v26 }
0x128d   : > { %7537 = vmatpush3.msra.mxu1 %v8945_v13  ;;  %7538 = vmatprep.mubr.msk.f32.mxu1 %vm8155_vm0, %v8154_v0 }
0x128e   : > { %4804 = vbcast.lane.b32.xlu0 %v4802_v28, 256  ;;  %v5259_v28 = vcombine.high %v5251_v63, %v5251_v63 }
0x1292   : > { %4811 = vbcast.lane.b32.xlu0 %v4809_v60, 256 }
0x1296   : > { %5184 = vbcast.lane.b32.xlu0 %v5182_v46, 256 }
0x129a   : > { %5191 = vbcast.lane.b32.xlu0 %v5189_v21, 256  ;;  %v5267_v21 = vrot.slane %v5251_v63, %v9166_v44 }
0x129b   : > { %v4440_v49 = vpop.permute.xlu1 %4439 }
0x129c   : > { %v4484_v31 = vmul.f32 8.0, %v4440_v49 }
0x129e   : > { %5563 = vbcast.lane.b32.xlu0 %v5561_v29, 256  ;;  %v9175_v3 = vmul.f32 %v4548_v27, %v4484_v31 }
0x129f   : > { %v5557_v52 = vpop.permute.xlu1 %5556 }
0x12a0   : > { %v4592_v51 = vsel %vm553_vm1, %v9175_v3, -inf }
0x12a2   : > { %4818 = vbcast.lane.b32.xlu0 %v4816_v32, 256 }
0x12a3   : > { %v4447_v53 = vpop.permute.xlu1 %4446 }
0x12a4   : > { %v4485_v43 = vmul.f32 8.0, %v4447_v53  ;;  %v4909_v53 = vcombine.high %v9183_v6, %v9183_v6 }
0x12a6   : > { %5570 = vbcast.lane.b32.xlu0 %v5568_v33, 256  ;;  %v4920_v33 = vrot.slane %v9193_v22, %v8480_v20 }
0x12a7   : > { %v5199_v58 = vpop.permute.xlu1 %5198 }
0x12aa   : > { %4825 = vbcast.lane.b32.xlu0 %v4823_v1, 256 }
0x12ab   : > { %v9190_v18 = vpop.permute.xlu1 %4453 }
0x12ae   : > { %5577 = vbcast.lane.b32.xlu0 %v5575_v34, 256  ;;  %v9211_v34 = vrot.slane %v5623_v25, %v9166_v44 }
0x12af   : > { %v5206_v1 = vpop.permute.xlu1 %5205 }
0x12b0   : > { %v5668_v61 = vrot.slane %v9211_v34, %v8480_v20 }
0x12b2   : > { %4832 = vbcast.lane.b32.xlu0 %v4830_v35, 256 }
0x12b3   : > { %v4461_v45 = vpop.permute.xlu1 %4460 }
0x12b6   : > { %5584 = vbcast.lane.b32.xlu0 %v5582_v54, 256  ;;  %v5631_v54 = vcombine.high %v5623_v25, %v5623_v25 }
0x12b8   : > { %v9230_v42 = vrot.slane %v5631_v54, %v9166_v44 }
0x12ba   : > { %4839 = vbcast.lane.b32.xlu0 %v4837_v36, 256 }
0x12be   : > { %5591 = vbcast.lane.b32.xlu0 %v5589_v37, 256  ;;  %v5607_v37 = vmul.f32 8.0, %v5557_v52 }
0x12c2   : > { %4846 = vbcast.lane.b32.xlu0 %v4844_v39, 256 }
0x12c6   : > { %5598 = vbcast.lane.b32.xlu0 %v5596_v38, 256 }
0x12ca   : > { %4853 = vbcast.lane.b32.xlu0 %v4851_v40, 256  ;;  %v5296_v40 = vrot.slane %v5267_v21, %v8480_v20 }
0x12ce   : > { %5605 = vbcast.lane.b32.xlu0 %v5603_v59, 256  ;;  %v4537_v59 = vcombine.high %v4515_v4, %v4515_v4 }
0x12d0   : > { %v4552_v52 = vrot.slane %v4537_v59, %v8480_v20 }
0x12d2   : > { %v9245_v2 = vmul.f32 %v4552_v52, %v4485_v43 }
0x12ed   : > { %4593 = vmax.xlane.f32.xlu0 %v4592_v51  ;;  %v9236_v51 = vmul.f32 %v5668_v61, %v5607_v37 }
0x1301   : > { %v4225_v55 = vpop.xlane.xlu0 %4224 }
0x1302   : > { %7993 = vrcp.f32 %v4225_v55  ;;  %v5289_v55 = vcombine.high %v5267_v21, %v5267_v21 }
0x1305   : > { %v4433_v62 = vpop.permute.xlu0 %4432 }
0x1306   : > { %v4483_v7 = vmul.f32 8.0, %v4433_v62  ;;  %v5672_v62 = vrot.slane %v9230_v42, %v8480_v20 }
0x1308   : > { %v9186_v14 = vmul.f32 %v4544_v9, %v4483_v7  ;;  %v5237_v7 = vmul.f32 8.0, %v5199_v58  ;;  %v4539_v58 = vcombine.high %v9171_v50, %v9171_v50 }
0x1309   : > { %v4805_v19 = vpop.permute.xlu0 %4804 }
0x130a   : > { %v4855_v23 = vmul.f32 8.0, %v4805_v19  ;;  %v4589_v11 = vsel %vm553_vm1, %v9186_v14, -inf  ;;  %v5713_v19 = vsel %vm553_vm1, %v9236_v51, -inf  ;;  %v4556_v54 = vrot.slane %v4539_v58, %v8480_v20 }
0x130b   : > { %4590 = vmax.xlane.f32.xlu1 %v4589_v11  ;;  %v5213_v11 = vpop.permute.xlu1 %5212 }
0x130c   : > { %v7994_v24 = vpop.eup %7993  ;;  %v9201_v26 = vmul.f32 %v4916_v5, %v4855_v23  ;;  %v4492_v23 = vcombine.high %v8718_v41, %v8718_v41  ;;  %v5304_v5 = vrot.slane %v5289_v55, %v8480_v20  ;;  %v4486_v41 = vmul.f32 8.0, %v9190_v18 }
0x130d   : > { %v4812_v60 = vpop.permute.xlu0 %4811  ;;  %v4227_v46 = vmul.f32 %v7994_v24, %v9136_v15  ;;  %v9219_v15 = vrot.slane %v5259_v28, %v9166_v44  ;;  %v5661_v24 = vcombine.high %v9211_v34, %v9211_v34  ;;  %v4595_v28 = vsel %vm553_vm1, %v9245_v2, -inf }
0x130e   : > { %v4856_v29 = vmul.f32 8.0, %v4812_v60  ;;  %v4961_v32 = vsel %vm553_vm1, %v9201_v26, -inf  ;;  %v4924_v60 = vrot.slane %v4909_v53, %v8480_v20  ;;  %v5244_v34 = vcombine.high %v9083_v8, %v9083_v8 }
0x130f   : > { %4962 = vmax.xlane.f32.xlu0 %v4961_v32  ;;  %7524 = vmatmul.mubr.msk.f32.vlgmr.msra.gmra.mrb[40].mxu0 %vm553_vm1, %v4227_v46  ;;  %v5300_v27 = vrot.slane %v9219_v15, %v8480_v20  ;;  %v4506_v32 = vrot.slane %v4492_v23, %v9166_v44  ;;  %v5291_v50 = vcombine.high %v9219_v15, %v9219_v15  ;;  %v4468_v37 = vpop.permute.xlu1 %4467  ;;  %v4487_v53 = vmul.f32 8.0, %v4461_v45 }
0x1310   : > { %v9213_v35 = vmul.f32 %v4920_v33, %v4856_v29  ;;  %7532 = vmatpush3.msra.mxu0 %v8945_v13  ;;  %7533 = vmatprep.mubr.msk.f32.mxu0 %vm8155_vm0, %v8154_v0  ;;  %v9266_v29 = vmul.f32 %v5304_v5, %v5237_v7  ;;  %v4864_v33 = vcombine.high %v8737_v48, %v8737_v48  ;;  %v8125_v0 = vld [vmem:[%s8326_s30] sm:$0xff]  ;;  %s8165_s30 = smov 127  }
0x1311   : > { %v5185_v36 = vpop.permute.xlu0 %5184  ;;  %7829 = vmatprep.subr.bf16.mxu0 %v8157_v10  ;;  %v9285_v8 = vmul.f32 %v4556_v54, %v4486_v41  ;;  %v9289_v61 = vrot.slane %v4506_v32, %v9166_v44  ;;  %v5663_v55 = vcombine.high %v9230_v42, %v9230_v42 }
0x1312   : > { %v5235_v39 = vmul.f32 8.0, %v5185_v36  ;;  %v4964_v38 = vsel %vm553_vm1, %v9213_v35, -inf  ;;  %v5238_v36 = vmul.f32 8.0, %v5206_v1  ;;  %v5347_v48 = vsel %vm553_vm1, %v9266_v29, -inf }
0x1313   : > { %4965 = vmax.xlane.f32.xlu0 %v4964_v38  ;;  %v5676_v38 = vrot.slane %v5661_v24, %v8480_v20  ;;  %v5308_v1 = vrot.slane %v5291_v50, %v8480_v20  ;;  %v4878_v43 = vrot.slane %v4864_v33, %v9166_v44  ;;  %v4598_v7 = vsel %vm553_vm1, %v9285_v8, -inf }
0x1314   : > { %v9225_v13 = vmul.f32 %v5296_v40, %v5235_v39  ;;  %v4911_v40 = vcombine.high %v9193_v22, %v9193_v22  ;;  %v5258_v22 = vrot.slane %v5244_v34, %v9166_v44  ;;  %v4560_v42 = vrot.slane %v9289_v61, %v8480_v20 }
0x1315   : > { %v5192_v47 = vpop.permute.xlu0 %5191  ;;  %v9298_v52 = vmul.f32 %v5308_v1, %v5238_v36  ;;  %v9314_v45 = vrot.slane %v4878_v43, %v9166_v44  ;;  %v5680_v24 = vrot.slane %v5663_v55, %v8480_v20  ;;  %v4880_v33 = vcombine.high %v4878_v43, %v4878_v43 }
0x1316   : > { %v5236_v49 = vmul.f32 8.0, %v5192_v47  ;;  %v5341_v31 = vsel %vm553_vm1, %v9225_v13, -inf  ;;  %v9322_v41 = vmul.f32 %v4560_v42, %v4487_v53  ;;  %v4488_v34 = vmul.f32 8.0, %v4468_v37 }
0x1317   : > { %5342 = vmax.xlane.f32.xlu1 %v5341_v31  ;;  %v5350_v58 = vsel %vm553_vm1, %v9298_v52, -inf }
0x1318   : > { %v9239_v4 = vmul.f32 %v5300_v27, %v5236_v49  ;;  %v5616_v49 = vcombine.high %v9102_v56, %v9102_v56  ;;  %v4928_v27 = vrot.slane %v4911_v40, %v8480_v20  ;;  %v9307_v56 = vrot.slane %v5258_v22, %v9166_v44 }
0x1319   : > { %v5564_v57 = vpop.permute.xlu0 %5563 }
0x131a   : > { %v5608_v9 = vmul.f32 8.0, %v5564_v57  ;;  %v5344_v63 = vsel %vm553_vm1, %v9239_v4, -inf  ;;  %v5630_v23 = vrot.slane %v5616_v49, %v9166_v44  ;;  %v5312_v50 = vrot.slane %v9307_v56, %v8480_v20 }
0x131b   : > { %5345 = vmax.xlane.f32.xlu0 %v5344_v63  ;;  %5714 = vmax.xlane.f32.xlu1 %v5713_v19  ;;  %v5220_v63 = vpop.permute.xlu1 %5219 }
0x131c   : > { %v9253_v6 = vmul.f32 %v5672_v62, %v5608_v9  ;;  %v4508_v9 = vcombine.high %v4506_v32, %v4506_v32  ;;  %v5632_v43 = vcombine.high %v5630_v23, %v5630_v23  ;;  %v5240_v55 = vmul.f32 8.0, %v5220_v63 }
0x131d   : > { %v4819_v25 = vpop.permute.xlu0 %4818 }
0x131e   : > { %v4857_v46 = vmul.f32 8.0, %v4819_v25  ;;  %v5716_v21 = vsel %vm553_vm1, %v9253_v6, -inf  ;;  %v5239_v25 = vmul.f32 8.0, %v5213_v11  ;;  %v9332_v11 = vrot.slane %v5630_v23, %v9166_v44 }
0x131f   : > { %5717 = vmax.xlane.f32.xlu0 %v5716_v21  ;;  %4596 = vmax.xlane.f32.xlu1 %v4595_v28  ;;  %v5260_v21 = vcombine.high %v5258_v22, %v5258_v22  ;;  %v4475_v54 = vpop.permute.xlu1 %4474  ;;  %v4538_v23 = vcombine.high %v9289_v61, %v9289_v61  ;;  %v5290_v61 = vcombine.high %v9307_v56, %v9307_v56 }
0x1320   : > { %v9275_v18 = vmul.f32 %v4924_v60, %v4857_v46  ;;  %v9325_v46 = vrot.slane %v4508_v9, %v9166_v44  ;;  %v5684_v49 = vrot.slane %v9332_v11, %v8480_v20 }
0x1321   : > { %v5571_v39 = vpop.permute.xlu0 %5570  ;;  %v9347_v1 = vrot.slane %v5260_v21, %v9166_v44 }
0x1322   : > { %v5609_v59 = vmul.f32 8.0, %v5571_v39  ;;  %v4967_v15 = vsel %vm553_vm1, %v9275_v18, -inf  ;;  %v4932_v39 = vrot.slane %v9314_v45, %v8480_v20 }
0x1323   : > { %4968 = vmax.xlane.f32.xlu0 %v4967_v15  ;;  %5348 = vmax.xlane.f32.xlu1 %v5347_v48  ;;  %v9340_v15 = vmul.f32 %v5312_v50, %v5239_v25  ;;  %v4564_v48 = vrot.slane %v9325_v46, %v8480_v20  ;;  %v5316_v42 = vrot.slane %v9347_v1, %v8480_v20  ;;  %v4489_v25 = vmul.f32 8.0, %v4475_v54 }
0x1324   : > { %v9293_v47 = vmul.f32 %v5676_v38, %v5609_v59  ;;  %v4601_v59 = vsel %vm553_vm1, %v9322_v41, -inf }
0x1325   : > { %v4826_v31 = vpop.permute.xlu0 %4825  ;;  %v9375_v21 = vmul.f32 %v5316_v42, %v5240_v55 }
0x1326   : > { %v4858_v57 = vmul.f32 8.0, %v4826_v31  ;;  %v5719_v62 = vsel %vm553_vm1, %v9293_v47, -inf  ;;  %v9351_v31 = vmul.f32 %v4564_v48, %v4488_v34 }
0x1327   : > { %5720 = vmax.xlane.f32.xlu0 %v5719_v62  ;;  %4599 = vmax.xlane.f32.xlu1 %v4598_v7  ;;  %v5353_v62 = vsel %vm553_vm1, %v9340_v15, -inf  ;;  %v5227_v7 = vpop.permute.xlu1 %5226  ;;  %v5356_v56 = vsel %vm553_vm1, %v9375_v21, -inf }
0x1328   : > { %v9309_v19 = vmul.f32 %v4928_v27, %v4858_v57  ;;  %v9354_v27 = vrot.slane %v4880_v33, %v9166_v44  ;;  %v4604_v63 = vsel %vm553_vm1, %v9351_v31, -inf  ;;  %v4568_v33 = vrot.slane %v4538_v23, %v8480_v20 }
0x1329   : > { %v5578_v5 = vpop.permute.xlu0 %5577  ;;  %v5241_v34 = vmul.f32 8.0, %v5227_v7 }
0x132a   : > { %v5610_v28 = vmul.f32 8.0, %v5578_v5  ;;  %v4970_v60 = vsel %vm553_vm1, %v9309_v19, -inf  ;;  %v9390_v48 = vmul.f32 %v4568_v33, %v4489_v25 }
0x132b   : > { %4971 = vmax.xlane.f32.xlu0 %v4970_v60  ;;  %5351 = vmax.xlane.f32.xlu1 %v5350_v58  ;;  %v4936_v58 = vrot.slane %v9354_v27, %v8480_v20 }
0x132c   : > { %v9327_v32 = vmul.f32 %v5680_v24, %v5610_v28  ;;  %v9371_v24 = vrot.slane %v5632_v43, %v9166_v44  ;;  %v5320_v43 = vrot.slane %v5290_v61, %v8480_v20  ;;  %v4607_v23 = vsel %vm553_vm1, %v9390_v48, -inf }
0x132d   : > { %v4833_v36 = vpop.permute.xlu0 %4832 }
0x132e   : > { %v4859_v38 = vmul.f32 8.0, %v4833_v36  ;;  %v5722_v40 = vsel %vm553_vm1, %v9327_v32, -inf  ;;  %v4482_v36 = vpop.permute.xlu1 %4481  ;;  %v5688_v54 = vrot.slane %v9371_v24, %v8480_v20 }
0x132f   : > { %5723 = vmax.xlane.f32.xlu0 %v5722_v40  ;;  %4602 = vmax.xlane.f32.xlu1 %v4601_v59 }
0x1330   : > { %v9344_v37 = vmul.f32 %v4932_v39, %v4859_v38  ;;  %v4910_v38 = vcombine.high %v9314_v45, %v9314_v45 }
0x1331   : > { %v5585_v22 = vpop.permute.xlu0 %5584 }
0x1332   : > { %v5611_v53 = vmul.f32 8.0, %v5585_v22  ;;  %v4973_v57 = vsel %vm553_vm1, %v9344_v37, -inf  ;;  %v4940_v45 = vrot.slane %v4910_v38, %v8480_v20 }
0x1333   : > { %4974 = vmax.xlane.f32.xlu0 %v4973_v57  ;;  %5354 = vmax.xlane.f32.xlu1 %v5353_v62  ;;  %v5662_v57 = vcombine.high %v9332_v11, %v9332_v11  ;;  %v4490_v62 = vmul.f32 8.0, %v4482_v36 }
0x1334   : > { %v9360_v9 = vmul.f32 %v5684_v49, %v5611_v53  ;;  %v4540_v49 = vcombine.high %v9325_v46, %v9325_v46  ;;  %v9398_v53 = vmul.f32 %v5320_v43, %v5241_v34 }
0x1335   : > { %v4840_v5 = vpop.permute.xlu0 %4839 }
0x1336   : > { %v4860_v28 = vmul.f32 8.0, %v4840_v5  ;;  %v5725_v60 = vsel %vm553_vm1, %v9360_v9, -inf  ;;  %v5234_v5 = vpop.permute.xlu1 %5233  ;;  %v5359_v11 = vsel %vm553_vm1, %v9398_v53, -inf }
0x1337   : > { %5726 = vmax.xlane.f32.xlu0 %v5725_v60  ;;  %4605 = vmax.xlane.f32.xlu1 %v4604_v63  ;;  %v4572_v63 = vrot.slane %v4540_v49, %v8480_v20  ;;  %v4912_v60 = vcombine.high %v9354_v27, %v9354_v27  ;;  %v5242_v61 = vmul.f32 8.0, %v5234_v5 }
0x1338   : > { %v9379_v50 = vmul.f32 %v4936_v58, %v4860_v28  ;;  %v5292_v58 = vcombine.high %v9347_v1, %v9347_v1  ;;  %v5692_v28 = vrot.slane %v5662_v57, %v8480_v20 }
0x1339   : > { %v5592_v39 = vpop.permute.xlu0 %5591  ;;  %v9418_v36 = vmul.f32 %v4572_v63, %v4490_v62  ;;  %v4944_v38 = vrot.slane %v4912_v60, %v8480_v20 }
0x133a   : > { %v5612_v40 = vmul.f32 8.0, %v5592_v39  ;;  %v4976_v59 = vsel %vm553_vm1, %v9379_v50, -inf  ;;  %v5324_v1 = vrot.slane %v5292_v58, %v8480_v20 }
0x133b   : > { %4977 = vmax.xlane.f32.xlu0 %v4976_v59  ;;  %5357 = vmax.xlane.f32.xlu1 %v5356_v56  ;;  %v4610_v56 = vsel %vm553_vm1, %v9418_v36, -inf }
0x133c   : > { %v9393_v22 = vmul.f32 %v5688_v54, %v5612_v40  ;;  %v5664_v40 = vcombine.high %v9371_v24, %v9371_v24  ;;  %v9430_v43 = vmul.f32 %v5324_v1, %v5242_v61 }
0x133d   : > { %v4847_v55 = vpop.permute.xlu0 %4846 }
0x133e   : > { %v4861_v7 = vmul.f32 8.0, %v4847_v55  ;;  %v5728_v42 = vsel %vm553_vm1, %v9393_v22, -inf  ;;  %v5362_v24 = vsel %vm553_vm1, %v9430_v43, -inf  ;;  %v5696_v62 = vrot.slane %v5664_v40, %v8480_v20 }
0x133f   : > { %5729 = vmax.xlane.f32.xlu0 %v5728_v42  ;;  %4608 = vmax.xlane.f32.xlu1 %v4607_v23 }
0x1340   : > { %v9406_v46 = vmul.f32 %v4940_v45, %v4861_v7 }
0x1341   : > { %v5599_v25 = vpop.permute.xlu0 %5598 }
0x1342   : > { %v5613_v33 = vmul.f32 8.0, %v5599_v25  ;;  %v4979_v34 = vsel %vm553_vm1, %v9406_v46, -inf  ;;  %v4669_v25 = vrot.slane %v8838_v30, %v9166_v44 }
0x1343   : > { %4980 = vmax.xlane.f32.xlu0 %v4979_v34  ;;  %5360 = vmax.xlane.f32.xlu1 %v5359_v11 }
0x1344   : > { %v9420_v39 = vmul.f32 %v5692_v28, %v5613_v33  ;;  %v4677_v28 = vcombine.high %v4669_v25, %v4669_v25 }
0x1345   : > { %v4854_v54 = vpop.permute.xlu0 %4853 }
0x1346   : > { %v4862_v27 = vmul.f32 8.0, %v4854_v54  ;;  %v5731_v59 = vsel %vm553_vm1, %v9420_v39, -inf  ;;  %v9449_v60 = vrot.slane %v4677_v28, %v9166_v44 }
0x1347   : > { %5732 = vmax.xlane.f32.xlu0 %v5731_v59  ;;  %4611 = vmax.xlane.f32.xlu1 %v4610_v56 }
0x1348   : > { %v9432_v49 = vmul.f32 %v4944_v38, %v4862_v27  ;;  %v4718_v61 = vrot.slane %v9449_v60, %v8480_v20 }
0x1349   : > { %v5606_v55 = vpop.permute.xlu0 %5605 }
0x134a   : > { %v5614_v45 = vmul.f32 8.0, %v5606_v55  ;;  %v4982_v57 = vsel %vm553_vm1, %v9432_v49, -inf }
0x134b   : > { %4983 = vmax.xlane.f32.xlu0 %v4982_v57  ;;  %5363 = vmax.xlane.f32.xlu1 %v5362_v24  ;;  %v5041_v57 = vrot.slane %v8857_v12, %v9166_v44 }
0x134c   : > { %v9439_v7 = vmul.f32 %v5696_v62, %v5614_v45  ;;  %v9460_v45 = vrot.slane %v4669_v25, %v9166_v44 }
0x134e   : > { %v5734_v42 = vsel %vm553_vm1, %v9439_v7, -inf }
0x134f   : > { %5735 = vmax.xlane.f32.xlu0 %v5734_v42  ;;  %v5049_v42 = vcombine.high %v5041_v57, %v5041_v57 }
0x135f   : > { %v9443_v23 = vpop.f32.mrb[42].mxu1 }
0x1360   : > { %v7530_v5 = vpop.f32.mrb[43].mxu1 }
0x1361   : > { %v9466_v5 = vrot.slane %v5041_v57, %v9166_v44 }
0x137a   : > { %v4594_v63 = vpop.xlane.xlu0 %4593 }
0x137b   : > { %v4614_v58 = vsub.f32 %v9175_v3, %v4594_v63 }
0x137d   : > { %v4623_v11 = vmul.f32 1.442695, %v4614_v58 }
0x137f   : > { %7995 = vpow2.f32 %v4623_v11 }
0x1389   : > { %v7996_v33 = vpop.eup %7995 }
0x138a   : > { %v4640_v34 = vsel %vm553_vm1, %v7996_v33, 0.0  ;;  %v9454_v1 = vmul.f32 %v7996_v33, %v4718_v61  ;;  %v9476_v33 = vrot.slane %v5049_v42, %v9166_v44 }
0x138b   : > { %4641 = vadd.xlane.f32.xlu0 %v4640_v34  ;;  %v5086_v34 = vrot.slane %v9466_v5, %v8480_v20 }
0x138c   : > { %v5090_v57 = vrot.slane %v9476_v33, %v8480_v20 }
0x1398   : > { %v4591_v54 = vpop.xlane.xlu1 %4590 }
0x1399   : > { %v4613_v3 = vsub.f32 %v9186_v14, %v4591_v54 }
0x139b   : > { %v4621_v38 = vmul.f32 1.442695, %v4613_v3 }
0x139c   : > { %v4963_v40 = vpop.xlane.xlu0 %4962 }
0x139d   : > { %7997 = vpow2.f32 %v4621_v38  ;;  %v4985_v27 = vsub.f32 %v9201_v26, %v4963_v40  ;;  %v4714_v26 = vrot.slane %v9460_v45, %v8480_v20 }
0x139f   : > { %v4993_v59 = vmul.f32 1.442695, %v4985_v27 }
0x13a0   : > { %v4966_v56 = vpop.xlane.xlu0 %4965 }
0x13a1   : > { %7999 = vpow2.f32 %v4993_v59  ;;  %v4986_v55 = vsub.f32 %v9213_v35, %v4966_v56 }
0x13a3   : > { %v4995_v24 = vmul.f32 1.442695, %v4986_v55  ;;  %v5793_v55 = vrot.slane %v9443_v23, %v9166_v44 }
0x13a4   : > { %v5343_v62 = vpop.xlane.xlu1 %5342 }
0x13a5   : > { %8001 = vpow2.f32 %v4995_v24  ;;  %v5365_v14 = vsub.f32 %v9225_v13, %v5343_v62 }
0x13a7   : > { %v7998_v63 = vpop.eup %7997  ;;  %v5373_v35 = vmul.f32 1.442695, %v5365_v14 }
0x13a8   : > { %v5346_v58 = vpop.xlane.xlu0 %5345  ;;  %v5715_v25 = vpop.xlane.xlu1 %5714  ;;  %v4637_v11 = vsel %vm553_vm1, %v7998_v63, 0.0  ;;  %v9471_v28 = vmul.f32 %v7998_v63, %v4714_v26  ;;  %v5801_v63 = vcombine.high %v5793_v55, %v5793_v55 }
0x13a9   : > { %8003 = vpow2.f32 %v5373_v35  ;;  %v5366_v61 = vsub.f32 %v9239_v4, %v5346_v58  ;;  %v5737_v13 = vsub.f32 %v9236_v51, %v5715_v25  ;;  %4638 = vadd.xlane.f32.xlu1 %v4637_v11  ;;  %v5809_v25 = vrot.slane %v5793_v55, %v9166_v44 }
0x13aa   : > { %v4707_v55 = vcombine.high %v9460_v45, %v9460_v45 }
0x13ab   : > { %v8000_v54 = vpop.eup %7999  ;;  %v5375_v3 = vmul.f32 1.442695, %v5366_v61  ;;  %v5745_v38 = vmul.f32 1.442695, %v5737_v13 }
0x13ac   : > { %v5718_v40 = vpop.xlane.xlu0 %5717  ;;  %v4597_v27 = vpop.xlane.xlu1 %4596  ;;  %v5009_v59 = vsel %vm553_vm1, %v8000_v54, 0.0  ;;  %v9481_v56 = vmul.f32 %v8000_v54, %v5086_v34  ;;  %v9498_v34 = vrot.slane %v5801_v63, %v9166_v44 }
0x13ad   : > { %8005 = vpow2.f32 %v5375_v3  ;;  %v5738_v4 = vsub.f32 %v9253_v6, %v5718_v40  ;;  %v4615_v51 = vsub.f32 %v9245_v2, %v4597_v27  ;;  %5010 = vadd.xlane.f32.xlu1 %v5009_v59  ;;  %v5838_v40 = vrot.slane %v5809_v25, %v8480_v20 }
0x13ae   : > { %8007 = vpow2.f32 %v5745_v38 }
0x13af   : > { %v8002_v24 = vpop.eup %8001  ;;  %v5747_v62 = vmul.f32 1.442695, %v5738_v4  ;;  %v4625_v14 = vmul.f32 1.442695, %v4615_v51 }
0x13b0   : > { %v4969_v42 = vpop.xlane.xlu0 %4968  ;;  %v5349_v26 = vpop.xlane.xlu1 %5348  ;;  %v5012_v35 = vsel %vm553_vm1, %v8002_v24, 0.0  ;;  %v9490_v58 = vmul.f32 %v8002_v24, %v5090_v57 }
0x13b1   : > { %8009 = vpow2.f32 %v5747_v62  ;;  %v4987_v2 = vsub.f32 %v9275_v18, %v4969_v42  ;;  %v5367_v6 = vsub.f32 %v9266_v29, %v5349_v26  ;;  %5013 = vadd.xlane.f32.xlu0 %v5012_v35  ;;  %v5079_v26 = vcombine.high %v9466_v5, %v9466_v5 }
0x13b2   : > { %8011 = vpow2.f32 %v4625_v14 }
0x13b3   : > { %v9495_v11 = vpop.eup %8003  ;;  %v4997_v61 = vmul.f32 1.442695, %v4987_v2  ;;  %v5377_v13 = vmul.f32 1.442695, %v5367_v6 }
0x13b4   : > { %v5721_v54 = vpop.xlane.xlu0 %5720  ;;  %v4600_v3 = vpop.xlane.xlu1 %4599  ;;  %v5389_v38 = vsel %vm553_vm1, %v9495_v11, 0.0 }
0x13b5   : > { %8013 = vpow2.f32 %v4997_v61  ;;  %v5739_v18 = vsub.f32 %v9293_v47, %v5721_v54  ;;  %v4616_v29 = vsub.f32 %v9285_v8, %v4600_v3  ;;  %5390 = vadd.xlane.f32.xlu1 %v5389_v38  ;;  %v5842_v8 = vrot.slane %v9498_v34, %v8480_v20 }
0x13b6   : > { %8015 = vpow2.f32 %v5377_v13  ;;  %v5831_v61 = vcombine.high %v5809_v25, %v5809_v25  ;;  %v5094_v25 = vrot.slane %v5079_v26, %v8480_v20 }
0x13b7   : > { %v9505_v27 = vpop.eup %8005  ;;  %v5749_v59 = vmul.f32 1.442695, %v5739_v18  ;;  %v4627_v4 = vmul.f32 1.442695, %v4616_v29 }
0x13b8   : > { %v8008_v51 = vpop.eup %8007  ;;  %v4972_v57 = vpop.xlane.xlu0 %4971  ;;  %v5392_v62 = vsel %vm553_vm1, %v9505_v27, 0.0 }
0x13b9   : > { %v5352_v24 = vpop.xlane.xlu1 %5351  ;;  %8017 = vpow2.f32 %v5749_v59  ;;  %v4988_v47 = vsub.f32 %v9309_v19, %v4972_v57  ;;  %5393 = vadd.xlane.f32.xlu0 %v5392_v62  ;;  %v5761_v42 = vsel %vm553_vm1, %v8008_v51, 0.0  ;;  %v9518_v45 = vmul.f32 %v8008_v51, %v5838_v40 }
0x13ba   : > { %v5368_v14 = vsub.f32 %v9298_v52, %v5352_v24  ;;  %8019 = vpow2.f32 %v4627_v4  ;;  %5762 = vadd.xlane.f32.xlu1 %v5761_v42  ;;  %v4722_v52 = vrot.slane %v4707_v55, %v8480_v20 }
0x13bb   : > { %v8010_v63 = vpop.eup %8009  ;;  %v4999_v35 = vmul.f32 1.442695, %v4988_v47 }
0x13bc   : > { %v5379_v2 = vmul.f32 1.442695, %v5368_v14  ;;  %v8012_v6 = vpop.eup %8011  ;;  %v5724_v13 = vpop.xlane.xlu0 %5723  ;;  %v5764_v19 = vsel %vm553_vm1, %v8010_v63, 0.0  ;;  %v9522_v3 = vmul.f32 %v8010_v63, %v5842_v8 }
0x13bd   : > { %v4603_v54 = vpop.xlane.xlu1 %4602  ;;  %8021 = vpow2.f32 %v4999_v35  ;;  %v5740_v5 = vsub.f32 %v9327_v32, %v5724_v13  ;;  %5765 = vadd.xlane.f32.xlu0 %v5764_v19  ;;  %v4643_v18 = vsel %vm553_vm1, %v8012_v6, 0.0  ;;  %v9527_v29 = vmul.f32 %v8012_v6, %v4722_v52 }
0x13be   : > { %v4617_v38 = vsub.f32 %v9322_v41, %v4603_v54  ;;  %8023 = vpow2.f32 %v5379_v2  ;;  %4644 = vadd.xlane.f32.xlu1 %v4643_v18  ;;  %v5846_v41 = vrot.slane %v5831_v61, %v8480_v20  ;;  %v5786_v35 = vcombine.high %v9443_v23, %v9443_v23 }
0x13bf   : > { %v8014_v40 = vpop.eup %8013  ;;  %v5751_v59 = vmul.f32 1.442695, %v5740_v5 }
0x13c0   : > { %v4629_v4 = vmul.f32 1.442695, %v4617_v38  ;;  %v9530_v51 = vpop.eup %8015  ;;  %v4975_v55 = vpop.xlane.xlu0 %4974  ;;  %v5015_v32 = vsel %vm553_vm1, %v8014_v40, 0.0  ;;  %v9533_v24 = vmul.f32 %v8014_v40, %v5094_v25  ;;  %v5800_v18 = vrot.slane %v5786_v35, %v9166_v44 }
0x13c1   : > { %v5355_v57 = vpop.xlane.xlu1 %5354  ;;  %8025 = vpow2.f32 %v5751_v59  ;;  %v4989_v62 = vsub.f32 %v9344_v37, %v4975_v55  ;;  %5016 = vadd.xlane.f32.xlu0 %v5015_v32  ;;  %v5395_v47 = vsel %vm553_vm1, %v9530_v51, 0.0 }
0x13c2   : > { %v5369_v8 = vsub.f32 %v9340_v15, %v5355_v57  ;;  %8027 = vpow2.f32 %v4629_v4  ;;  %5396 = vadd.xlane.f32.xlu1 %v5395_v47  ;;  %v5833_v15 = vcombine.high %v9498_v34, %v9498_v34 }
0x13c3   : > { %v8018_v14 = vpop.eup %8017  ;;  %v5001_v42 = vmul.f32 1.442695, %v4989_v62  ;;  %v9568_v62 = vrot.slane %v5800_v18, %v9166_v44 }
0x13c4   : > { %v5381_v26 = vmul.f32 1.442695, %v5369_v8  ;;  %v9540_v63 = vpop.eup %8019  ;;  %v5727_v2 = vpop.xlane.xlu0 %5726  ;;  %v5767_v37 = vsel %vm553_vm1, %v8018_v14, 0.0  ;;  %v9545_v61 = vmul.f32 %v8018_v14, %v5846_v41 }
0x13c5   : > { %v4606_v6 = vpop.xlane.xlu1 %4605  ;;  %8029 = vpow2.f32 %v5001_v42  ;;  %v5741_v13 = vsub.f32 %v9360_v9, %v5727_v2  ;;  %5768 = vadd.xlane.f32.xlu0 %v5767_v37  ;;  %v4646_v19 = vsel %vm553_vm1, %v9540_v63, 0.0 }
0x13c6   : > { %v4618_v54 = vsub.f32 %v9351_v31, %v4606_v6  ;;  %8031 = vpow2.f32 %v5381_v26  ;;  %4647 = vadd.xlane.f32.xlu1 %v4646_v19  ;;  %v5850_v31 = vrot.slane %v5833_v15, %v8480_v20  ;;  %v5802_v15 = vcombine.high %v5800_v18, %v5800_v18 }
0x13c7   : > { %v9553_v23 = vpop.eup %8021  ;;  %v5753_v52 = vmul.f32 1.442695, %v5741_v13  ;;  %v5034_v18 = vcombine.high %v8857_v12, %v8857_v12 }
0x13c8   : > { %v4631_v5 = vmul.f32 1.442695, %v4618_v54  ;;  %v9555_v38 = vpop.eup %8023  ;;  %v4978_v34 = vpop.xlane.xlu0 %4977  ;;  %v5018_v9 = vsel %vm553_vm1, %v9553_v23, 0.0 }
0x13c9   : > { %v5358_v25 = vpop.xlane.xlu1 %5357  ;;  %8033 = vpow2.f32 %v5753_v52  ;;  %v4990_v40 = vsub.f32 %v9379_v50, %v4978_v34  ;;  %5019 = vadd.xlane.f32.xlu0 %v5018_v9  ;;  %v5398_v4 = vsel %vm553_vm1, %v9555_v38, 0.0 }
0x13ca   : > { %v5370_v59 = vsub.f32 %v9375_v21, %v5358_v25  ;;  %8035 = vpow2.f32 %v4631_v5  ;;  %5399 = vadd.xlane.f32.xlu1 %v5398_v4 }
0x13cb   : > { %v8026_v55 = vpop.eup %8025  ;;  %v5003_v57 = vmul.f32 1.442695, %v4990_v40 }
0x13cc   : > { %v5383_v32 = vmul.f32 1.442695, %v5370_v59  ;;  %v9565_v41 = vpop.eup %8027  ;;  %v5730_v8 = vpop.xlane.xlu0 %5729  ;;  %v5770_v50 = vsel %vm553_vm1, %v8026_v55, 0.0  ;;  %v9571_v14 = vmul.f32 %v8026_v55, %v5850_v31 }
0x13cd   : > { %v4609_v47 = vpop.xlane.xlu1 %4608  ;;  %8037 = vpow2.f32 %v5003_v57  ;;  %v5742_v21 = vsub.f32 %v9393_v22, %v5730_v8  ;;  %5771 = vadd.xlane.f32.xlu0 %v5770_v50  ;;  %v4649_v26 = vsel %vm553_vm1, %v9565_v41, 0.0 }
0x13ce   : > { %v4619_v42 = vsub.f32 %v9390_v48, %v4609_v47  ;;  %8039 = vpow2.f32 %v5383_v32  ;;  %4650 = vadd.xlane.f32.xlu1 %v4649_v26  ;;  %v5854_v48 = vrot.slane %v9568_v62, %v8480_v20  ;;  %v9604_v32 = vrot.slane %v5034_v18, %v9166_v44 }
0x13cf   : > { %v9577_v35 = vpop.eup %8029  ;;  %v5755_v2 = vmul.f32 1.442695, %v5742_v21 }
0x13d0   : > { %v4633_v6 = vmul.f32 1.442695, %v4619_v42  ;;  %v9579_v37 = vpop.eup %8031  ;;  %v4981_v13 = vpop.xlane.xlu0 %4980  ;;  %v5021_v22 = vsel %vm553_vm1, %v9577_v35, 0.0 }
0x13d1   : > { %v5361_v54 = vpop.xlane.xlu1 %5360  ;;  %8041 = vpow2.f32 %v5755_v2  ;;  %v4991_v19 = vsub.f32 %v9406_v46, %v4981_v13  ;;  %5022 = vadd.xlane.f32.xlu0 %v5021_v22  ;;  %v5401_v5 = vsel %vm553_vm1, %v9579_v37, 0.0  ;;  %v5050_v13 = vcombine.high %v9604_v32, %v9604_v32 }
0x13d2   : > { %v5371_v52 = vsub.f32 %v9398_v53, %v5361_v54  ;;  %8043 = vpow2.f32 %v4633_v6  ;;  %5402 = vadd.xlane.f32.xlu1 %v5401_v5  ;;  %v9597_v53 = vrot.slane %v5802_v15, %v9166_v44 }
0x13d3   : > { %v8034_v34 = vpop.eup %8033  ;;  %v5005_v25 = vmul.f32 1.442695, %v4991_v19 }
0x13d4   : > { %v5385_v9 = vmul.f32 1.442695, %v5371_v52  ;;  %v9591_v31 = vpop.eup %8035  ;;  %v5733_v40 = vpop.xlane.xlu0 %5732  ;;  %v5773_v46 = vsel %vm553_vm1, %v8034_v34, 0.0  ;;  %v9594_v4 = vmul.f32 %v8034_v34, %v5854_v48 }
0x13d5   : > { %v4612_v59 = vpop.xlane.xlu1 %4611  ;;  %8045 = vpow2.f32 %v5005_v25  ;;  %v5743_v55 = vsub.f32 %v9420_v39, %v5733_v40  ;;  %5774 = vadd.xlane.f32.xlu0 %v5773_v46  ;;  %v4652_v57 = vsel %vm553_vm1, %v9591_v31, 0.0  ;;  %v5858_v39 = vrot.slane %v9597_v53, %v8480_v20 }
0x13d6   : > { %v4620_v12 = vsub.f32 %v9418_v36, %v4612_v59  ;;  %8047 = vpow2.f32 %v5385_v9  ;;  %4653 = vadd.xlane.f32.xlu1 %v4652_v57  ;;  %v9631_v25 = vrot.slane %v5050_v13, %v9166_v44 }
0x13d7   : > { %v9606_v8 = vpop.eup %8037  ;;  %v5757_v47 = vmul.f32 1.442695, %v5743_v55 }
0x13d8   : > { %v4635_v50 = vmul.f32 1.442695, %v4620_v12  ;;  %v9608_v21 = vpop.eup %8039  ;;  %v4984_v42 = vpop.xlane.xlu0 %4983  ;;  %v5024_v36 = vsel %vm553_vm1, %v9606_v8, 0.0  ;;  %v5082_v12 = vcombine.high %v9631_v25, %v9631_v25 }
0x13d9   : > { %v5364_v26 = vpop.xlane.xlu1 %5363  ;;  %8049 = vpow2.f32 %v5757_v47  ;;  %v4992_v2 = vsub.f32 %v9432_v49, %v4984_v42  ;;  %5025 = vadd.xlane.f32.xlu0 %v5024_v36  ;;  %v5404_v15 = vsel %vm553_vm1, %v9608_v21, 0.0 }
0x13da   : > { %v5372_v6 = vsub.f32 %v9430_v43, %v5364_v26  ;;  %8051 = vpow2.f32 %v4635_v50  ;;  %5405 = vadd.xlane.f32.xlu1 %v5404_v15  ;;  %v5832_v43 = vcombine.high %v9568_v62, %v9568_v62 }
0x13db   : > { %v8042_v54 = vpop.eup %8041  ;;  %v5007_v22 = vmul.f32 1.442695, %v4992_v2 }
0x13dc   : > { %v5387_v48 = vmul.f32 1.442695, %v5372_v6  ;;  %v9620_v19 = vpop.eup %8043  ;;  %v5736_v52 = vpop.xlane.xlu0 %5735  ;;  %v5776_v5 = vsel %vm553_vm1, %v8042_v54, 0.0  ;;  %v9623_v49 = vmul.f32 %v8042_v54, %v5858_v39  ;;  %v5862_v62 = vrot.slane %v5832_v43, %v8480_v20 }
0x13dd   : > { %8053 = vpow2.f32 %v5007_v22  ;;  %v5744_v18 = vsub.f32 %v9439_v7, %v5736_v52  ;;  %5777 = vadd.xlane.f32.xlu0 %v5776_v5  ;;  %v4655_v34 = vsel %vm553_vm1, %v9620_v19, 0.0  ;;  %v5114_v54 = vrot.slane %v5082_v12, %v8480_v20 }
0x13de   : > { %8055 = vpow2.f32 %v5387_v48  ;;  %4656 = vadd.xlane.f32.xlu1 %v4655_v34 }
0x13df   : > { %v9633_v9 = vpop.eup %8045  ;;  %v5759_v40 = vmul.f32 1.442695, %v5744_v18 }
0x13e0   : > { %v8048_v59 = vpop.eup %8047  ;;  %v5027_v46 = vsel %vm553_vm1, %v9633_v9, 0.0 }
0x13e1   : > { %8057 = vpow2.f32 %v5759_v40  ;;  %5028 = vadd.xlane.f32.xlu0 %v5027_v46  ;;  %v5407_v7 = vsel %vm553_vm1, %v8048_v59, 0.0 }
0x13e2   : > { %5408 = vadd.xlane.f32.xlu1 %v5407_v7  ;;  %v4318_v55 = vpop.f32.mrb[40].mxu0 }
0x13e3   : > { %v8050_v57 = vpop.eup %8049  ;;  %v5414_v47 = vcombine.high %v4318_v55, %v4318_v55  ;;  %v5421_v50 = vrot.slane %v4318_v55, %v9166_v44  ;;  %v7525_v42 = vpop.f32.mrb[41].mxu0 }
0x13e4   : > { %v9642_v26 = vpop.eup %8051  ;;  %v5779_v36 = vsel %vm553_vm1, %v8050_v57, 0.0  ;;  %v9645_v39 = vmul.f32 %v8050_v57, %v5862_v62  ;;  %v5834_v62 = vcombine.high %v9597_v53, %v9597_v53  ;;  %v4662_v53 = vcombine.high %v8838_v30, %v8838_v30 }
0x13e5   : > { %v5428_v2 = vrot.slane %v5414_v47, %v9166_v44  ;;  %v5429_v6 = vcombine.high %v5421_v50, %v5421_v50  ;;  %v5437_v15 = vrot.slane %v5421_v50, %v9166_v44  ;;  %5780 = vadd.xlane.f32.xlu0 %v5779_v36  ;;  %v4658_v13 = vsel %vm553_vm1, %v9642_v26, 0.0 }
0x13e6   : > { %4659 = vadd.xlane.f32.xlu1 %v4658_v13  ;;  %v4759_v30 = vsel %vm553_vm1, %v9471_v28, 0.0  ;;  %v4762_v28 = vsel %vm553_vm1, %v9454_v1, 0.0  ;;  %v5134_v1 = vsel %vm553_vm1, %v9490_v58, 0.0 }
0x13e7   : > { %v8054_v22 = vpop.eup %8053  ;;  %v5430_v48 = vcombine.high %v5428_v2, %v5428_v2  ;;  %v5444_v52 = vrot.slane %v5428_v2, %v9166_v44  ;;  %v5451_v5 = vrot.slane %v5429_v6, %v9166_v44  ;;  %v5459_v43 = vcombine.high %v5437_v15, %v5437_v15 }
0x13e8   : > { %v8056_v18 = vpop.eup %8055  ;;  %v5030_v34 = vsel %vm553_vm1, %v8054_v22, 0.0  ;;  %v5466_v40 = vrot.slane %v5437_v15, %v8480_v20  ;;  %v9656_v46 = vmul.f32 %v8054_v22, %v5114_v54 }
0x13e9   : > { %5031 = vadd.xlane.f32.xlu0 %v5030_v34  ;;  %v5410_v7 = vsel %vm553_vm1, %v8056_v18, 0.0  ;;  %v5474_v55 = vrot.slane %v5459_v43, %v8480_v20  ;;  %v5482_v12 = vrot.slane %v5444_v52, %v8480_v20  ;;  %v5461_v57 = vcombine.high %v5451_v5, %v5451_v5 }
0x13ea   : > { %5411 = vadd.xlane.f32.xlu1 %v5410_v7  ;;  %v9664_v47 = vmul.f32 %v9495_v11, %v5466_v40  ;;  %v5458_v50 = vrot.slane %v5430_v48, %v9166_v44  ;;  %v5470_v42 = vrot.slane %v5451_v5, %v8480_v20  ;;  %v5460_v36 = vcombine.high %v5444_v52, %v5444_v52 }
0x13eb   : > { %v8058_v2 = vpop.eup %8057  ;;  %v9671_v6 = vmul.f32 %v9530_v51, %v5474_v55  ;;  %v9674_v15 = vmul.f32 %v9579_v37, %v5482_v12  ;;  %v5478_v13 = vrot.slane %v5461_v57, %v8480_v20  ;;  %v5866_v48 = vrot.slane %v5834_v62, %v8480_v20 }
0x13ec   : > { %v5782_v11 = vsel %vm553_vm1, %v8058_v2, 0.0  ;;  %v5486_v54 = vrot.slane %v5458_v50, %v8480_v20  ;;  %v9680_v22 = vmul.f32 %v9505_v27, %v5470_v42  ;;  %v5490_v37 = vrot.slane %v5460_v36, %v8480_v20 }
0x13ed   : > { %5783 = vadd.xlane.f32.xlu0 %v5782_v11  ;;  %v9686_v51 = vmul.f32 %v9555_v38, %v5478_v13  ;;  %v5462_v5 = vcombine.high %v5458_v50, %v5458_v50  ;;  %v9692_v43 = vmul.f32 %v8058_v2, %v5866_v48  ;;  %v4676_v27 = vrot.slane %v4662_v53, %v9166_v44 }
0x13ee   : > { %4760 = vadd.xlane.f32.xlu1 %v4759_v30  ;;  %v9690_v52 = vmul.f32 %v9608_v21, %v5486_v54  ;;  %v4709_v34 = vcombine.high %v9449_v60, %v9449_v60  ;;  %v9697_v40 = vmul.f32 %v8048_v59, %v5490_v37  ;;  %v5131_v21 = vsel %vm553_vm1, %v9481_v56, 0.0 }
0x13ef   : > { %v5494_v38 = vrot.slane %v5462_v5, %v8480_v20  ;;  %v5081_v62 = vcombine.high %v9476_v33, %v9476_v33  ;;  %v4678_v55 = vcombine.high %v4676_v27, %v4676_v27  ;;  %v4692_v60 = vrot.slane %v4676_v27, %v9166_v44 }
0x13f0   : > { %v4726_v59 = vrot.slane %v4709_v34, %v8480_v20  ;;  %v4765_v12 = vsel %vm553_vm1, %v9527_v29, 0.0  ;;  %v5064_v57 = vrot.slane %v9604_v32, %v9166_v44  ;;  %v5137_v42 = vsel %vm553_vm1, %v9533_v24, 0.0 }
0x13f1   : > { %4763 = vadd.xlane.f32.xlu0 %v4762_v28  ;;  %v9706_v7 = vmul.f32 %v8056_v18, %v5494_v38  ;;  %v5098_v33 = vrot.slane %v5081_v62, %v8480_v20  ;;  %v4730_v18 = vrot.slane %v4692_v60, %v8480_v20  ;;  %v4706_v50 = vrot.slane %v4678_v55, %v9166_v44 }
0x13f2   : > { %5132 = vadd.xlane.f32.xlu1 %v5131_v21  ;;  %v4754_v56 = vmul.f32 %v9540_v63, %v4726_v59  ;;  %v5102_v32 = vrot.slane %v5064_v57, %v8480_v20  ;;  %v4708_v2 = vcombine.high %v4692_v60, %v4692_v60  ;;  %v5106_v13 = vrot.slane %v9631_v25, %v8480_v20 }
0x13f3   : > { %v5126_v58 = vmul.f32 %v9553_v23, %v5098_v33  ;;  %v4755_v63 = vmul.f32 %v9565_v41, %v4730_v18  ;;  %v4734_v36 = vrot.slane %v4706_v50, %v8480_v20  ;;  %v5080_v41 = vcombine.high %v5064_v57, %v5064_v57 }
0x13f4   : > { %v4768_v29 = vsel %vm553_vm1, %v4754_v56, 0.0  ;;  %v5127_v44 = vmul.f32 %v9577_v35, %v5102_v32  ;;  %v4738_v11 = vrot.slane %v4708_v2, %v8480_v20  ;;  %v4710_v54 = vcombine.high %v4706_v50, %v4706_v50 }
0x13f5   : > { %5135 = vadd.xlane.f32.xlu0 %v5134_v1  ;;  %v5140_v53 = vsel %vm553_vm1, %v5126_v58, 0.0  ;;  %v4771_v24 = vsel %vm553_vm1, %v4755_v63, 0.0  ;;  %v4756_v23 = vmul.f32 %v9591_v31, %v4734_v36  ;;  %v5128_v30 = vmul.f32 %v9606_v8, %v5106_v13 }
0x13f6   : > { %4766 = vadd.xlane.f32.xlu1 %v4765_v12  ;;  %v5143_v48 = vsel %vm553_vm1, %v5127_v44, 0.0  ;;  %v4757_v37 = vmul.f32 %v9620_v19, %v4738_v11  ;;  %v5110_v31 = vrot.slane %v5080_v41, %v8480_v20  ;;  %v4742_v5 = vrot.slane %v4710_v54, %v8480_v20 }
0x13f7   : > { %v4774_v35 = vsel %vm553_vm1, %v4756_v23, 0.0  ;;  %v5146_v25 = vsel %vm553_vm1, %v5128_v30, 0.0  ;;  %v5886_v38 = vsel %vm553_vm1, %v9522_v3, 0.0  ;;  %v5883_v20 = vsel %vm553_vm1, %v9518_v45, 0.0 }
0x13f8   : > { %v5129_v27 = vmul.f32 %v9633_v9, %v5110_v31  ;;  %v4777_v34 = vsel %vm553_vm1, %v4757_v37, 0.0  ;;  %v4758_v28 = vmul.f32 %v9642_v26, %v4742_v5  ;;  %v5889_v9 = vsel %vm553_vm1, %v9545_v61, 0.0 }
0x13f9   : > { %5138 = vadd.xlane.f32.xlu0 %v5137_v42  ;;  %v5511_v26 = vsel %vm553_vm1, %v9664_v47, 0.0  ;;  %v5895_v21 = vsel %vm553_vm1, %v9594_v4, 0.0  ;;  %v5517_v3 = vsel %vm553_vm1, %v9671_v6, 0.0  ;;  %v5892_v45 = vsel %vm553_vm1, %v9571_v14, 0.0 }
0x13fa   : > { %4769 = vadd.xlane.f32.xlu1 %v4768_v29  ;;  %v5149_v8 = vsel %vm553_vm1, %v5129_v27, 0.0  ;;  %v4780_v19 = vsel %vm553_vm1, %v4758_v28, 0.0  ;;  %v5523_v61 = vsel %vm553_vm1, %v9674_v15, 0.0  ;;  %v5898_v47 = vsel %vm553_vm1, %v9623_v49, 0.0 }
0x13fb   : > { %v5520_v4 = vsel %vm553_vm1, %v9686_v51, 0.0  ;;  %v5901_v6 = vsel %vm553_vm1, %v9645_v39, 0.0  ;;  %v5526_v14 = vsel %vm553_vm1, %v9690_v52, 0.0  ;;  %v5514_v15 = vsel %vm553_vm1, %v9680_v22, 0.0 }
0x13fc   : > { %v5529_v49 = vsel %vm553_vm1, %v9697_v40, 0.0  ;;  %v5152_v51 = vsel %vm553_vm1, %v9656_v46, 0.0  ;;  %v5532_v39 = vsel %vm553_vm1, %v9706_v7, 0.0  ;;  %v5904_v52 = vsel %vm553_vm1, %v9692_v43, 0.0 }
0x13fd   : > { %5141 = vadd.xlane.f32.xlu0 %v5140_v53  ;;  %v5942_v5 = vand.u32 127, %v931_v16 }
0x13fe   : > { %4772 = vadd.xlane.f32.xlu1 %v4771_v24 }
0x1401   : > { %5144 = vadd.xlane.f32.xlu0 %v5143_v48 }
0x1402   : > { %4775 = vadd.xlane.f32.xlu1 %v4774_v35 }
0x1405   : > { %5147 = vadd.xlane.f32.xlu0 %v5146_v25 }
0x1406   : > { %4778 = vadd.xlane.f32.xlu1 %v4777_v34 }
0x1409   : > { %5150 = vadd.xlane.f32.xlu0 %v5149_v8 }
0x140a   : > { %4781 = vadd.xlane.f32.xlu1 %v4780_v19 }
0x140d   : > { %5887 = vadd.xlane.f32.xlu0 %v5886_v38 }
0x140e   : > { %5884 = vadd.xlane.f32.xlu1 %v5883_v20 }
0x1411   : > { %5890 = vadd.xlane.f32.xlu0 %v5889_v9  ;;  %v9822_v9 = vsub.s32 %v5942_v5, %v8477_v17 }
0x1412   : > { %5512 = vadd.xlane.f32.xlu1 %v5511_v26 }
0x1415   : > { %5896 = vadd.xlane.f32.xlu0 %v5895_v21 }
0x1416   : > { %5518 = vadd.xlane.f32.xlu1 %v5517_v3 }
0x1418   : > { %v4642_v55 = vpop.xlane.xlu0 %4641 }
0x1419   : > { %5893 = vadd.xlane.f32.xlu0 %v5892_v45 }
0x141a   : > { %5524 = vadd.xlane.f32.xlu1 %v5523_v61 }
0x141d   : > { %5899 = vadd.xlane.f32.xlu0 %v5898_v47 }
0x141e   : > { %5521 = vadd.xlane.f32.xlu1 %v5520_v4 }
0x1421   : > { %5902 = vadd.xlane.f32.xlu0 %v5901_v6 }
0x1422   : > { %5527 = vadd.xlane.f32.xlu1 %v5526_v14 }
0x1425   : > { %5515 = vadd.xlane.f32.xlu0 %v5514_v15 }
0x1426   : > { %5530 = vadd.xlane.f32.xlu1 %v5529_v49 }
0x1429   : > { %5153 = vadd.xlane.f32.xlu0 %v5152_v51 }
0x142a   : > { %5533 = vadd.xlane.f32.xlu1 %v5532_v39 }
0x142d   : > { %5905 = vadd.xlane.f32.xlu0 %v5904_v52 }
0x1436   : > { %v4639_v62 = vpop.xlane.xlu1 %4638 }
0x1437   : > { %8059 = vrcp.f32 %v4639_v62 }
0x143a   : > { %v5011_v22 = vpop.xlane.xlu1 %5010 }
0x143b   : > { %8061 = vrcp.f32 %v5011_v22 }
0x143c   : > { %8063 = vrcp.f32 %v4642_v55 }
0x143e   : > { %v5014_v60 = vpop.xlane.xlu0 %5013 }
0x143f   : > { %8065 = vrcp.f32 %v5014_v60 }
0x1441   : > { %v8060_v35 = vpop.eup %8059 }
0x1442   : > { %v9780_v59 = vpop.xlane.xlu1 %5390 }
0x1445   : > { %v8062_v31 = vpop.eup %8061 }
0x1446   : > { %v9782_v40 = vpop.xlane.xlu0 %5393  ;;  %v8064_v28 = vpop.eup %8063 }
0x1447   : > { %v9784_v1 = vpop.xlane.xlu1 %5762 }
0x1449   : > { %v8066_v8 = vpop.eup %8065 }
0x144a   : > { %v9786_v46 = vpop.xlane.xlu0 %5765 }
0x144b   : > { %v4645_v12 = vpop.xlane.xlu1 %4644 }
0x144c   : > { %8067 = vrcp.f32 %v4645_v12 }
0x144e   : > { %v5017_v56 = vpop.xlane.xlu0 %5016 }
0x144f   : > { %v9788_v7 = vpop.xlane.xlu1 %5396  ;;  %8069 = vrcp.f32 %v5017_v56 }
0x1452   : > { %v9790_v57 = vpop.xlane.xlu0 %5768 }
0x1453   : > { %v4648_v43 = vpop.xlane.xlu1 %4647 }
0x1454   : > { %8071 = vrcp.f32 %v4648_v43 }
0x1456   : > { %v5020_v33 = vpop.xlane.xlu0 %5019  ;;  %v8068_v3 = vpop.eup %8067 }
0x1457   : > { %v9792_v18 = vpop.xlane.xlu1 %5399  ;;  %8073 = vrcp.f32 %v5020_v33 }
0x1459   : > { %v8070_v61 = vpop.eup %8069 }
0x145a   : > { %v9794_v50 = vpop.xlane.xlu0 %5771 }
0x145b   : > { %v4651_v42 = vpop.xlane.xlu1 %4650 }
0x145c   : > { %8075 = vrcp.f32 %v4651_v42 }
0x145e   : > { %v5023_v58 = vpop.xlane.xlu0 %5022  ;;  %v8072_v49 = vpop.eup %8071 }
0x145f   : > { %v9796_v29 = vpop.xlane.xlu1 %5402  ;;  %8077 = vrcp.f32 %v5023_v58 }
0x1461   : > { %v8074_v39 = vpop.eup %8073 }
0x1462   : > { %v9798_v63 = vpop.xlane.xlu0 %5774 }
0x1463   : > { %v4654_v32 = vpop.xlane.xlu1 %4653 }
0x1464   : > { %8079 = vrcp.f32 %v4654_v32 }
0x1466   : > { %v5026_v36 = vpop.xlane.xlu0 %5025  ;;  %v8076_v12 = vpop.eup %8075 }
0x1467   : > { %v9800_v2 = vpop.xlane.xlu1 %5405  ;;  %8081 = vrcp.f32 %v5026_v36 }
0x1468   : > { %8083 = vrcp.f32 %v9780_v59 }
0x1469   : > { %v8078_v33 = vpop.eup %8077  ;;  %8085 = vrcp.f32 %v9784_v1 }
0x146a   : > { %v9802_v53 = vpop.xlane.xlu0 %5777  ;;  %8087 = vrcp.f32 %v9788_v7 }
0x146b   : > { %v9804_v44 = vpop.xlane.xlu1 %4656  ;;  %8089 = vrcp.f32 %v9790_v57 }
0x146c   : > { %8091 = vrcp.f32 %v9796_v29 }
0x146d   : > { %8093 = vrcp.f32 %v9798_v63 }
0x146e   : > { %v9806_v24 = vpop.xlane.xlu0 %5028  ;;  %8095 = vrcp.f32 %v9792_v18 }
0x146f   : > { %v9808_v23 = vpop.xlane.xlu1 %5408  ;;  %8097 = vrcp.f32 %v9794_v50 }
0x1470   : > { %8099 = vrcp.f32 %v9800_v2 }
0x1471   : > { %8101 = vrcp.f32 %v9802_v53 }
0x1472   : > { %v9810_v13 = vpop.xlane.xlu0 %5780  ;;  %8103 = vrcp.f32 %v9806_v24 }
0x1473   : > { %v9812_v41 = vpop.xlane.xlu1 %4659  ;;  %8105 = vrcp.f32 %v9782_v40 }
0x1474   : > { %8107 = vrcp.f32 %v9804_v44 }
0x1475   : > { %8109 = vrcp.f32 %v9786_v46 }
0x1476   : > { %v9814_v11 = vpop.xlane.xlu0 %5031 }
0x1477   : > { %v9816_v54 = vpop.xlane.xlu1 %5411 }
0x147a   : > { %v9818_v48 = vpop.xlane.xlu0 %5783 }
0x147b   : > { %v4761_v30 = vpop.xlane.xlu1 %4760 }
0x147c   : > { %v4791_v27 = vmul.f32 %v8060_v35, %v4761_v30  ;;  %v8080_v35 = vpop.eup %8079  ;;  %8111 = vrcp.f32 %v9808_v23 }
0x147d   : > { %v8082_v5 = vpop.eup %8081  ;;  %8113 = vrcp.f32 %v9812_v41 }
0x147e   : > { %v4764_v37 = vpop.xlane.xlu0 %4763  ;;  %v8084_v1 = vpop.eup %8083  ;;  %8115 = vrcp.f32 %v9814_v11 }
0x147f   : > { %v5133_v25 = vpop.xlane.xlu1 %5132  ;;  %v4792_v20 = vmul.f32 %v8064_v28, %v4764_v37 }
0x1480   : > { %v5163_v34 = vmul.f32 %v8062_v31, %v5133_v25 }
0x1482   : > { %v5171_v19 = vadd.f32 %v5163_v34, %v4791_v27  ;;  %v5136_v38 = vpop.xlane.xlu0 %5135 }
0x1483   : > { %v5164_v26 = vmul.f32 %v8066_v8, %v5136_v38  ;;  %v4767_v21 = vpop.xlane.xlu1 %4766 }
0x1484   : > { %v5946_v47 = vrot.slane %v5171_v19, %v9822_v9  ;;  %v4793_v6 = vmul.f32 %v8068_v3, %v4767_v21 }
0x1485   : > { %v5172_v45 = vadd.f32 %v5164_v26, %v4792_v20 }
0x1486   : > { %v5139_v16 = vpop.xlane.xlu0 %5138 }
0x1487   : > { %v5950_v4 = vrot.slane %v5172_v45, %v9822_v9  ;;  %v5165_v14 = vmul.f32 %v8070_v61, %v5139_v16  ;;  %v4770_v15 = vpop.xlane.xlu1 %4769  ;;  %v8086_v16 = vpop.eup %8085  ;;  %8117 = vrcp.f32 %v9810_v13 }
0x1488   : > { %v4794_v55 = vmul.f32 %v8072_v49, %v4770_v15  ;;  %v8088_v7 = vpop.eup %8087  ;;  %8119 = vrcp.f32 %v9816_v54 }
0x1489   : > { %v5976_v17 = vsel %vm5975_vm3, %v5950_v4, %v5946_v47  ;;  %v5173_v51 = vadd.f32 %v5165_v14, %v4793_v6  ;;  %v8090_v15 = vpop.eup %8089  ;;  %8121 = vrcp.f32 %v9818_v48 }
0x148a   : > { %v5142_v52 = vpop.xlane.xlu0 %5141 }
0x148b   : > { %v5954_v62 = vrot.slane %v5173_v51, %v9822_v9  ;;  %v5166_v22 = vmul.f32 %v8074_v39, %v5142_v52  ;;  %v4773_v60 = vpop.xlane.xlu1 %4772 }
0x148c   : > { %v4795_v32 = vmul.f32 %v8076_v12, %v4773_v60 }
0x148d   : > { %v5978_v56 = vsel %vm5977_vm4, %v5954_v62, %v5976_v17  ;;  %v5174_v43 = vadd.f32 %v5166_v22, %v4794_v55  ;;  %v8092_v17 = vpop.eup %8091 }
0x148e   : > { %v5145_v42 = vpop.xlane.xlu0 %5144  ;;  %v8094_v51 = vpop.eup %8093 }
0x148f   : > { %v5958_v58 = vrot.slane %v5174_v43, %v9822_v9  ;;  %v5167_v36 = vmul.f32 %v8078_v33, %v5145_v42  ;;  %v4776_v30 = vpop.xlane.xlu1 %4775  ;;  %v8096_v62 = vpop.eup %8095 }
0x1490   : > { %v4796_v34 = vmul.f32 %v8080_v35, %v4776_v30  ;;  %v8098_v55 = vpop.eup %8097 }
0x1491   : > { %v5980_v37 = vsel %vm5979_vm5, %v5958_v58, %v5978_v56  ;;  %v5175_v31 = vadd.f32 %v5167_v36, %v4795_v32  ;;  %v8100_v44 = vpop.eup %8099 }
0x1492   : > { %v5148_v25 = vpop.xlane.xlu0 %5147  ;;  %v8102_v46 = vpop.eup %8101 }
0x1493   : > { %v5962_v27 = vrot.slane %v5175_v31, %v9822_v9  ;;  %v5168_v28 = vmul.f32 %v8082_v5, %v5148_v25  ;;  %v9832_v8 = vpop.xlane.xlu1 %4778  ;;  %v8104_v43 = vpop.eup %8103 }
0x1494   : > { %v8106_v33 = vpop.eup %8105 }
0x1495   : > { %v5982_v19 = vsel %vm5981_vm6, %v5962_v27, %v5980_v37  ;;  %v5176_v38 = vadd.f32 %v5168_v28, %v4796_v34  ;;  %v8108_v32 = vpop.eup %8107 }
0x1496   : > { %v5151_v20 = vpop.xlane.xlu0 %5150  ;;  %v8110_v11 = vpop.eup %8109  ;;  %v4797_v36 = vmul.f32 %v8108_v32, %v9832_v8 }
0x1497   : > { %v5966_v26 = vrot.slane %v5176_v38, %v9822_v9  ;;  %v9838_v21 = vpop.xlane.xlu1 %4781  ;;  %v5169_v42 = vmul.f32 %v8104_v43, %v5151_v20  ;;  %v8112_v5 = vpop.eup %8111 }
0x1498   : > { %v8114_v27 = vpop.eup %8113 }
0x1499   : > { %v9843_v3 = vsel %vm5983_vm7, %v5966_v26, %v5982_v19  ;;  %v5177_v25 = vadd.f32 %v5169_v42, %v4797_v36  ;;  %v8116_v34 = vpop.eup %8115  ;;  %v4798_v38 = vmul.f32 %v8114_v27, %v9838_v21  ;;  %v6694_v42 = vld [vmem:[%s9946_s12] ss:$0 sm:$0xff] }
0x149a   : > { %v5888_v45 = vpop.xlane.xlu0 %5887  ;;  %v8118_v48 = vpop.eup %8117 }
0x149b   : > { %v5885_v59 = vpop.xlane.xlu1 %5884  ;;  %v5916_v13 = vmul.f32 %v8110_v11, %v5888_v45  ;;  %v5970_v45 = vrot.slane %v5177_v25, %v9822_v9 }
0x149c   : > { %v5915_v4 = vmul.f32 %v8086_v16, %v5885_v59  ;;  %v8120_v16 = vpop.eup %8119 }
0x149e   : > { %v5891_v61 = vpop.xlane.xlu0 %5890 }
0x149f   : > { %v5513_v47 = vpop.xlane.xlu1 %5512  ;;  %v5917_v63 = vmul.f32 %v8090_v15, %v5891_v61 }
0x14a0   : > { %v5543_v6 = vmul.f32 %v8084_v1, %v5513_v47 }
0x14a2   : > { %v9849_v57 = vadd.f32 %v5915_v4, %v5543_v6  ;;  %v5897_v14 = vpop.xlane.xlu0 %5896  ;;  %v8122_v6 = vpop.eup %8121 }
0x14a3   : > { %v5519_v29 = vpop.xlane.xlu1 %5518  ;;  %v5919_v2 = vmul.f32 %v8094_v51, %v5897_v14 }
0x14a4   : > { %v5545_v49 = vmul.f32 %v8088_v7, %v5519_v29  ;;  %v6106_v20 = vrot.slane %v9849_v57, %v9822_v9 }
0x14a6   : > { %v9855_v18 = vadd.f32 %v5917_v63, %v5545_v49  ;;  %v5894_v50 = vpop.xlane.xlu0 %5893 }
0x14a7   : > { %v5525_v39 = vpop.xlane.xlu1 %5524  ;;  %v5918_v22 = vmul.f32 %v8098_v55, %v5894_v50  ;;  %v5986_v50 = vsel %vm5985_vm8, %v5970_v45, %v9843_v3 }
0x14a8   : > { %v5547_v52 = vmul.f32 %v8092_v17, %v5525_v39  ;;  %v6114_v59 = vrot.slane %v9855_v18, %v9822_v9 }
0x14aa   : > { %v9860_v53 = vadd.f32 %v5919_v2, %v5547_v52  ;;  %v5900_v24 = vpop.xlane.xlu0 %5899 }
0x14ab   : > { %v5522_v40 = vpop.xlane.xlu1 %5521  ;;  %v5920_v41 = vmul.f32 %v8102_v46, %v5900_v24  ;;  %v6263_v46 = vstv %s6691_s25  ;;  %s8167_s25 = smov 120  }
0x14ac   : > { %v5546_v60 = vmul.f32 %v8096_v62, %v5522_v40  ;;  %v6122_v7 = vrot.slane %v9860_v53, %v9822_v9 }
0x14ae   : > { %v5926_v12 = vadd.f32 %v5918_v22, %v5546_v60  ;;  %v5903_v56 = vpop.xlane.xlu0 %5902 }
0x14af   : > { %v5528_v23 = vpop.xlane.xlu1 %5527  ;;  %v5921_v1 = vmul.f32 %v8118_v48, %v5903_v56 }
0x14b0   : > { %v5548_v58 = vmul.f32 %v8100_v44, %v5528_v23  ;;  %v6118_v47 = vrot.slane %v5926_v12, %v9822_v9  ;;  %v8124_v12 = vld [vmem:[%s8304_s22] sm:$0xff]  ;;  %s8161_s22 = smov 2  }
0x14b2   : > { %v5928_v30 = vadd.f32 %v5920_v41, %v5548_v58  ;;  %v5516_v35 = vpop.xlane.xlu0 %5515  ;;  %v6695_v58 = vld [vmem:[%s9946_s12 + $0x2] ss:$0 sm:$0xff] }
0x14b3   : > { %v5544_v37 = vmul.f32 %v8106_v33, %v5516_v35  ;;  %v5531_v31 = vpop.xlane.xlu1 %5530 }
0x14b4   : > { %v5549_v28 = vmul.f32 %v8112_v5, %v5531_v31  ;;  %v6126_v57 = vrot.slane %v5928_v30, %v9822_v9 }
0x14b5   : > { %v5924_v54 = vadd.f32 %v5916_v13, %v5544_v37 }
0x14b6   : > { %v5154_v19 = vpop.xlane.xlu0 %5153  ;;  %v5929_v15 = vadd.f32 %v5921_v1, %v5549_v28 }
0x14b7   : > { %v6110_v8 = vrot.slane %v5924_v54, %v9822_v9  ;;  %v5170_v26 = vmul.f32 %v8116_v34, %v5154_v19  ;;  %v5534_v61 = vpop.xlane.xlu1 %5533 }
0x14b8   : > { %v5550_v17 = vmul.f32 %v8120_v16, %v5534_v61  ;;  %v6130_v62 = vrot.slane %v5929_v15, %v9822_v9 }
0x14b9   : > { %v6135_v4 = vsel %vm5975_vm3, %v6110_v8, %v6106_v20  ;;  %v5178_v21 = vadd.f32 %v5170_v26, %v4798_v38 }
0x14ba   : > { %v6136_v14 = vsel %vm5977_vm4, %v6114_v59, %v6135_v4  ;;  %v5906_v29 = vpop.xlane.xlu0 %5905 }
0x14bb   : > { %v6137_v63 = vsel %vm5979_vm5, %v6118_v47, %v6136_v14  ;;  %v5974_v49 = vrot.slane %v5178_v21, %v9822_v9  ;;  %v5922_v18 = vmul.f32 %v8122_v6, %v5906_v29  ;;  %v6448_v6 = vld [vmem:[%s9947_s13] sm:$0xff] }
0x14bc   : > { %v6138_v51 = vsel %vm5981_vm6, %v6122_v7, %v6137_v63  ;;  %v6455_v7 = vld [vmem:[%s9948_s14] sm:$0xff] }
0x14bd   : > { %v5930_v39 = vadd.f32 %v5922_v18, %v5550_v17  ;;  %v5988_v2 = vsel %vm5987_vm9, %v5974_v49, %v5986_v50  ;;  %v6139_v52 = vsel %vm5983_vm7, %v6126_v57, %v6138_v51  ;;  %v6373_v57 = vld [vmem:[%s9945_s11 + $0x8] sm:$0xff] }
0x14be   : > { %5990 = vxpose.xlu1.b32.start.end [1/1] (short) (narrow) %v5988_v2, 8  ;;  %v6140_v24 = vsel %vm5985_vm8, %v6130_v62, %v6139_v52 }
0x14bf   : > { %v6134_v53 = vrot.slane %v5930_v39, %v9822_v9  ;;  %v6254_v9 = vstv %s5931_s24  ;;  %s8166_s24 = smov 126  }
0x14c1   : > { %v6141_v55 = vsel %vm5987_vm9, %v6134_v53, %v6140_v24 }
0x14c2   : > { %6143 = vxpose.xlu0.b32.start.end [1/1] (short) (narrow) %v6141_v55, 8 }
0x153e   : > { %v6006_v40 = vpop.trf.xlu1 }
0x153f   : > { %7534 = vmatmul.mubr.msk.f32.vlgmr.msra.gmra.mrb[42].mxu0 %vm553_vm1, %v6006_v40 }
0x1540   : > { %6696 = vmatprep.mubr.msk.f32.mxu0 %vm6374_vm13, %v6373_v57 }
0x1542   : > { %v6159_v3 = vpop.trf.xlu0 }
0x1543   : > { %7539 = vmatmul.mubr.msk.f32.vlgmr.msra.gmra.mrb[44].mxu1 %vm553_vm1, %v6159_v3 }
0x1612   : > { %v6091_v22 = vpop.f32.mrb[42].mxu0 }
0x1613   : > { %v6255_v60 = vmul.f32 %v6254_v9, %v6091_v22  ;;  %v7535_v44 = vpop.f32.mrb[43].mxu0 }
0x1615   : > { %v6256_v56 = vadd.f32 %v8124_v12, %v6255_v60 }
0x1616   : > { %v6244_v43 = vpop.f32.mrb[44].mxu1 }
0x1617   : > { %v6264_v23 = vmul.f32 %v6263_v46, %v6244_v43  ;;  %v7540_v33 = vpop.f32.mrb[45].mxu1  ;;  %6258 = vrot.lane.b32.xlu0 %v6256_v56, %s8159_s26 }
0x1619   : > { %v6265_v41 = vadd.f32 %v8125_v0, %v6264_v23 }
0x161b   : > { %6267 = vrot.lane.b32.xlu1 %v6265_v41, %s8159_s26  ;;  %6302 = vrot.lane.b32.xlu0 %v6694_v42, %s8160_s28  ;;  %s8168_s26 = smov 119   ;;  %s8171_s28 = smov 111  }
0x161f   : > { %6286 = vrot.lane.b32.xlu1 %v6695_v58, %s8161_s22 }
0x1623   : > { %6292 = vrot.lane.b32.xlu1 %v6694_v42, %s8162_s20 }
0x1627   : > { %6297 = vrot.lane.b32.xlu1 %v6695_v58, %s8163_s21 }
0x162b   : > { %6307 = vrot.lane.b32.xlu1 %v6695_v58, %s8164_s23 }
0x1689   : > { %v6259_v32 = vpop.permute.xlu0 %6258 }
0x168a   : > { %6262 = vst.msk [vmem:[#allocation2] sm:$0xff] %vm6261_vm12, %v6259_v32  ;;  %v6372_v32 = vld [vmem:[%s9945_s11] sm:$0xff] }
0x168d   : > { %v6268_v11 = vpop.permute.xlu1 %6267  ;;  %v6303_v19 = vpop.permute.xlu0 %6302 }
0x168e   : > { %6270 = vst.msk [vmem:[#allocation2 + $0x8] sm:$0xff] %vm6261_vm12, %v6268_v11 }
0x1691   : > { %v6287_v36 = vpop.permute.xlu1 %6286  ;;  %v6271_v30 = vld [vmem:[#allocation2] sm:$0xff] }
0x1692   : > { %v6289_v35 = vmul.f32 %v6287_v36, %v6271_v30  ;;  %v6278_v31 = vmul.f32 %v6694_v42, %v6271_v30  ;;  %v6305_v45 = vmul.f32 %v6303_v19, %v6271_v30 }
0x1695   : > { %v6272_v13 = vld [vmem:[#allocation2 + $0x8] sm:$0xff]  ;;  %v6293_v37 = vpop.permute.xlu1 %6292 }
0x1696   : > { %v6290_v5 = vmul.f32 %v6287_v36, %v6272_v13  ;;  %v6295_v25 = vmul.f32 %v6293_v37, %v6271_v30  ;;  %v6296_v27 = vmul.f32 %v6293_v37, %v6272_v13  ;;  %v7907_v54 = vpack.i.bf16 %v6272_v13, %v6271_v30 }
0x1697   : > { %v6279_v34 = vmul.f32 %v6694_v42, %v6272_v13  ;;  %v6306_v59 = vmul.f32 %v6303_v19, %v6272_v13 }
0x1698   : > { %v7912_v28 = vpack.i.bf16 %v6290_v5, %v6289_v35  ;;  %7908 = vrot.lane.b32.xlu0 %v7907_v54, %s8165_s30  ;;  %v7917_v20 = vpack.i.bf16 %v6296_v27, %v6295_v25 }
0x1699   : > { %v6298_v48 = vpop.permute.xlu1 %6297  ;;  %v7830_v38 = vpack.c.bf16 %v6279_v34, %v6278_v31  ;;  %v7932_v16 = vpack.i.bf16 %v6306_v59, %v6305_v45 }
0x169a   : > { %7913 = vrot.lane.b32.xlu1 %v7912_v28, %s8166_s24  ;;  %v6300_v8 = vmul.f32 %v6298_v48, %v6271_v30  ;;  %v6301_v26 = vmul.f32 %v6298_v48, %v6272_v13 }
0x169b   : > { %7831 = vmatpush1.bf16.msra.mxu0 %v7830_v38 }
0x169c   : > { %7832 = vmatprep.subr.bf16.mxu0 %v8157_v10  ;;  %7918 = vrot.lane.b32.xlu0 %v7917_v20, %s8167_s25  ;;  %v7927_v61 = vpack.i.bf16 %v6301_v26, %v6300_v8 }
0x169d   : > { %v6308_v1 = vpop.permute.xlu1 %6307 }
0x169e   : > { %7923 = vrot.lane.b32.xlu1 %v7907_v54, %s8168_s26  ;;  %v6310_v47 = vmul.f32 %v6308_v1, %v6271_v30  ;;  %v6311_v4 = vmul.f32 %v6308_v1, %v6272_v13 }
0x16a0   : > { %7928 = vrot.lane.b32.xlu0 %v7927_v61, %s8169_s19  ;;  %v7942_v21 = vpack.i.bf16 %v6311_v4, %v6310_v47 }
0x16a2   : > { %7933 = vrot.lane.b32.xlu1 %v7932_v16, %s8170_s27  ;;  %s520_s27 = scalar_lea.vmem %s9949_s15, %s8298_s17 }
0x16a4   : > { %7938 = vrot.lane.b32.xlu0 %v7907_v54, %s8171_s28 }
0x16a6   : > { %7943 = vrot.lane.b32.xlu1 %v7942_v21, %s8172_s29 }
0x16a8   : > { %6451 = vperm.xlu0 %7905, %v6448_v6  }
0x16aa   : > { %6458 = vperm.xlu1 %7906, %v6455_v7  }
0x170a   : > { %v7909_v14 = vpop.permute.xlu0 %7908 }
0x170b   : > { %v7911_v15 = vunpack.i.h.bf16 %v7909_v14  ;;  %v7910_v29 = vunpack.i.l.bf16 %v7909_v14 }
0x170c   : > { %v7914_v63 = vpop.permute.xlu1 %7913 }
0x170d   : > { %v7833_v49 = vpack.c.bf16 %v7911_v15, %v7910_v29  ;;  %v7916_v17 = vunpack.i.h.bf16 %v7914_v63  ;;  %v7915_v18 = vunpack.i.l.bf16 %v7914_v63 }
0x170e   : > { %v7919_v50 = vpop.permute.xlu0 %7918 }
0x170f   : > { %7834 = vmatpush1.bf16.msra.mxu0 %v7833_v49  ;;  %v7836_v51 = vpack.c.bf16 %v7916_v17, %v7915_v18  ;;  %v7921_v39 = vunpack.i.h.bf16 %v7919_v50  ;;  %v7920_v2 = vunpack.i.l.bf16 %v7919_v50 }
0x1710   : > { %7835 = vmatprep.subr.bf16.mxu0 %v8157_v10  ;;  %v7924_v52 = vpop.permute.xlu1 %7923 }
0x1711   : > { %v7839_v62 = vpack.c.bf16 %v7921_v39, %v7920_v2  ;;  %v7926_v53 = vunpack.i.h.bf16 %v7924_v52  ;;  %v7925_v24 = vunpack.i.l.bf16 %v7924_v52 }
0x1712   : > { %v7929_v55 = vpop.permute.xlu0 %7928 }
0x1713   : > { %7837 = vmatpush1.bf16.msra.mxu0 %v7836_v51  ;;  %v7842_v40 = vpack.c.bf16 %v7926_v53, %v7925_v24  ;;  %v7931_v3 = vunpack.i.h.bf16 %v7929_v55  ;;  %v7930_v9 = vunpack.i.l.bf16 %v7929_v55 }
0x1714   : > { %7838 = vmatprep.subr.bf16.mxu0 %v8157_v10  ;;  %v7934_v22 = vpop.permute.xlu1 %7933 }
0x1715   : > { %v7845_v60 = vpack.c.bf16 %v7931_v3, %v7930_v9  ;;  %v7936_v44 = vunpack.i.h.bf16 %v7934_v22  ;;  %v7935_v46 = vunpack.i.l.bf16 %v7934_v22 }
0x1716   : > { %v7939_v12 = vpop.permute.xlu0 %7938 }
0x1717   : > { %7840 = vmatpush1.bf16.msra.mxu0 %v7839_v62  ;;  %v7848_v56 = vpack.c.bf16 %v7936_v44, %v7935_v46  ;;  %v7941_v43 = vunpack.i.h.bf16 %v7939_v12  ;;  %v7940_v23 = vunpack.i.l.bf16 %v7939_v12 }
0x1718   : > { %7841 = vmatprep.subr.bf16.mxu0 %v8157_v10  ;;  %v7944_v33 = vpop.permute.xlu1 %7943 }
0x1719   : > { %v7851_v42 = vpack.c.bf16 %v7941_v43, %v7940_v23  ;;  %v7946_v0 = vunpack.i.h.bf16 %v7944_v33  ;;  %v7945_v41 = vunpack.i.l.bf16 %v7944_v33 }
0x171b   : > { %7843 = vmatpush1.bf16.msra.mxu0 %v7842_v40  ;;  %v7854_v58 = vpack.c.bf16 %v7946_v0, %v7945_v41 }
0x171c   : > { %7844 = vmatprep.subr.bf16.mxu0 %v8157_v10 }
0x171f   : > { %7846 = vmatpush1.bf16.msra.mxu0 %v7845_v60 }
0x1720   : > { %7847 = vmatprep.subr.bf16.mxu0 %v8157_v10 }
0x1723   : > { %7849 = vmatpush1.bf16.msra.mxu0 %v7848_v56 }
0x1724   : > { %7850 = vmatprep.subr.bf16.mxu0 %v8157_v10 }
0x1727   : > { %7852 = vmatpush1.bf16.msra.mxu0 %v7851_v42  ;;  %v6452_v11 = vpop.permute.xlu0 %6451 }
0x1728   : > { %7853 = vmatprep.subr.bf16.mxu0 %v8157_v10 }
0x1729   : > { %v6459_v13 = vpop.permute.xlu1 %6458 }
0x172b   : > { %7855 = vmatpush1.bf16.msra.mxu0 %v7854_v58 }
0x172e   : > { %6443 = vmatmul.mubr.f32.vlgmr.msra.gmra.mrb[44].mxu0 %v6372_v32 }
0x1801   : > { %v6444_v36 = vpop.f32.mrb[44].mxu0 }
0x1802   : > { %v6454_v30 = vmul.f32 %v6452_v11, %v6444_v36  ;;  %v6446_v35 = vpop.f32.mrb[45].mxu0 }
0x1804   : > { %v6461_v37 = vadd.f32 %v6459_v13, %v6454_v30 }
0x1806   : > { %v6462_v31 = vmax.f32 %v6461_v37, 0.0 }
0x1808   : > { %6463 = vst.msk [vmem:[%s520_s27] sm:$0xff] %vm753_vm2, %v6462_v31 }
0x1809 PF: > { %s26_s18 = sadd.s32 1, %s8151_s18  }
0x180a   : > { %p23_p1 = scmp.ge.s32.totalorder %s26_s18, 4  }
0x180c   :  { %25 = sbr.rel (!%p23_p1) target bundleno = 1 (0x1), region = 128 }
0x1813   :  { %6483 = vsyncpa [#allocation4], 1 }
0x1814   :  { %6485 = vsyncpa [#allocation4 + $0x1], 1 }

</bundles_post_ra>
